<compile_context>
chip_gen: v6e
topology: v6e:2x2x1
jax: 0.10.0
libtpu: 0.0.40
codegen_flags: <defaults>
</compile_context>

<pallas_src>
import functools
import math

import jax
import jax.numpy as jnp
from jax.experimental import pallas as pl
from jax.experimental.pallas import tpu as pltpu

LN_EPS = 1e-5


def _layernorm(y, gamma, beta):
    mu = jnp.mean(y, axis=-1, keepdims=True)
    var = jnp.mean((y - mu) ** 2, axis=-1, keepdims=True)
    return (y - mu) * jax.lax.rsqrt(var + LN_EPS) * gamma + beta


def _transformer_kernel(nhead,
                        x_ref,
                        wqkv_ref, bqkv_ref,
                        wo_ref, bo_ref,
                        g1_ref, be1_ref,
                        w1_ref, b1_ref,
                        w2_ref, b2_ref,
                        g2_ref, be2_ref,
                        o_ref,
                        ctx_ref):
    Bt, S, D = x_ref.shape
    dh = D // nhead
    cdt = wqkv_ref.dtype            # bf16 MXU-input dtype
    R = Bt * S                      # flattened row count for the dense matmuls

    # Hoist parameter loads once per grid step.
    bqkv = bqkv_ref[...]
    bo = bo_ref[...]
    g1, be1 = g1_ref[...], be1_ref[...]
    b1, b2 = b1_ref[...], b2_ref[...]
    g2, be2 = g2_ref[...], be2_ref[...]

    x = x_ref[...].reshape(R, D).astype(jnp.float32)       # (Bt*S, D)

    # --- fused QKV projection: one (R, D) x (D, 3D) MXU op, f32 accumulate ---
    # 1/sqrt(dh) is pre-folded into the q columns of wqkv_t / bqkv at init, so
    # no score scaling is needed later.  Cast to bf16 ONCE for all attention
    # matmul feeds.
    qkv = (jnp.dot(x.astype(cdt), wqkv_ref[...],
                   preferred_element_type=jnp.float32) + bqkv).astype(cdt)

    # 128-lane head grouping: process 128//dh heads together and emit a single
    # unmasked 128-lane store per group into the bf16 ctx scratch.
    if dh >= 128:
        hpg = 1
    elif (128 % dh == 0) and (nhead % (128 // dh) == 0):
        hpg = 128 // dh
    else:
        hpg = 1        # sub-128 masked stores; still correct, just slower
    gw = hpg * dh

    for b in range(Bt):
        rows = slice(b * S, (b + 1) * S)
        for g in range(nhead // hpg):
            q_g = qkv[rows, g * gw:(g + 1) * gw]                       # (S, gw)
            k_g = qkv[rows, D + g * gw:D + (g + 1) * gw]
            v_g = qkv[rows, 2 * D + g * gw:2 * D + (g + 1) * gw]
            outs = []
            for h in range(hpg):
                hsl = slice(h * dh, (h + 1) * dh)
                qh, kh, vh = q_g[:, hsl], k_g[:, hsl], v_g[:, hsl]     # bf16
                s = jax.lax.dot_general(qh, kh, (((1,), (1,)), ((), ())),
                                        preferred_element_type=jnp.float32)
                s = s - jnp.max(s, axis=-1, keepdims=True)
                p = jnp.exp(s)
                inv = pl.reciprocal(jnp.sum(p, axis=-1, keepdims=True),
                                    approx=True)
                # Fold normalisation into the (S, dh) context, not (S, S) probs.
                c = jnp.dot(p.astype(cdt), vh,
                            preferred_element_type=jnp.float32) * inv
                outs.append(c.astype(cdt))
            ctx_ref[rows, g * gw:(g + 1) * gw] = (
                outs[0] if hpg == 1 else jnp.concatenate(outs, axis=-1))

    # --- output projection (ctx scratch is already bf16: no cast needed) ---
    attn_out = jnp.dot(ctx_ref[...], wo_ref[...],
                       preferred_element_type=jnp.float32) + bo

    # --- residual + LayerNorm 1 ---
    y = _layernorm(x + attn_out, g1, be1)

    # --- feed-forward: linear1 -> ReLU -> linear2 ---
    h1 = jnp.dot(y.astype(cdt), w1_ref[...],
                 preferred_element_type=jnp.float32) + b1
    h1 = jnp.maximum(h1, 0.0)
    ff = jnp.dot(h1.astype(cdt), w2_ref[...],
                 preferred_element_type=jnp.float32) + b2

    # --- residual + LayerNorm 2 ---
    out = _layernorm(y + ff, g2, be2)

    o_ref[...] = out.reshape(Bt, S, D).astype(o_ref.dtype)


def _vmem_limit_bytes():
    # Derive the scoped VMEM budget from the chip; if the query fails, default
    # per-generation (128 MiB on v5e/v6e, 64 MiB on v7x) instead of a blanket
    # 64 MiB that would needlessly cap v5e/v6e.  Keep 25% headroom.
    try:
        cap = pltpu.get_tpu_info().vmem_capacity_bytes
    except Exception:
        kind = ""
        try:
            kind = jax.devices()[0].device_kind.lower()
        except Exception:
            pass
        cap = (128 if ("v5" in kind or "v6" in kind) else 64) * 1024 * 1024
    return int(cap * 3 // 4)


def _pick_batch_block(B, S, max_rows=256):
    """Largest batch block Bt (divisor of B) with Bt*S <= max_rows, preferring
    an MXU-filling M (>=128 rows) and an even grid extent (v7x has 2 TCs)."""
    divs = [d for d in range(1, B + 1) if B % d == 0 and d * S <= max_rows]
    if not divs:
        return 1
    for pred in (lambda d: d * S >= 128 and (B // d) % 2 == 0,
                 lambda d: (B // d) % 2 == 0,
                 lambda d: True):
        cand = [d for d in divs if pred(d)]
        if cand:
            return max(cand)
    return max(divs)


def transformer_block(x, params, nhead, *, batch_block=None,
                      single_buffer_weights=True):
    B, S, D = x.shape
    assert D % nhead == 0, "d_model must be divisible by nhead"
    cdt = params["wqkv_t"].dtype
    Bt = batch_block if batch_block is not None else _pick_batch_block(B, S)
    assert B % Bt == 0, "batch_block must divide the batch size"

    ordered = [
        params["wqkv_t"], params["bqkv"],
        params["wo_t"], params["bo"],
        params["g1"], params["be1"],
        params["w1_t"], params["b1"],
        params["w2_t"], params["b2"],
        params["g2"], params["be2"],
    ]

    def param_spec(arr):
        nd = arr.ndim
        idx_map = lambda b, _nd=nd: (0,) * _nd
        if single_buffer_weights:
            # Constant block index across the grid -> single-buffer the weight
            # (default double-buffering just doubles its VMEM footprint).
            return pl.BlockSpec(arr.shape, idx_map, pipeline_mode=pl.Buffered(1))
        return pl.BlockSpec(arr.shape, idx_map)

    in_specs = [pl.BlockSpec((Bt, S, D), lambda b: (b, 0, 0))]
    in_specs += [param_spec(a) for a in ordered]

    kernel = functools.partial(_transformer_kernel, nhead)

    return pl.pallas_call(
        kernel,
        out_shape=jax.ShapeDtypeStruct((B, S, D), x.dtype),
        grid_spec=pltpu.PrefetchScalarGridSpec(
            num_scalar_prefetch=0,
            grid=(B // Bt,),
            in_specs=in_specs,
            out_specs=pl.BlockSpec((Bt, S, D), lambda b: (b, 0, 0)),
            scratch_shapes=[pltpu.VMEM((Bt * S, D), cdt)],   # bf16 ctx scratch
        ),
        compiler_params=pltpu.CompilerParams(
            dimension_semantics=("parallel",),
            vmem_limit_bytes=_vmem_limit_bytes(),
        ),
    )(x, *ordered)


def init_params(key, d_model, nhead, dim_feedforward, weight_dtype=jnp.bfloat16):
    """Returns (kernel_params, raw_f32_params).

    raw:    PyTorch-layout f32 weights (W is (out, in); y = x @ W.T + b).
    kernel: fused / pre-transposed / scale-folded, big matrices in bf16.
    """
    ks = jax.random.split(key, 12)
    sc = 0.1

    def rn(k, shape):
        return (sc * jax.random.normal(k, shape)).astype(jnp.float32)

    dh = d_model // nhead
    scale = 1.0 / math.sqrt(dh)

    wq = rn(ks[0], (d_model, d_model))
    wk = rn(ks[1], (d_model, d_model))
    wv = rn(ks[2], (d_model, d_model))
    wo = rn(ks[3], (d_model, d_model))
    w1 = rn(ks[4], (dim_feedforward, d_model))
    w2 = rn(ks[5], (d_model, dim_feedforward))
    bq = rn(ks[6], (d_model,))
    bk = rn(ks[7], (d_model,))
    bv = rn(ks[8], (d_model,))
    bo = rn(ks[9], (d_model,))
    b1 = rn(ks[10], (dim_feedforward,))
    b2 = rn(ks[11], (d_model,))
    g1 = jnp.ones((d_model,), jnp.float32)
    be1 = jnp.zeros((d_model,), jnp.float32)
    g2 = jnp.ones((d_model,), jnp.float32)
    be2 = jnp.zeros((d_model,), jnp.float32)

    raw = dict(wq=wq, wk=wk, wv=wv, wo=wo, w1=w1, w2=w2,
               bq=bq, bk=bk, bv=bv, bo=bo, b1=b1, b2=b2,
               g1=g1, be1=be1, g2=g2, be2=be2)

    kparams = {
        # Fused, pre-transposed QKV weight with 1/sqrt(dh) folded into the q
        # columns: x @ wqkv_t == [q*scale | k | v].
        "wqkv_t": jnp.concatenate([wq.T * scale, wk.T, wv.T],
                                  axis=1).astype(weight_dtype),
        "bqkv": jnp.concatenate([bq * scale, bk, bv]).reshape(1, 3 * d_model),
        "wo_t": wo.T.astype(weight_dtype),
        "bo": bo.reshape(1, d_model),
        "g1": g1.reshape(1, d_model),
        "be1": be1.reshape(1, d_model),
        "w1_t": w1.T.astype(weight_dtype),
        "b1": b1.reshape(1, dim_feedforward),
        "w2_t": w2.T.astype(weight_dtype),
        "b2": b2.reshape(1, d_model),
        "g2": g2.reshape(1, d_model),
        "be2": be2.reshape(1, d_model),
    }
    return kparams, raw


def reference_forward(x, raw, nhead):
    """Pure-f32 reference of nn.TransformerEncoderLayer (eval mode, post-norm,
    ReLU, batch_first) from the raw unfused / unfolded weights."""
    B, S, D = x.shape
    dh = D // nhead
    hi = jax.lax.Precision.HIGHEST

    def lin(z, w, b):
        return jnp.dot(z, w.T, precision=hi) + b

    q = lin(x, raw["wq"], raw["bq"])
    k = lin(x, raw["wk"], raw["bk"])
    v = lin(x, raw["wv"], raw["bv"])
    qh = q.reshape(B, S, nhead, dh).transpose(0, 2, 1, 3)
    kh = k.reshape(B, S, nhead, dh).transpose(0, 2, 1, 3)
    vh = v.reshape(B, S, nhead, dh).transpose(0, 2, 1, 3)
    s = jnp.einsum("bhsd,bhtd->bhst", qh, kh, precision=hi) / math.sqrt(dh)
    a = jax.nn.softmax(s, axis=-1)
    ctx = jnp.einsum("bhst,bhtd->bhsd", a, vh,
                     precision=hi).transpose(0, 2, 1, 3).reshape(B, S, D)
    attn_out = lin(ctx, raw["wo"], raw["bo"])

    def ln(y, g, b):
        mu = y.mean(-1, keepdims=True)
        var = ((y - mu) ** 2).mean(-1, keepdims=True)
        return (y - mu) / jnp.sqrt(var + LN_EPS) * g + b

    y = ln(x + attn_out, raw["g1"], raw["be1"])
    h1 = jnp.maximum(lin(y, raw["w1"], raw["b1"]), 0.0)
    ff = lin(h1, raw["w2"], raw["b2"])
    return ln(y + ff, raw["g2"], raw["be2"])


if __name__ == "__main__":
    # Small, lane/sublane-aligned demo shapes: D % 128 == 0, S % 8 == 0.
    B, S, D = 4, 16, 128
    NHEAD = 4                 # head dim 32 -> 4 heads per 128-lane group
    DFF = 256

    key = jax.random.PRNGKey(0)
    k_x, k_p = jax.random.split(key)
    x = jax.random.normal(k_x, (B, S, D), dtype=jnp.float32)
    kparams, raw = init_params(k_p, D, NHEAD, DFF)

    try:
        out = jax.block_until_ready(transformer_block(x, kparams, NHEAD))
    except Exception:
        # Fallback if this jax build rejects single-buffered (Buffered(1)) specs.
        out = jax.block_until_ready(
            transformer_block(x, kparams, NHEAD, single_buffer_weights=False))

    ref = jax.block_until_ready(reference_forward(x, raw, NHEAD))
    assert out.shape == (B, S, D)
    # Tolerance covers bf16 weights + bf16 MXU activation feeds + approximate
    # reciprocal in the softmax normalisation vs. the exact f32 reference.
    assert bool(jnp.all(jnp.isfinite(out)))
    assert jnp.allclose(out, ref, rtol=5e-2, atol=5e-2), "mismatch vs f32 reference"

    print("KERNEL_OK")
</pallas_src>

<mosaic_0001>
module attributes {stable_mosaic.version = 11 : i64} {
  func.func @_transformer_kernel(%arg0: i32, %arg1: memref<2x16x128xf32, #tpu.memory_space<vmem>>, %arg2: memref<128x384xbf16, #tpu.memory_space<vmem>>, %arg3: memref<1x384xf32, #tpu.memory_space<vmem>>, %arg4: memref<128x128xbf16, #tpu.memory_space<vmem>>, %arg5: memref<1x128xf32, #tpu.memory_space<vmem>>, %arg6: memref<1x128xf32, #tpu.memory_space<vmem>>, %arg7: memref<1x128xf32, #tpu.memory_space<vmem>>, %arg8: memref<128x256xbf16, #tpu.memory_space<vmem>>, %arg9: memref<1x256xf32, #tpu.memory_space<vmem>>, %arg10: memref<256x128xbf16, #tpu.memory_space<vmem>>, %arg11: memref<1x128xf32, #tpu.memory_space<vmem>>, %arg12: memref<1x128xf32, #tpu.memory_space<vmem>>, %arg13: memref<1x128xf32, #tpu.memory_space<vmem>>, %arg14: memref<2x16x128xf32, #tpu.memory_space<vmem>>, %arg15: memref<32x128xbf16, #tpu.memory_space<vmem>>) attributes {dimension_semantics = [#tpu.dimension_semantics<parallel>], iteration_bounds = array<i64: 2>, scalar_prefetch = 0 : i64, scratch_operands = 1 : i64, tpu.core_type = #tpu.core_type<tc>, window_params = [{transform_indices = @transform_0, window_bounds = array<i64: 2, 16, 128>}, {pipeline_mode = #tpu.pipeline_mode<synchronous>, transform_indices = @transform_1, window_bounds = array<i64: 128, 384>}, {pipeline_mode = #tpu.pipeline_mode<synchronous>, transform_indices = @transform_2, window_bounds = array<i64: 1, 384>}, {pipeline_mode = #tpu.pipeline_mode<synchronous>, transform_indices = @transform_3, window_bounds = array<i64: 128, 128>}, {pipeline_mode = #tpu.pipeline_mode<synchronous>, transform_indices = @transform_4, window_bounds = array<i64: 1, 128>}, {pipeline_mode = #tpu.pipeline_mode<synchronous>, transform_indices = @transform_5, window_bounds = array<i64: 1, 128>}, {pipeline_mode = #tpu.pipeline_mode<synchronous>, transform_indices = @transform_6, window_bounds = array<i64: 1, 128>}, {pipeline_mode = #tpu.pipeline_mode<synchronous>, transform_indices = @transform_7, window_bounds = array<i64: 128, 256>}, {pipeline_mode = #tpu.pipeline_mode<synchronous>, transform_indices = @transform_8, window_bounds = array<i64: 1, 256>}, {pipeline_mode = #tpu.pipeline_mode<synchronous>, transform_indices = @transform_9, window_bounds = array<i64: 256, 128>}, {pipeline_mode = #tpu.pipeline_mode<synchronous>, transform_indices = @transform_10, window_bounds = array<i64: 1, 128>}, {pipeline_mode = #tpu.pipeline_mode<synchronous>, transform_indices = @transform_11, window_bounds = array<i64: 1, 128>}, {pipeline_mode = #tpu.pipeline_mode<synchronous>, transform_indices = @transform_12, window_bounds = array<i64: 1, 128>}, {transform_indices = @transform_13, window_bounds = array<i64: 2, 16, 128>}]} {
    %c0 = arith.constant 0 : index
    %c0_0 = arith.constant 0 : index
    %0 = vector.load %arg3[%c0, %c0_0] : memref<1x384xf32, #tpu.memory_space<vmem>>, vector<1x384xf32>
    %c0_1 = arith.constant 0 : index
    %c0_2 = arith.constant 0 : index
    %1 = vector.load %arg5[%c0_1, %c0_2] : memref<1x128xf32, #tpu.memory_space<vmem>>, vector<1x128xf32>
    %c0_3 = arith.constant 0 : index
    %c0_4 = arith.constant 0 : index
    %2 = vector.load %arg6[%c0_3, %c0_4] : memref<1x128xf32, #tpu.memory_space<vmem>>, vector<1x128xf32>
    %c0_5 = arith.constant 0 : index
    %c0_6 = arith.constant 0 : index
    %3 = vector.load %arg7[%c0_5, %c0_6] : memref<1x128xf32, #tpu.memory_space<vmem>>, vector<1x128xf32>
    %c0_7 = arith.constant 0 : index
    %c0_8 = arith.constant 0 : index
    %4 = vector.load %arg9[%c0_7, %c0_8] : memref<1x256xf32, #tpu.memory_space<vmem>>, vector<1x256xf32>
    %c0_9 = arith.constant 0 : index
    %c0_10 = arith.constant 0 : index
    %5 = vector.load %arg11[%c0_9, %c0_10] : memref<1x128xf32, #tpu.memory_space<vmem>>, vector<1x128xf32>
    %c0_11 = arith.constant 0 : index
    %c0_12 = arith.constant 0 : index
    %6 = vector.load %arg12[%c0_11, %c0_12] : memref<1x128xf32, #tpu.memory_space<vmem>>, vector<1x128xf32>
    %c0_13 = arith.constant 0 : index
    %c0_14 = arith.constant 0 : index
    %7 = vector.load %arg13[%c0_13, %c0_14] : memref<1x128xf32, #tpu.memory_space<vmem>>, vector<1x128xf32>
    %c0_15 = arith.constant 0 : index
    %c0_16 = arith.constant 0 : index
    %c0_17 = arith.constant 0 : index
    %8 = vector.load %arg1[%c0_15, %c0_16, %c0_17] : memref<2x16x128xf32, #tpu.memory_space<vmem>>, vector<2x16x128xf32>
    %9 = vector.shape_cast %8 : vector<2x16x128xf32> to vector<32x128xf32>
    %10 = arith.truncf %9 : vector<32x128xf32> to vector<32x128xbf16>
    %c0_18 = arith.constant 0 : index
    %c0_19 = arith.constant 0 : index
    %11 = vector.load %arg2[%c0_18, %c0_19] : memref<128x384xbf16, #tpu.memory_space<vmem>>, vector<128x384xbf16>
    %cst = arith.constant dense<0.000000e+00> : vector<32x384xf32>
    %12 = tpu.matmul %10, %11, %cst {dimension_numbers = #tpu.dot_dimension_numbers<[1], [0], [0], [1], [0, 0, 1, 1], [], []>} : vector<32x128xbf16>, vector<128x384xbf16>, vector<32x384xf32> -> vector<32x384xf32>
    %13 = vector.broadcast %0 : vector<1x384xf32> to vector<32x384xf32>
    %14 = arith.addf %12, %13 : vector<32x384xf32>
    %15 = arith.truncf %14 : vector<32x384xf32> to vector<32x384xbf16>
    %16 = vector.extract_strided_slice %15 {offsets = [0, 0], sizes = [16, 128], strides = [1, 1]} : vector<32x384xbf16> to vector<16x128xbf16>
    %17 = vector.extract_strided_slice %15 {offsets = [0, 128], sizes = [16, 128], strides = [1, 1]} : vector<32x384xbf16> to vector<16x128xbf16>
    %18 = vector.extract_strided_slice %15 {offsets = [0, 256], sizes = [16, 128], strides = [1, 1]} : vector<32x384xbf16> to vector<16x128xbf16>
    %19 = vector.extract_strided_slice %16 {offsets = [0, 0], sizes = [16, 32], strides = [1, 1]} : vector<16x128xbf16> to vector<16x32xbf16>
    %20 = vector.extract_strided_slice %17 {offsets = [0, 0], sizes = [16, 32], strides = [1, 1]} : vector<16x128xbf16> to vector<16x32xbf16>
    %21 = vector.extract_strided_slice %18 {offsets = [0, 0], sizes = [16, 32], strides = [1, 1]} : vector<16x128xbf16> to vector<16x32xbf16>
    %cst_20 = arith.constant dense<0.000000e+00> : vector<16x16xf32>
    %22 = tpu.matmul %19, %20, %cst_20 {dimension_numbers = #tpu.dot_dimension_numbers<[1], [1], [0], [0], [0, 0, 1, 0], [], []>} : vector<16x32xbf16>, vector<16x32xbf16>, vector<16x16xf32> -> vector<16x16xf32>
    %cst_21 = arith.constant dense<0xFF800000> : vector<16xf32>
    %23 = vector.multi_reduction <maximumf>, %22, %cst_21 [1] : vector<16x16xf32> to vector<16xf32>
    %24 = vector.shape_cast %23 : vector<16xf32> to vector<16x1xf32>
    %25 = vector.broadcast %24 : vector<16x1xf32> to vector<16x16xf32>
    %26 = arith.subf %22, %25 : vector<16x16xf32>
    %27 = math.exp %26 : vector<16x16xf32>
    %cst_22 = arith.constant dense<0.000000e+00> : vector<16xf32>
    %28 = vector.multi_reduction <add>, %27, %cst_22 [1] : vector<16x16xf32> to vector<16xf32>
    %29 = vector.shape_cast %28 : vector<16xf32> to vector<16x1xf32>
    %30 = tpu.reciprocal %29 {approx = true} : vector<16x1xf32> -> vector<16x1xf32>
    %31 = arith.truncf %27 : vector<16x16xf32> to vector<16x16xbf16>
    %cst_23 = arith.constant dense<0.000000e+00> : vector<16x32xf32>
    %32 = tpu.matmul %31, %21, %cst_23 {dimension_numbers = #tpu.dot_dimension_numbers<[1], [0], [0], [1], [0, 0, 1, 1], [], []>} : vector<16x16xbf16>, vector<16x32xbf16>, vector<16x32xf32> -> vector<16x32xf32>
    %33 = vector.broadcast %30 : vector<16x1xf32> to vector<16x32xf32>
    %34 = arith.mulf %32, %33 : vector<16x32xf32>
    %35 = arith.truncf %34 : vector<16x32xf32> to vector<16x32xbf16>
    %36 = vector.extract_strided_slice %16 {offsets = [0, 32], sizes = [16, 32], strides = [1, 1]} : vector<16x128xbf16> to vector<16x32xbf16>
    %37 = vector.extract_strided_slice %17 {offsets = [0, 32], sizes = [16, 32], strides = [1, 1]} : vector<16x128xbf16> to vector<16x32xbf16>
    %38 = vector.extract_strided_slice %18 {offsets = [0, 32], sizes = [16, 32], strides = [1, 1]} : vector<16x128xbf16> to vector<16x32xbf16>
    %cst_24 = arith.constant dense<0.000000e+00> : vector<16x16xf32>
    %39 = tpu.matmul %36, %37, %cst_24 {dimension_numbers = #tpu.dot_dimension_numbers<[1], [1], [0], [0], [0, 0, 1, 0], [], []>} : vector<16x32xbf16>, vector<16x32xbf16>, vector<16x16xf32> -> vector<16x16xf32>
    %cst_25 = arith.constant dense<0xFF800000> : vector<16xf32>
    %40 = vector.multi_reduction <maximumf>, %39, %cst_25 [1] : vector<16x16xf32> to vector<16xf32>
    %41 = vector.shape_cast %40 : vector<16xf32> to vector<16x1xf32>
    %42 = vector.broadcast %41 : vector<16x1xf32> to vector<16x16xf32>
    %43 = arith.subf %39, %42 : vector<16x16xf32>
    %44 = math.exp %43 : vector<16x16xf32>
    %cst_26 = arith.constant dense<0.000000e+00> : vector<16xf32>
    %45 = vector.multi_reduction <add>, %44, %cst_26 [1] : vector<16x16xf32> to vector<16xf32>
    %46 = vector.shape_cast %45 : vector<16xf32> to vector<16x1xf32>
    %47 = tpu.reciprocal %46 {approx = true} : vector<16x1xf32> -> vector<16x1xf32>
    %48 = arith.truncf %44 : vector<16x16xf32> to vector<16x16xbf16>
    %cst_27 = arith.constant dense<0.000000e+00> : vector<16x32xf32>
    %49 = tpu.matmul %48, %38, %cst_27 {dimension_numbers = #tpu.dot_dimension_numbers<[1], [0], [0], [1], [0, 0, 1, 1], [], []>} : vector<16x16xbf16>, vector<16x32xbf16>, vector<16x32xf32> -> vector<16x32xf32>
    %50 = vector.broadcast %47 : vector<16x1xf32> to vector<16x32xf32>
    %51 = arith.mulf %49, %50 : vector<16x32xf32>
    %52 = arith.truncf %51 : vector<16x32xf32> to vector<16x32xbf16>
    %53 = vector.extract_strided_slice %16 {offsets = [0, 64], sizes = [16, 32], strides = [1, 1]} : vector<16x128xbf16> to vector<16x32xbf16>
    %54 = vector.extract_strided_slice %17 {offsets = [0, 64], sizes = [16, 32], strides = [1, 1]} : vector<16x128xbf16> to vector<16x32xbf16>
    %55 = vector.extract_strided_slice %18 {offsets = [0, 64], sizes = [16, 32], strides = [1, 1]} : vector<16x128xbf16> to vector<16x32xbf16>
    %cst_28 = arith.constant dense<0.000000e+00> : vector<16x16xf32>
    %56 = tpu.matmul %53, %54, %cst_28 {dimension_numbers = #tpu.dot_dimension_numbers<[1], [1], [0], [0], [0, 0, 1, 0], [], []>} : vector<16x32xbf16>, vector<16x32xbf16>, vector<16x16xf32> -> vector<16x16xf32>
    %cst_29 = arith.constant dense<0xFF800000> : vector<16xf32>
    %57 = vector.multi_reduction <maximumf>, %56, %cst_29 [1] : vector<16x16xf32> to vector<16xf32>
    %58 = vector.shape_cast %57 : vector<16xf32> to vector<16x1xf32>
    %59 = vector.broadcast %58 : vector<16x1xf32> to vector<16x16xf32>
    %60 = arith.subf %56, %59 : vector<16x16xf32>
    %61 = math.exp %60 : vector<16x16xf32>
    %cst_30 = arith.constant dense<0.000000e+00> : vector<16xf32>
    %62 = vector.multi_reduction <add>, %61, %cst_30 [1] : vector<16x16xf32> to vector<16xf32>
    %63 = vector.shape_cast %62 : vector<16xf32> to vector<16x1xf32>
    %64 = tpu.reciprocal %63 {approx = true} : vector<16x1xf32> -> vector<16x1xf32>
    %65 = arith.truncf %61 : vector<16x16xf32> to vector<16x16xbf16>
    %cst_31 = arith.constant dense<0.000000e+00> : vector<16x32xf32>
    %66 = tpu.matmul %65, %55, %cst_31 {dimension_numbers = #tpu.dot_dimension_numbers<[1], [0], [0], [1], [0, 0, 1, 1], [], []>} : vector<16x16xbf16>, vector<16x32xbf16>, vector<16x32xf32> -> vector<16x32xf32>
    %67 = vector.broadcast %64 : vector<16x1xf32> to vector<16x32xf32>
    %68 = arith.mulf %66, %67 : vector<16x32xf32>
    %69 = arith.truncf %68 : vector<16x32xf32> to vector<16x32xbf16>
    %70 = vector.extract_strided_slice %16 {offsets = [0, 96], sizes = [16, 32], strides = [1, 1]} : vector<16x128xbf16> to vector<16x32xbf16>
    %71 = vector.extract_strided_slice %17 {offsets = [0, 96], sizes = [16, 32], strides = [1, 1]} : vector<16x128xbf16> to vector<16x32xbf16>
    %72 = vector.extract_strided_slice %18 {offsets = [0, 96], sizes = [16, 32], strides = [1, 1]} : vector<16x128xbf16> to vector<16x32xbf16>
    %cst_32 = arith.constant dense<0.000000e+00> : vector<16x16xf32>
    %73 = tpu.matmul %70, %71, %cst_32 {dimension_numbers = #tpu.dot_dimension_numbers<[1], [1], [0], [0], [0, 0, 1, 0], [], []>} : vector<16x32xbf16>, vector<16x32xbf16>, vector<16x16xf32> -> vector<16x16xf32>
    %cst_33 = arith.constant dense<0xFF800000> : vector<16xf32>
    %74 = vector.multi_reduction <maximumf>, %73, %cst_33 [1] : vector<16x16xf32> to vector<16xf32>
    %75 = vector.shape_cast %74 : vector<16xf32> to vector<16x1xf32>
    %76 = vector.broadcast %75 : vector<16x1xf32> to vector<16x16xf32>
    %77 = arith.subf %73, %76 : vector<16x16xf32>
    %78 = math.exp %77 : vector<16x16xf32>
    %cst_34 = arith.constant dense<0.000000e+00> : vector<16xf32>
    %79 = vector.multi_reduction <add>, %78, %cst_34 [1] : vector<16x16xf32> to vector<16xf32>
    %80 = vector.shape_cast %79 : vector<16xf32> to vector<16x1xf32>
    %81 = tpu.reciprocal %80 {approx = true} : vector<16x1xf32> -> vector<16x1xf32>
    %82 = arith.truncf %78 : vector<16x16xf32> to vector<16x16xbf16>
    %cst_35 = arith.constant dense<0.000000e+00> : vector<16x32xf32>
    %83 = tpu.matmul %82, %72, %cst_35 {dimension_numbers = #tpu.dot_dimension_numbers<[1], [0], [0], [1], [0, 0, 1, 1], [], []>} : vector<16x16xbf16>, vector<16x32xbf16>, vector<16x32xf32> -> vector<16x32xf32>
    %84 = vector.broadcast %81 : vector<16x1xf32> to vector<16x32xf32>
    %85 = arith.mulf %83, %84 : vector<16x32xf32>
    %86 = arith.truncf %85 : vector<16x32xf32> to vector<16x32xbf16>
    %87 = tpu.concatenate %35, %52, %69, %86 in 1 : vector<16x32xbf16>, vector<16x32xbf16>, vector<16x32xbf16>, vector<16x32xbf16> -> vector<16x128xbf16>
    %c0_36 = arith.constant 0 : index
    %c0_37 = arith.constant 0 : index
    %88 = vector.load %arg15[%c0_36, %c0_37] : memref<32x128xbf16, #tpu.memory_space<vmem>>, vector<16x128xbf16>
    tpu.vector_store %arg15[%c0_36, %c0_37], %87 {strides = array<i32>} : memref<32x128xbf16, #tpu.memory_space<vmem>>, vector<16x128xbf16>,
    %89 = vector.extract_strided_slice %15 {offsets = [16, 0], sizes = [16, 128], strides = [1, 1]} : vector<32x384xbf16> to vector<16x128xbf16>
    %90 = vector.extract_strided_slice %15 {offsets = [16, 128], sizes = [16, 128], strides = [1, 1]} : vector<32x384xbf16> to vector<16x128xbf16>
    %91 = vector.extract_strided_slice %15 {offsets = [16, 256], sizes = [16, 128], strides = [1, 1]} : vector<32x384xbf16> to vector<16x128xbf16>
    %92 = vector.extract_strided_slice %89 {offsets = [0, 0], sizes = [16, 32], strides = [1, 1]} : vector<16x128xbf16> to vector<16x32xbf16>
    %93 = vector.extract_strided_slice %90 {offsets = [0, 0], sizes = [16, 32], strides = [1, 1]} : vector<16x128xbf16> to vector<16x32xbf16>
    %94 = vector.extract_strided_slice %91 {offsets = [0, 0], sizes = [16, 32], strides = [1, 1]} : vector<16x128xbf16> to vector<16x32xbf16>
    %cst_38 = arith.constant dense<0.000000e+00> : vector<16x16xf32>
    %95 = tpu.matmul %92, %93, %cst_38 {dimension_numbers = #tpu.dot_dimension_numbers<[1], [1], [0], [0], [0, 0, 1, 0], [], []>} : vector<16x32xbf16>, vector<16x32xbf16>, vector<16x16xf32> -> vector<16x16xf32>
    %cst_39 = arith.constant dense<0xFF800000> : vector<16xf32>
    %96 = vector.multi_reduction <maximumf>, %95, %cst_39 [1] : vector<16x16xf32> to vector<16xf32>
    %97 = vector.shape_cast %96 : vector<16xf32> to vector<16x1xf32>
    %98 = vector.broadcast %97 : vector<16x1xf32> to vector<16x16xf32>
    %99 = arith.subf %95, %98 : vector<16x16xf32>
    %100 = math.exp %99 : vector<16x16xf32>
    %cst_40 = arith.constant dense<0.000000e+00> : vector<16xf32>
    %101 = vector.multi_reduction <add>, %100, %cst_40 [1] : vector<16x16xf32> to vector<16xf32>
    %102 = vector.shape_cast %101 : vector<16xf32> to vector<16x1xf32>
    %103 = tpu.reciprocal %102 {approx = true} : vector<16x1xf32> -> vector<16x1xf32>
    %104 = arith.truncf %100 : vector<16x16xf32> to vector<16x16xbf16>
    %cst_41 = arith.constant dense<0.000000e+00> : vector<16x32xf32>
    %105 = tpu.matmul %104, %94, %cst_41 {dimension_numbers = #tpu.dot_dimension_numbers<[1], [0], [0], [1], [0, 0, 1, 1], [], []>} : vector<16x16xbf16>, vector<16x32xbf16>, vector<16x32xf32> -> vector<16x32xf32>
    %106 = vector.broadcast %103 : vector<16x1xf32> to vector<16x32xf32>
    %107 = arith.mulf %105, %106 : vector<16x32xf32>
    %108 = arith.truncf %107 : vector<16x32xf32> to vector<16x32xbf16>
    %109 = vector.extract_strided_slice %89 {offsets = [0, 32], sizes = [16, 32], strides = [1, 1]} : vector<16x128xbf16> to vector<16x32xbf16>
    %110 = vector.extract_strided_slice %90 {offsets = [0, 32], sizes = [16, 32], strides = [1, 1]} : vector<16x128xbf16> to vector<16x32xbf16>
    %111 = vector.extract_strided_slice %91 {offsets = [0, 32], sizes = [16, 32], strides = [1, 1]} : vector<16x128xbf16> to vector<16x32xbf16>
    %cst_42 = arith.constant dense<0.000000e+00> : vector<16x16xf32>
    %112 = tpu.matmul %109, %110, %cst_42 {dimension_numbers = #tpu.dot_dimension_numbers<[1], [1], [0], [0], [0, 0, 1, 0], [], []>} : vector<16x32xbf16>, vector<16x32xbf16>, vector<16x16xf32> -> vector<16x16xf32>
    %cst_43 = arith.constant dense<0xFF800000> : vector<16xf32>
    %113 = vector.multi_reduction <maximumf>, %112, %cst_43 [1] : vector<16x16xf32> to vector<16xf32>
    %114 = vector.shape_cast %113 : vector<16xf32> to vector<16x1xf32>
    %115 = vector.broadcast %114 : vector<16x1xf32> to vector<16x16xf32>
    %116 = arith.subf %112, %115 : vector<16x16xf32>
    %117 = math.exp %116 : vector<16x16xf32>
    %cst_44 = arith.constant dense<0.000000e+00> : vector<16xf32>
    %118 = vector.multi_reduction <add>, %117, %cst_44 [1] : vector<16x16xf32> to vector<16xf32>
    %119 = vector.shape_cast %118 : vector<16xf32> to vector<16x1xf32>
    %120 = tpu.reciprocal %119 {approx = true} : vector<16x1xf32> -> vector<16x1xf32>
    %121 = arith.truncf %117 : vector<16x16xf32> to vector<16x16xbf16>
    %cst_45 = arith.constant dense<0.000000e+00> : vector<16x32xf32>
    %122 = tpu.matmul %121, %111, %cst_45 {dimension_numbers = #tpu.dot_dimension_numbers<[1], [0], [0], [1], [0, 0, 1, 1], [], []>} : vector<16x16xbf16>, vector<16x32xbf16>, vector<16x32xf32> -> vector<16x32xf32>
    %123 = vector.broadcast %120 : vector<16x1xf32> to vector<16x32xf32>
    %124 = arith.mulf %122, %123 : vector<16x32xf32>
    %125 = arith.truncf %124 : vector<16x32xf32> to vector<16x32xbf16>
    %126 = vector.extract_strided_slice %89 {offsets = [0, 64], sizes = [16, 32], strides = [1, 1]} : vector<16x128xbf16> to vector<16x32xbf16>
    %127 = vector.extract_strided_slice %90 {offsets = [0, 64], sizes = [16, 32], strides = [1, 1]} : vector<16x128xbf16> to vector<16x32xbf16>
    %128 = vector.extract_strided_slice %91 {offsets = [0, 64], sizes = [16, 32], strides = [1, 1]} : vector<16x128xbf16> to vector<16x32xbf16>
    %cst_46 = arith.constant dense<0.000000e+00> : vector<16x16xf32>
    %129 = tpu.matmul %126, %127, %cst_46 {dimension_numbers = #tpu.dot_dimension_numbers<[1], [1], [0], [0], [0, 0, 1, 0], [], []>} : vector<16x32xbf16>, vector<16x32xbf16>, vector<16x16xf32> -> vector<16x16xf32>
    %cst_47 = arith.constant dense<0xFF800000> : vector<16xf32>
    %130 = vector.multi_reduction <maximumf>, %129, %cst_47 [1] : vector<16x16xf32> to vector<16xf32>
    %131 = vector.shape_cast %130 : vector<16xf32> to vector<16x1xf32>
    %132 = vector.broadcast %131 : vector<16x1xf32> to vector<16x16xf32>
    %133 = arith.subf %129, %132 : vector<16x16xf32>
    %134 = math.exp %133 : vector<16x16xf32>
    %cst_48 = arith.constant dense<0.000000e+00> : vector<16xf32>
    %135 = vector.multi_reduction <add>, %134, %cst_48 [1] : vector<16x16xf32> to vector<16xf32>
    %136 = vector.shape_cast %135 : vector<16xf32> to vector<16x1xf32>
    %137 = tpu.reciprocal %136 {approx = true} : vector<16x1xf32> -> vector<16x1xf32>
    %138 = arith.truncf %134 : vector<16x16xf32> to vector<16x16xbf16>
    %cst_49 = arith.constant dense<0.000000e+00> : vector<16x32xf32>
    %139 = tpu.matmul %138, %128, %cst_49 {dimension_numbers = #tpu.dot_dimension_numbers<[1], [0], [0], [1], [0, 0, 1, 1], [], []>} : vector<16x16xbf16>, vector<16x32xbf16>, vector<16x32xf32> -> vector<16x32xf32>
    %140 = vector.broadcast %137 : vector<16x1xf32> to vector<16x32xf32>
    %141 = arith.mulf %139, %140 : vector<16x32xf32>
    %142 = arith.truncf %141 : vector<16x32xf32> to vector<16x32xbf16>
    %143 = vector.extract_strided_slice %89 {offsets = [0, 96], sizes = [16, 32], strides = [1, 1]} : vector<16x128xbf16> to vector<16x32xbf16>
    %144 = vector.extract_strided_slice %90 {offsets = [0, 96], sizes = [16, 32], strides = [1, 1]} : vector<16x128xbf16> to vector<16x32xbf16>
    %145 = vector.extract_strided_slice %91 {offsets = [0, 96], sizes = [16, 32], strides = [1, 1]} : vector<16x128xbf16> to vector<16x32xbf16>
    %cst_50 = arith.constant dense<0.000000e+00> : vector<16x16xf32>
    %146 = tpu.matmul %143, %144, %cst_50 {dimension_numbers = #tpu.dot_dimension_numbers<[1], [1], [0], [0], [0, 0, 1, 0], [], []>} : vector<16x32xbf16>, vector<16x32xbf16>, vector<16x16xf32> -> vector<16x16xf32>
    %cst_51 = arith.constant dense<0xFF800000> : vector<16xf32>
    %147 = vector.multi_reduction <maximumf>, %146, %cst_51 [1] : vector<16x16xf32> to vector<16xf32>
    %148 = vector.shape_cast %147 : vector<16xf32> to vector<16x1xf32>
    %149 = vector.broadcast %148 : vector<16x1xf32> to vector<16x16xf32>
    %150 = arith.subf %146, %149 : vector<16x16xf32>
    %151 = math.exp %150 : vector<16x16xf32>
    %cst_52 = arith.constant dense<0.000000e+00> : vector<16xf32>
    %152 = vector.multi_reduction <add>, %151, %cst_52 [1] : vector<16x16xf32> to vector<16xf32>
    %153 = vector.shape_cast %152 : vector<16xf32> to vector<16x1xf32>
    %154 = tpu.reciprocal %153 {approx = true} : vector<16x1xf32> -> vector<16x1xf32>
    %155 = arith.truncf %151 : vector<16x16xf32> to vector<16x16xbf16>
    %cst_53 = arith.constant dense<0.000000e+00> : vector<16x32xf32>
    %156 = tpu.matmul %155, %145, %cst_53 {dimension_numbers = #tpu.dot_dimension_numbers<[1], [0], [0], [1], [0, 0, 1, 1], [], []>} : vector<16x16xbf16>, vector<16x32xbf16>, vector<16x32xf32> -> vector<16x32xf32>
    %157 = vector.broadcast %154 : vector<16x1xf32> to vector<16x32xf32>
    %158 = arith.mulf %156, %157 : vector<16x32xf32>
    %159 = arith.truncf %158 : vector<16x32xf32> to vector<16x32xbf16>
    %160 = tpu.concatenate %108, %125, %142, %159 in 1 : vector<16x32xbf16>, vector<16x32xbf16>, vector<16x32xbf16>, vector<16x32xbf16> -> vector<16x128xbf16>
    %c16 = arith.constant 16 : index
    %c0_54 = arith.constant 0 : index
    %161 = vector.load %arg15[%c16, %c0_54] : memref<32x128xbf16, #tpu.memory_space<vmem>>, vector<16x128xbf16>
    tpu.vector_store %arg15[%c16, %c0_54], %160 {strides = array<i32>} : memref<32x128xbf16, #tpu.memory_space<vmem>>, vector<16x128xbf16>,
    %c0_55 = arith.constant 0 : index
    %c0_56 = arith.constant 0 : index
    %162 = vector.load %arg15[%c0_55, %c0_56] : memref<32x128xbf16, #tpu.memory_space<vmem>>, vector<32x128xbf16>
    %c0_57 = arith.constant 0 : index
    %c0_58 = arith.constant 0 : index
    %163 = vector.load %arg4[%c0_57, %c0_58] : memref<128x128xbf16, #tpu.memory_space<vmem>>, vector<128x128xbf16>
    %cst_59 = arith.constant dense<0.000000e+00> : vector<32x128xf32>
    %164 = tpu.matmul %162, %163, %cst_59 {dimension_numbers = #tpu.dot_dimension_numbers<[1], [0], [0], [1], [0, 0, 1, 1], [], []>} : vector<32x128xbf16>, vector<128x128xbf16>, vector<32x128xf32> -> vector<32x128xf32>
    %165 = vector.broadcast %1 : vector<1x128xf32> to vector<32x128xf32>
    %166 = arith.addf %164, %165 : vector<32x128xf32>
    %167 = arith.addf %9, %166 : vector<32x128xf32>
    %cst_60 = arith.constant dense<0.000000e+00> : vector<32xf32>
    %168 = vector.multi_reduction <add>, %167, %cst_60 [1] : vector<32x128xf32> to vector<32xf32>
    %169 = vector.shape_cast %168 : vector<32xf32> to vector<32x1xf32>
    %cst_61 = arith.constant 1.280000e+02 : f32
    %170 = vector.broadcast %cst_61 : f32 to vector<32x1xf32>
    %171 = arith.divf %169, %170 : vector<32x1xf32>
    %172 = vector.broadcast %171 : vector<32x1xf32> to vector<32x128xf32>
    %173 = arith.subf %167, %172 : vector<32x128xf32>
    %174 = arith.mulf %173, %173 : vector<32x128xf32>
    %cst_62 = arith.constant dense<0.000000e+00> : vector<32xf32>
    %175 = vector.multi_reduction <add>, %174, %cst_62 [1] : vector<32x128xf32> to vector<32xf32>
    %176 = vector.shape_cast %175 : vector<32xf32> to vector<32x1xf32>
    %cst_63 = arith.constant 1.280000e+02 : f32
    %177 = vector.broadcast %cst_63 : f32 to vector<32x1xf32>
    %178 = arith.divf %176, %177 : vector<32x1xf32>
    %179 = vector.broadcast %171 : vector<32x1xf32> to vector<32x128xf32>
    %180 = arith.subf %167, %179 : vector<32x128xf32>
    %cst_64 = arith.constant 9.99999974E-6 : f32
    %181 = vector.broadcast %cst_64 : f32 to vector<32x1xf32>
    %182 = arith.addf %178, %181 : vector<32x1xf32>
    %183 = math.rsqrt %182 : vector<32x1xf32>
    %184 = vector.broadcast %183 : vector<32x1xf32> to vector<32x128xf32>
    %185 = arith.mulf %180, %184 : vector<32x128xf32>
    %186 = vector.broadcast %2 : vector<1x128xf32> to vector<32x128xf32>
    %187 = arith.mulf %185, %186 : vector<32x128xf32>
    %188 = vector.broadcast %3 : vector<1x128xf32> to vector<32x128xf32>
    %189 = arith.addf %187, %188 : vector<32x128xf32>
    %190 = arith.truncf %189 : vector<32x128xf32> to vector<32x128xbf16>
    %c0_65 = arith.constant 0 : index
    %c0_66 = arith.constant 0 : index
    %191 = vector.load %arg8[%c0_65, %c0_66] : memref<128x256xbf16, #tpu.memory_space<vmem>>, vector<128x256xbf16>
    %cst_67 = arith.constant dense<0.000000e+00> : vector<32x256xf32>
    %192 = tpu.matmul %190, %191, %cst_67 {dimension_numbers = #tpu.dot_dimension_numbers<[1], [0], [0], [1], [0, 0, 1, 1], [], []>} : vector<32x128xbf16>, vector<128x256xbf16>, vector<32x256xf32> -> vector<32x256xf32>
    %193 = vector.broadcast %4 : vector<1x256xf32> to vector<32x256xf32>
    %194 = arith.addf %192, %193 : vector<32x256xf32>
    %cst_68 = arith.constant 0.000000e+00 : f32
    %195 = vector.broadcast %cst_68 : f32 to vector<32x256xf32>
    %196 = arith.maximumf %194, %195 : vector<32x256xf32>
    %197 = arith.truncf %196 : vector<32x256xf32> to vector<32x256xbf16>
    %c0_69 = arith.constant 0 : index
    %c0_70 = arith.constant 0 : index
    %198 = vector.load %arg10[%c0_69, %c0_70] : memref<256x128xbf16, #tpu.memory_space<vmem>>, vector<256x128xbf16>
    %cst_71 = arith.constant dense<0.000000e+00> : vector<32x128xf32>
    %199 = tpu.matmul %197, %198, %cst_71 {dimension_numbers = #tpu.dot_dimension_numbers<[1], [0], [0], [1], [0, 0, 1, 1], [], []>} : vector<32x256xbf16>, vector<256x128xbf16>, vector<32x128xf32> -> vector<32x128xf32>
    %200 = vector.broadcast %5 : vector<1x128xf32> to vector<32x128xf32>
    %201 = arith.addf %199, %200 : vector<32x128xf32>
    %202 = arith.addf %189, %201 : vector<32x128xf32>
    %cst_72 = arith.constant dense<0.000000e+00> : vector<32xf32>
    %203 = vector.multi_reduction <add>, %202, %cst_72 [1] : vector<32x128xf32> to vector<32xf32>
    %204 = vector.shape_cast %203 : vector<32xf32> to vector<32x1xf32>
    %cst_73 = arith.constant 1.280000e+02 : f32
    %205 = vector.broadcast %cst_73 : f32 to vector<32x1xf32>
    %206 = arith.divf %204, %205 : vector<32x1xf32>
    %207 = vector.broadcast %206 : vector<32x1xf32> to vector<32x128xf32>
    %208 = arith.subf %202, %207 : vector<32x128xf32>
    %209 = arith.mulf %208, %208 : vector<32x128xf32>
    %cst_74 = arith.constant dense<0.000000e+00> : vector<32xf32>
    %210 = vector.multi_reduction <add>, %209, %cst_74 [1] : vector<32x128xf32> to vector<32xf32>
    %211 = vector.shape_cast %210 : vector<32xf32> to vector<32x1xf32>
    %cst_75 = arith.constant 1.280000e+02 : f32
    %212 = vector.broadcast %cst_75 : f32 to vector<32x1xf32>
    %213 = arith.divf %211, %212 : vector<32x1xf32>
    %214 = vector.broadcast %206 : vector<32x1xf32> to vector<32x128xf32>
    %215 = arith.subf %202, %214 : vector<32x128xf32>
    %cst_76 = arith.constant 9.99999974E-6 : f32
    %216 = vector.broadcast %cst_76 : f32 to vector<32x1xf32>
    %217 = arith.addf %213, %216 : vector<32x1xf32>
    %218 = math.rsqrt %217 : vector<32x1xf32>
    %219 = vector.broadcast %218 : vector<32x1xf32> to vector<32x128xf32>
    %220 = arith.mulf %215, %219 : vector<32x128xf32>
    %221 = vector.broadcast %6 : vector<1x128xf32> to vector<32x128xf32>
    %222 = arith.mulf %220, %221 : vector<32x128xf32>
    %223 = vector.broadcast %7 : vector<1x128xf32> to vector<32x128xf32>
    %224 = arith.addf %222, %223 : vector<32x128xf32>
    %225 = vector.shape_cast %224 : vector<32x128xf32> to vector<2x16x128xf32>
    %c0_77 = arith.constant 0 : index
    %c0_78 = arith.constant 0 : index
    %c0_79 = arith.constant 0 : index
    %226 = vector.load %arg14[%c0_77, %c0_78, %c0_79] : memref<2x16x128xf32, #tpu.memory_space<vmem>>, vector<2x16x128xf32>
    tpu.vector_store %arg14[%c0_77, %c0_78, %c0_79], %225 {strides = array<i32>} : memref<2x16x128xf32, #tpu.memory_space<vmem>>, vector<2x16x128xf32>,
    return
  }
  func.func @transform_0(%arg0: i32) -> (i32, i32, i32) {
    %c0_i32 = arith.constant 0 : i32
    %c0_i32_0 = arith.constant 0 : i32
    %c0_i32_1 = arith.constant 0 : i32
    return %arg0, %c0_i32, %c0_i32_0 : i32, i32, i32
  }
  func.func @transform_1(%arg0: i32) -> (i32, i32) {
    %c0_i32 = arith.constant 0 : i32
    %c0_i32_0 = arith.constant 0 : i32
    %c0_i32_1 = arith.constant 0 : i32
    return %c0_i32, %c0_i32_0 : i32, i32
  }
  func.func @transform_2(%arg0: i32) -> (i32, i32) {
    %c0_i32 = arith.constant 0 : i32
    %c0_i32_0 = arith.constant 0 : i32
    %c0_i32_1 = arith.constant 0 : i32
    return %c0_i32, %c0_i32_0 : i32, i32
  }
  func.func @transform_3(%arg0: i32) -> (i32, i32) {
    %c0_i32 = arith.constant 0 : i32
    %c0_i32_0 = arith.constant 0 : i32
    %c0_i32_1 = arith.constant 0 : i32
    return %c0_i32, %c0_i32_0 : i32, i32
  }
  func.func @transform_4(%arg0: i32) -> (i32, i32) {
    %c0_i32 = arith.constant 0 : i32
    %c0_i32_0 = arith.constant 0 : i32
    %c0_i32_1 = arith.constant 0 : i32
    return %c0_i32, %c0_i32_0 : i32, i32
  }
  func.func @transform_5(%arg0: i32) -> (i32, i32) {
    %c0_i32 = arith.constant 0 : i32
    %c0_i32_0 = arith.constant 0 : i32
    %c0_i32_1 = arith.constant 0 : i32
    return %c0_i32, %c0_i32_0 : i32, i32
  }
  func.func @transform_6(%arg0: i32) -> (i32, i32) {
    %c0_i32 = arith.constant 0 : i32
    %c0_i32_0 = arith.constant 0 : i32
    %c0_i32_1 = arith.constant 0 : i32
    return %c0_i32, %c0_i32_0 : i32, i32
  }
  func.func @transform_7(%arg0: i32) -> (i32, i32) {
    %c0_i32 = arith.constant 0 : i32
    %c0_i32_0 = arith.constant 0 : i32
    %c0_i32_1 = arith.constant 0 : i32
    return %c0_i32, %c0_i32_0 : i32, i32
  }
  func.func @transform_8(%arg0: i32) -> (i32, i32) {
    %c0_i32 = arith.constant 0 : i32
    %c0_i32_0 = arith.constant 0 : i32
    %c0_i32_1 = arith.constant 0 : i32
    return %c0_i32, %c0_i32_0 : i32, i32
  }
  func.func @transform_9(%arg0: i32) -> (i32, i32) {
    %c0_i32 = arith.constant 0 : i32
    %c0_i32_0 = arith.constant 0 : i32
    %c0_i32_1 = arith.constant 0 : i32
    return %c0_i32, %c0_i32_0 : i32, i32
  }
  func.func @transform_10(%arg0: i32) -> (i32, i32) {
    %c0_i32 = arith.constant 0 : i32
    %c0_i32_0 = arith.constant 0 : i32
    %c0_i32_1 = arith.constant 0 : i32
    return %c0_i32, %c0_i32_0 : i32, i32
  }
  func.func @transform_11(%arg0: i32) -> (i32, i32) {
    %c0_i32 = arith.constant 0 : i32
    %c0_i32_0 = arith.constant 0 : i32
    %c0_i32_1 = arith.constant 0 : i32
    return %c0_i32, %c0_i32_0 : i32, i32
  }
  func.func @transform_12(%arg0: i32) -> (i32, i32) {
    %c0_i32 = arith.constant 0 : i32
    %c0_i32_0 = arith.constant 0 : i32
    %c0_i32_1 = arith.constant 0 : i32
    return %c0_i32, %c0_i32_0 : i32, i32
  }
  func.func @transform_13(%arg0: i32) -> (i32, i32, i32) {
    %c0_i32 = arith.constant 0 : i32
    %c0_i32_0 = arith.constant 0 : i32
    %c0_i32_1 = arith.constant 0 : i32
    return %arg0, %c0_i32, %c0_i32_0 : i32, i32, i32
  }
}

module attributes {stable_mosaic.version = 11 : i64} {
  func.func @_transformer_kernel(%arg0: i32, %arg1: memref<2x16x128xf32, #tpu.memory_space<vmem>>, %arg2: memref<128x384xbf16, #tpu.memory_space<vmem>>, %arg3: memref<1x384xf32, #tpu.memory_space<vmem>>, %arg4: memref<128x128xbf16, #tpu.memory_space<vmem>>, %arg5: memref<1x128xf32, #tpu.memory_space<vmem>>, %arg6: memref<1x128xf32, #tpu.memory_space<vmem>>, %arg7: memref<1x128xf32, #tpu.memory_space<vmem>>, %arg8: memref<128x256xbf16, #tpu.memory_space<vmem>>, %arg9: memref<1x256xf32, #tpu.memory_space<vmem>>, %arg10: memref<256x128xbf16, #tpu.memory_space<vmem>>, %arg11: memref<1x128xf32, #tpu.memory_space<vmem>>, %arg12: memref<1x128xf32, #tpu.memory_space<vmem>>, %arg13: memref<1x128xf32, #tpu.memory_space<vmem>>, %arg14: memref<2x16x128xf32, #tpu.memory_space<vmem>>, %arg15: memref<32x128xbf16, #tpu.memory_space<vmem>>) attributes {dimension_semantics = [#tpu.dimension_semantics<parallel>], iteration_bounds = array<i64: 2>, scalar_prefetch = 0 : i64, scratch_operands = 1 : i64, tpu.core_type = #tpu.core_type<tc>, window_params = [{transform_indices = @transform_0, window_bounds = array<i64: 2, 16, 128>}, {pipeline_mode = #tpu.pipeline_mode<synchronous>, transform_indices = @transform_1, window_bounds = array<i64: 128, 384>}, {pipeline_mode = #tpu.pipeline_mode<synchronous>, transform_indices = @transform_2, window_bounds = array<i64: 1, 384>}, {pipeline_mode = #tpu.pipeline_mode<synchronous>, transform_indices = @transform_3, window_bounds = array<i64: 128, 128>}, {pipeline_mode = #tpu.pipeline_mode<synchronous>, transform_indices = @transform_4, window_bounds = array<i64: 1, 128>}, {pipeline_mode = #tpu.pipeline_mode<synchronous>, transform_indices = @transform_5, window_bounds = array<i64: 1, 128>}, {pipeline_mode = #tpu.pipeline_mode<synchronous>, transform_indices = @transform_6, window_bounds = array<i64: 1, 128>}, {pipeline_mode = #tpu.pipeline_mode<synchronous>, transform_indices = @transform_7, window_bounds = array<i64: 128, 256>}, {pipeline_mode = #tpu.pipeline_mode<synchronous>, transform_indices = @transform_8, window_bounds = array<i64: 1, 256>}, {pipeline_mode = #tpu.pipeline_mode<synchronous>, transform_indices = @transform_9, window_bounds = array<i64: 256, 128>}, {pipeline_mode = #tpu.pipeline_mode<synchronous>, transform_indices = @transform_10, window_bounds = array<i64: 1, 128>}, {pipeline_mode = #tpu.pipeline_mode<synchronous>, transform_indices = @transform_11, window_bounds = array<i64: 1, 128>}, {pipeline_mode = #tpu.pipeline_mode<synchronous>, transform_indices = @transform_12, window_bounds = array<i64: 1, 128>}, {transform_indices = @transform_13, window_bounds = array<i64: 2, 16, 128>}]} {
    %c0 = arith.constant 0 : index
    %c0_0 = arith.constant 0 : index
    %0 = vector.load %arg3[%c0, %c0_0] : memref<1x384xf32, #tpu.memory_space<vmem>>, vector<1x384xf32>
    %c0_1 = arith.constant 0 : index
    %c0_2 = arith.constant 0 : index
    %1 = vector.load %arg5[%c0_1, %c0_2] : memref<1x128xf32, #tpu.memory_space<vmem>>, vector<1x128xf32>
    %c0_3 = arith.constant 0 : index
    %c0_4 = arith.constant 0 : index
    %2 = vector.load %arg6[%c0_3, %c0_4] : memref<1x128xf32, #tpu.memory_space<vmem>>, vector<1x128xf32>
    %c0_5 = arith.constant 0 : index
    %c0_6 = arith.constant 0 : index
    %3 = vector.load %arg7[%c0_5, %c0_6] : memref<1x128xf32, #tpu.memory_space<vmem>>, vector<1x128xf32>
    %c0_7 = arith.constant 0 : index
    %c0_8 = arith.constant 0 : index
    %4 = vector.load %arg9[%c0_7, %c0_8] : memref<1x256xf32, #tpu.memory_space<vmem>>, vector<1x256xf32>
    %c0_9 = arith.constant 0 : index
    %c0_10 = arith.constant 0 : index
    %5 = vector.load %arg11[%c0_9, %c0_10] : memref<1x128xf32, #tpu.memory_space<vmem>>, vector<1x128xf32>
    %c0_11 = arith.constant 0 : index
    %c0_12 = arith.constant 0 : index
    %6 = vector.load %arg12[%c0_11, %c0_12] : memref<1x128xf32, #tpu.memory_space<vmem>>, vector<1x128xf32>
    %c0_13 = arith.constant 0 : index
    %c0_14 = arith.constant 0 : index
    %7 = vector.load %arg13[%c0_13, %c0_14] : memref<1x128xf32, #tpu.memory_space<vmem>>, vector<1x128xf32>
    %c0_15 = arith.constant 0 : index
    %c0_16 = arith.constant 0 : index
    %c0_17 = arith.constant 0 : index
    %8 = vector.load %arg1[%c0_15, %c0_16, %c0_17] : memref<2x16x128xf32, #tpu.memory_space<vmem>>, vector<2x16x128xf32>
    %9 = vector.shape_cast %8 : vector<2x16x128xf32> to vector<32x128xf32>
    %10 = arith.truncf %9 : vector<32x128xf32> to vector<32x128xbf16>
    %c0_18 = arith.constant 0 : index
    %c0_19 = arith.constant 0 : index
    %11 = vector.load %arg2[%c0_18, %c0_19] : memref<128x384xbf16, #tpu.memory_space<vmem>>, vector<128x384xbf16>
    %cst = arith.constant dense<0.000000e+00> : vector<32x384xf32>
    %12 = tpu.matmul %10, %11, %cst {dimension_numbers = #tpu.dot_dimension_numbers<[1], [0], [0], [1], [0, 0, 1, 1], [], []>} : vector<32x128xbf16>, vector<128x384xbf16>, vector<32x384xf32> -> vector<32x384xf32>
    %13 = vector.broadcast %0 : vector<1x384xf32> to vector<32x384xf32>
    %14 = arith.addf %12, %13 : vector<32x384xf32>
    %15 = arith.truncf %14 : vector<32x384xf32> to vector<32x384xbf16>
    %16 = vector.extract_strided_slice %15 {offsets = [0, 0], sizes = [16, 128], strides = [1, 1]} : vector<32x384xbf16> to vector<16x128xbf16>
    %17 = vector.extract_strided_slice %15 {offsets = [0, 128], sizes = [16, 128], strides = [1, 1]} : vector<32x384xbf16> to vector<16x128xbf16>
    %18 = vector.extract_strided_slice %15 {offsets = [0, 256], sizes = [16, 128], strides = [1, 1]} : vector<32x384xbf16> to vector<16x128xbf16>
    %19 = vector.extract_strided_slice %16 {offsets = [0, 0], sizes = [16, 32], strides = [1, 1]} : vector<16x128xbf16> to vector<16x32xbf16>
    %20 = vector.extract_strided_slice %17 {offsets = [0, 0], sizes = [16, 32], strides = [1, 1]} : vector<16x128xbf16> to vector<16x32xbf16>
    %21 = vector.extract_strided_slice %18 {offsets = [0, 0], sizes = [16, 32], strides = [1, 1]} : vector<16x128xbf16> to vector<16x32xbf16>
    %cst_20 = arith.constant dense<0.000000e+00> : vector<16x16xf32>
    %22 = tpu.matmul %19, %20, %cst_20 {dimension_numbers = #tpu.dot_dimension_numbers<[1], [1], [0], [0], [0, 0, 1, 0], [], []>} : vector<16x32xbf16>, vector<16x32xbf16>, vector<16x16xf32> -> vector<16x16xf32>
    %cst_21 = arith.constant dense<0xFF800000> : vector<16xf32>
    %23 = vector.multi_reduction <maximumf>, %22, %cst_21 [1] : vector<16x16xf32> to vector<16xf32>
    %24 = vector.shape_cast %23 : vector<16xf32> to vector<16x1xf32>
    %25 = vector.broadcast %24 : vector<16x1xf32> to vector<16x16xf32>
    %26 = arith.subf %22, %25 : vector<16x16xf32>
    %27 = math.exp %26 : vector<16x16xf32>
    %cst_22 = arith.constant dense<0.000000e+00> : vector<16xf32>
    %28 = vector.multi_reduction <add>, %27, %cst_22 [1] : vector<16x16xf32> to vector<16xf32>
    %29 = vector.shape_cast %28 : vector<16xf32> to vector<16x1xf32>
    %30 = tpu.reciprocal %29 {approx = true} : vector<16x1xf32> -> vector<16x1xf32>
    %31 = arith.truncf %27 : vector<16x16xf32> to vector<16x16xbf16>
    %cst_23 = arith.constant dense<0.000000e+00> : vector<16x32xf32>
    %32 = tpu.matmul %31, %21, %cst_23 {dimension_numbers = #tpu.dot_dimension_numbers<[1], [0], [0], [1], [0, 0, 1, 1], [], []>} : vector<16x16xbf16>, vector<16x32xbf16>, vector<16x32xf32> -> vector<16x32xf32>
    %33 = vector.broadcast %30 : vector<16x1xf32> to vector<16x32xf32>
    %34 = arith.mulf %32, %33 : vector<16x32xf32>
    %35 = arith.truncf %34 : vector<16x32xf32> to vector<16x32xbf16>
    %36 = vector.extract_strided_slice %16 {offsets = [0, 32], sizes = [16, 32], strides = [1, 1]} : vector<16x128xbf16> to vector<16x32xbf16>
    %37 = vector.extract_strided_slice %17 {offsets = [0, 32], sizes = [16, 32], strides = [1, 1]} : vector<16x128xbf16> to vector<16x32xbf16>
    %38 = vector.extract_strided_slice %18 {offsets = [0, 32], sizes = [16, 32], strides = [1, 1]} : vector<16x128xbf16> to vector<16x32xbf16>
    %cst_24 = arith.constant dense<0.000000e+00> : vector<16x16xf32>
    %39 = tpu.matmul %36, %37, %cst_24 {dimension_numbers = #tpu.dot_dimension_numbers<[1], [1], [0], [0], [0, 0, 1, 0], [], []>} : vector<16x32xbf16>, vector<16x32xbf16>, vector<16x16xf32> -> vector<16x16xf32>
    %cst_25 = arith.constant dense<0xFF800000> : vector<16xf32>
    %40 = vector.multi_reduction <maximumf>, %39, %cst_25 [1] : vector<16x16xf32> to vector<16xf32>
    %41 = vector.shape_cast %40 : vector<16xf32> to vector<16x1xf32>
    %42 = vector.broadcast %41 : vector<16x1xf32> to vector<16x16xf32>
    %43 = arith.subf %39, %42 : vector<16x16xf32>
    %44 = math.exp %43 : vector<16x16xf32>
    %cst_26 = arith.constant dense<0.000000e+00> : vector<16xf32>
    %45 = vector.multi_reduction <add>, %44, %cst_26 [1] : vector<16x16xf32> to vector<16xf32>
    %46 = vector.shape_cast %45 : vector<16xf32> to vector<16x1xf32>
    %47 = tpu.reciprocal %46 {approx = true} : vector<16x1xf32> -> vector<16x1xf32>
    %48 = arith.truncf %44 : vector<16x16xf32> to vector<16x16xbf16>
    %cst_27 = arith.constant dense<0.000000e+00> : vector<16x32xf32>
    %49 = tpu.matmul %48, %38, %cst_27 {dimension_numbers = #tpu.dot_dimension_numbers<[1], [0], [0], [1], [0, 0, 1, 1], [], []>} : vector<16x16xbf16>, vector<16x32xbf16>, vector<16x32xf32> -> vector<16x32xf32>
    %50 = vector.broadcast %47 : vector<16x1xf32> to vector<16x32xf32>
    %51 = arith.mulf %49, %50 : vector<16x32xf32>
    %52 = arith.truncf %51 : vector<16x32xf32> to vector<16x32xbf16>
    %53 = vector.extract_strided_slice %16 {offsets = [0, 64], sizes = [16, 32], strides = [1, 1]} : vector<16x128xbf16> to vector<16x32xbf16>
    %54 = vector.extract_strided_slice %17 {offsets = [0, 64], sizes = [16, 32], strides = [1, 1]} : vector<16x128xbf16> to vector<16x32xbf16>
    %55 = vector.extract_strided_slice %18 {offsets = [0, 64], sizes = [16, 32], strides = [1, 1]} : vector<16x128xbf16> to vector<16x32xbf16>
    %cst_28 = arith.constant dense<0.000000e+00> : vector<16x16xf32>
    %56 = tpu.matmul %53, %54, %cst_28 {dimension_numbers = #tpu.dot_dimension_numbers<[1], [1], [0], [0], [0, 0, 1, 0], [], []>} : vector<16x32xbf16>, vector<16x32xbf16>, vector<16x16xf32> -> vector<16x16xf32>
    %cst_29 = arith.constant dense<0xFF800000> : vector<16xf32>
    %57 = vector.multi_reduction <maximumf>, %56, %cst_29 [1] : vector<16x16xf32> to vector<16xf32>
    %58 = vector.shape_cast %57 : vector<16xf32> to vector<16x1xf32>
    %59 = vector.broadcast %58 : vector<16x1xf32> to vector<16x16xf32>
    %60 = arith.subf %56, %59 : vector<16x16xf32>
    %61 = math.exp %60 : vector<16x16xf32>
    %cst_30 = arith.constant dense<0.000000e+00> : vector<16xf32>
    %62 = vector.multi_reduction <add>, %61, %cst_30 [1] : vector<16x16xf32> to vector<16xf32>
    %63 = vector.shape_cast %62 : vector<16xf32> to vector<16x1xf32>
    %64 = tpu.reciprocal %63 {approx = true} : vector<16x1xf32> -> vector<16x1xf32>
    %65 = arith.truncf %61 : vector<16x16xf32> to vector<16x16xbf16>
    %cst_31 = arith.constant dense<0.000000e+00> : vector<16x32xf32>
    %66 = tpu.matmul %65, %55, %cst_31 {dimension_numbers = #tpu.dot_dimension_numbers<[1], [0], [0], [1], [0, 0, 1, 1], [], []>} : vector<16x16xbf16>, vector<16x32xbf16>, vector<16x32xf32> -> vector<16x32xf32>
    %67 = vector.broadcast %64 : vector<16x1xf32> to vector<16x32xf32>
    %68 = arith.mulf %66, %67 : vector<16x32xf32>
    %69 = arith.truncf %68 : vector<16x32xf32> to vector<16x32xbf16>
    %70 = vector.extract_strided_slice %16 {offsets = [0, 96], sizes = [16, 32], strides = [1, 1]} : vector<16x128xbf16> to vector<16x32xbf16>
    %71 = vector.extract_strided_slice %17 {offsets = [0, 96], sizes = [16, 32], strides = [1, 1]} : vector<16x128xbf16> to vector<16x32xbf16>
    %72 = vector.extract_strided_slice %18 {offsets = [0, 96], sizes = [16, 32], strides = [1, 1]} : vector<16x128xbf16> to vector<16x32xbf16>
    %cst_32 = arith.constant dense<0.000000e+00> : vector<16x16xf32>
    %73 = tpu.matmul %70, %71, %cst_32 {dimension_numbers = #tpu.dot_dimension_numbers<[1], [1], [0], [0], [0, 0, 1, 0], [], []>} : vector<16x32xbf16>, vector<16x32xbf16>, vector<16x16xf32> -> vector<16x16xf32>
    %cst_33 = arith.constant dense<0xFF800000> : vector<16xf32>
    %74 = vector.multi_reduction <maximumf>, %73, %cst_33 [1] : vector<16x16xf32> to vector<16xf32>
    %75 = vector.shape_cast %74 : vector<16xf32> to vector<16x1xf32>
    %76 = vector.broadcast %75 : vector<16x1xf32> to vector<16x16xf32>
    %77 = arith.subf %73, %76 : vector<16x16xf32>
    %78 = math.exp %77 : vector<16x16xf32>
    %cst_34 = arith.constant dense<0.000000e+00> : vector<16xf32>
    %79 = vector.multi_reduction <add>, %78, %cst_34 [1] : vector<16x16xf32> to vector<16xf32>
    %80 = vector.shape_cast %79 : vector<16xf32> to vector<16x1xf32>
    %81 = tpu.reciprocal %80 {approx = true} : vector<16x1xf32> -> vector<16x1xf32>
    %82 = arith.truncf %78 : vector<16x16xf32> to vector<16x16xbf16>
    %cst_35 = arith.constant dense<0.000000e+00> : vector<16x32xf32>
    %83 = tpu.matmul %82, %72, %cst_35 {dimension_numbers = #tpu.dot_dimension_numbers<[1], [0], [0], [1], [0, 0, 1, 1], [], []>} : vector<16x16xbf16>, vector<16x32xbf16>, vector<16x32xf32> -> vector<16x32xf32>
    %84 = vector.broadcast %81 : vector<16x1xf32> to vector<16x32xf32>
    %85 = arith.mulf %83, %84 : vector<16x32xf32>
    %86 = arith.truncf %85 : vector<16x32xf32> to vector<16x32xbf16>
    %87 = tpu.concatenate %35, %52, %69, %86 in 1 : vector<16x32xbf16>, vector<16x32xbf16>, vector<16x32xbf16>, vector<16x32xbf16> -> vector<16x128xbf16>
    %c0_36 = arith.constant 0 : index
    %c0_37 = arith.constant 0 : index
    %88 = vector.load %arg15[%c0_36, %c0_37] : memref<32x128xbf16, #tpu.memory_space<vmem>>, vector<16x128xbf16>
    tpu.vector_store %arg15[%c0_36, %c0_37], %87 {strides = array<i32>} : memref<32x128xbf16, #tpu.memory_space<vmem>>, vector<16x128xbf16>,
    %89 = vector.extract_strided_slice %15 {offsets = [16, 0], sizes = [16, 128], strides = [1, 1]} : vector<32x384xbf16> to vector<16x128xbf16>
    %90 = vector.extract_strided_slice %15 {offsets = [16, 128], sizes = [16, 128], strides = [1, 1]} : vector<32x384xbf16> to vector<16x128xbf16>
    %91 = vector.extract_strided_slice %15 {offsets = [16, 256], sizes = [16, 128], strides = [1, 1]} : vector<32x384xbf16> to vector<16x128xbf16>
    %92 = vector.extract_strided_slice %89 {offsets = [0, 0], sizes = [16, 32], strides = [1, 1]} : vector<16x128xbf16> to vector<16x32xbf16>
    %93 = vector.extract_strided_slice %90 {offsets = [0, 0], sizes = [16, 32], strides = [1, 1]} : vector<16x128xbf16> to vector<16x32xbf16>
    %94 = vector.extract_strided_slice %91 {offsets = [0, 0], sizes = [16, 32], strides = [1, 1]} : vector<16x128xbf16> to vector<16x32xbf16>
    %cst_38 = arith.constant dense<0.000000e+00> : vector<16x16xf32>
    %95 = tpu.matmul %92, %93, %cst_38 {dimension_numbers = #tpu.dot_dimension_numbers<[1], [1], [0], [0], [0, 0, 1, 0], [], []>} : vector<16x32xbf16>, vector<16x32xbf16>, vector<16x16xf32> -> vector<16x16xf32>
    %cst_39 = arith.constant dense<0xFF800000> : vector<16xf32>
    %96 = vector.multi_reduction <maximumf>, %95, %cst_39 [1] : vector<16x16xf32> to vector<16xf32>
    %97 = vector.shape_cast %96 : vector<16xf32> to vector<16x1xf32>
    %98 = vector.broadcast %97 : vector<16x1xf32> to vector<16x16xf32>
    %99 = arith.subf %95, %98 : vector<16x16xf32>
    %100 = math.exp %99 : vector<16x16xf32>
    %cst_40 = arith.constant dense<0.000000e+00> : vector<16xf32>
    %101 = vector.multi_reduction <add>, %100, %cst_40 [1] : vector<16x16xf32> to vector<16xf32>
    %102 = vector.shape_cast %101 : vector<16xf32> to vector<16x1xf32>
    %103 = tpu.reciprocal %102 {approx = true} : vector<16x1xf32> -> vector<16x1xf32>
    %104 = arith.truncf %100 : vector<16x16xf32> to vector<16x16xbf16>
    %cst_41 = arith.constant dense<0.000000e+00> : vector<16x32xf32>
    %105 = tpu.matmul %104, %94, %cst_41 {dimension_numbers = #tpu.dot_dimension_numbers<[1], [0], [0], [1], [0, 0, 1, 1], [], []>} : vector<16x16xbf16>, vector<16x32xbf16>, vector<16x32xf32> -> vector<16x32xf32>
    %106 = vector.broadcast %103 : vector<16x1xf32> to vector<16x32xf32>
    %107 = arith.mulf %105, %106 : vector<16x32xf32>
    %108 = arith.truncf %107 : vector<16x32xf32> to vector<16x32xbf16>
    %109 = vector.extract_strided_slice %89 {offsets = [0, 32], sizes = [16, 32], strides = [1, 1]} : vector<16x128xbf16> to vector<16x32xbf16>
    %110 = vector.extract_strided_slice %90 {offsets = [0, 32], sizes = [16, 32], strides = [1, 1]} : vector<16x128xbf16> to vector<16x32xbf16>
    %111 = vector.extract_strided_slice %91 {offsets = [0, 32], sizes = [16, 32], strides = [1, 1]} : vector<16x128xbf16> to vector<16x32xbf16>
    %cst_42 = arith.constant dense<0.000000e+00> : vector<16x16xf32>
    %112 = tpu.matmul %109, %110, %cst_42 {dimension_numbers = #tpu.dot_dimension_numbers<[1], [1], [0], [0], [0, 0, 1, 0], [], []>} : vector<16x32xbf16>, vector<16x32xbf16>, vector<16x16xf32> -> vector<16x16xf32>
    %cst_43 = arith.constant dense<0xFF800000> : vector<16xf32>
    %113 = vector.multi_reduction <maximumf>, %112, %cst_43 [1] : vector<16x16xf32> to vector<16xf32>
    %114 = vector.shape_cast %113 : vector<16xf32> to vector<16x1xf32>
    %115 = vector.broadcast %114 : vector<16x1xf32> to vector<16x16xf32>
    %116 = arith.subf %112, %115 : vector<16x16xf32>
    %117 = math.exp %116 : vector<16x16xf32>
    %cst_44 = arith.constant dense<0.000000e+00> : vector<16xf32>
    %118 = vector.multi_reduction <add>, %117, %cst_44 [1] : vector<16x16xf32> to vector<16xf32>
    %119 = vector.shape_cast %118 : vector<16xf32> to vector<16x1xf32>
    %120 = tpu.reciprocal %119 {approx = true} : vector<16x1xf32> -> vector<16x1xf32>
    %121 = arith.truncf %117 : vector<16x16xf32> to vector<16x16xbf16>
    %cst_45 = arith.constant dense<0.000000e+00> : vector<16x32xf32>
    %122 = tpu.matmul %121, %111, %cst_45 {dimension_numbers = #tpu.dot_dimension_numbers<[1], [0], [0], [1], [0, 0, 1, 1], [], []>} : vector<16x16xbf16>, vector<16x32xbf16>, vector<16x32xf32> -> vector<16x32xf32>
    %123 = vector.broadcast %120 : vector<16x1xf32> to vector<16x32xf32>
    %124 = arith.mulf %122, %123 : vector<16x32xf32>
    %125 = arith.truncf %124 : vector<16x32xf32> to vector<16x32xbf16>
    %126 = vector.extract_strided_slice %89 {offsets = [0, 64], sizes = [16, 32], strides = [1, 1]} : vector<16x128xbf16> to vector<16x32xbf16>
    %127 = vector.extract_strided_slice %90 {offsets = [0, 64], sizes = [16, 32], strides = [1, 1]} : vector<16x128xbf16> to vector<16x32xbf16>
    %128 = vector.extract_strided_slice %91 {offsets = [0, 64], sizes = [16, 32], strides = [1, 1]} : vector<16x128xbf16> to vector<16x32xbf16>
    %cst_46 = arith.constant dense<0.000000e+00> : vector<16x16xf32>
    %129 = tpu.matmul %126, %127, %cst_46 {dimension_numbers = #tpu.dot_dimension_numbers<[1], [1], [0], [0], [0, 0, 1, 0], [], []>} : vector<16x32xbf16>, vector<16x32xbf16>, vector<16x16xf32> -> vector<16x16xf32>
    %cst_47 = arith.constant dense<0xFF800000> : vector<16xf32>
    %130 = vector.multi_reduction <maximumf>, %129, %cst_47 [1] : vector<16x16xf32> to vector<16xf32>
    %131 = vector.shape_cast %130 : vector<16xf32> to vector<16x1xf32>
    %132 = vector.broadcast %131 : vector<16x1xf32> to vector<16x16xf32>
    %133 = arith.subf %129, %132 : vector<16x16xf32>
    %134 = math.exp %133 : vector<16x16xf32>
    %cst_48 = arith.constant dense<0.000000e+00> : vector<16xf32>
    %135 = vector.multi_reduction <add>, %134, %cst_48 [1] : vector<16x16xf32> to vector<16xf32>
    %136 = vector.shape_cast %135 : vector<16xf32> to vector<16x1xf32>
    %137 = tpu.reciprocal %136 {approx = true} : vector<16x1xf32> -> vector<16x1xf32>
    %138 = arith.truncf %134 : vector<16x16xf32> to vector<16x16xbf16>
    %cst_49 = arith.constant dense<0.000000e+00> : vector<16x32xf32>
    %139 = tpu.matmul %138, %128, %cst_49 {dimension_numbers = #tpu.dot_dimension_numbers<[1], [0], [0], [1], [0, 0, 1, 1], [], []>} : vector<16x16xbf16>, vector<16x32xbf16>, vector<16x32xf32> -> vector<16x32xf32>
    %140 = vector.broadcast %137 : vector<16x1xf32> to vector<16x32xf32>
    %141 = arith.mulf %139, %140 : vector<16x32xf32>
    %142 = arith.truncf %141 : vector<16x32xf32> to vector<16x32xbf16>
    %143 = vector.extract_strided_slice %89 {offsets = [0, 96], sizes = [16, 32], strides = [1, 1]} : vector<16x128xbf16> to vector<16x32xbf16>
    %144 = vector.extract_strided_slice %90 {offsets = [0, 96], sizes = [16, 32], strides = [1, 1]} : vector<16x128xbf16> to vector<16x32xbf16>
    %145 = vector.extract_strided_slice %91 {offsets = [0, 96], sizes = [16, 32], strides = [1, 1]} : vector<16x128xbf16> to vector<16x32xbf16>
    %cst_50 = arith.constant dense<0.000000e+00> : vector<16x16xf32>
    %146 = tpu.matmul %143, %144, %cst_50 {dimension_numbers = #tpu.dot_dimension_numbers<[1], [1], [0], [0], [0, 0, 1, 0], [], []>} : vector<16x32xbf16>, vector<16x32xbf16>, vector<16x16xf32> -> vector<16x16xf32>
    %cst_51 = arith.constant dense<0xFF800000> : vector<16xf32>
    %147 = vector.multi_reduction <maximumf>, %146, %cst_51 [1] : vector<16x16xf32> to vector<16xf32>
    %148 = vector.shape_cast %147 : vector<16xf32> to vector<16x1xf32>
    %149 = vector.broadcast %148 : vector<16x1xf32> to vector<16x16xf32>
    %150 = arith.subf %146, %149 : vector<16x16xf32>
    %151 = math.exp %150 : vector<16x16xf32>
    %cst_52 = arith.constant dense<0.000000e+00> : vector<16xf32>
    %152 = vector.multi_reduction <add>, %151, %cst_52 [1] : vector<16x16xf32> to vector<16xf32>
    %153 = vector.shape_cast %152 : vector<16xf32> to vector<16x1xf32>
    %154 = tpu.reciprocal %153 {approx = true} : vector<16x1xf32> -> vector<16x1xf32>
    %155 = arith.truncf %151 : vector<16x16xf32> to vector<16x16xbf16>
    %cst_53 = arith.constant dense<0.000000e+00> : vector<16x32xf32>
    %156 = tpu.matmul %155, %145, %cst_53 {dimension_numbers = #tpu.dot_dimension_numbers<[1], [0], [0], [1], [0, 0, 1, 1], [], []>} : vector<16x16xbf16>, vector<16x32xbf16>, vector<16x32xf32> -> vector<16x32xf32>
    %157 = vector.broadcast %154 : vector<16x1xf32> to vector<16x32xf32>
    %158 = arith.mulf %156, %157 : vector<16x32xf32>
    %159 = arith.truncf %158 : vector<16x32xf32> to vector<16x32xbf16>
    %160 = tpu.concatenate %108, %125, %142, %159 in 1 : vector<16x32xbf16>, vector<16x32xbf16>, vector<16x32xbf16>, vector<16x32xbf16> -> vector<16x128xbf16>
    %c16 = arith.constant 16 : index
    %c0_54 = arith.constant 0 : index
    %161 = vector.load %arg15[%c16, %c0_54] : memref<32x128xbf16, #tpu.memory_space<vmem>>, vector<16x128xbf16>
    tpu.vector_store %arg15[%c16, %c0_54], %160 {strides = array<i32>} : memref<32x128xbf16, #tpu.memory_space<vmem>>, vector<16x128xbf16>,
    %c0_55 = arith.constant 0 : index
    %c0_56 = arith.constant 0 : index
    %162 = vector.load %arg15[%c0_55, %c0_56] : memref<32x128xbf16, #tpu.memory_space<vmem>>, vector<32x128xbf16>
    %c0_57 = arith.constant 0 : index
    %c0_58 = arith.constant 0 : index
    %163 = vector.load %arg4[%c0_57, %c0_58] : memref<128x128xbf16, #tpu.memory_space<vmem>>, vector<128x128xbf16>
    %cst_59 = arith.constant dense<0.000000e+00> : vector<32x128xf32>
    %164 = tpu.matmul %162, %163, %cst_59 {dimension_numbers = #tpu.dot_dimension_numbers<[1], [0], [0], [1], [0, 0, 1, 1], [], []>} : vector<32x128xbf16>, vector<128x128xbf16>, vector<32x128xf32> -> vector<32x128xf32>
    %165 = vector.broadcast %1 : vector<1x128xf32> to vector<32x128xf32>
    %166 = arith.addf %164, %165 : vector<32x128xf32>
    %167 = arith.addf %9, %166 : vector<32x128xf32>
    %cst_60 = arith.constant dense<0.000000e+00> : vector<32xf32>
    %168 = vector.multi_reduction <add>, %167, %cst_60 [1] : vector<32x128xf32> to vector<32xf32>
    %169 = vector.shape_cast %168 : vector<32xf32> to vector<32x1xf32>
    %cst_61 = arith.constant 1.280000e+02 : f32
    %170 = vector.broadcast %cst_61 : f32 to vector<32x1xf32>
    %171 = arith.divf %169, %170 : vector<32x1xf32>
    %172 = vector.broadcast %171 : vector<32x1xf32> to vector<32x128xf32>
    %173 = arith.subf %167, %172 : vector<32x128xf32>
    %174 = arith.mulf %173, %173 : vector<32x128xf32>
    %cst_62 = arith.constant dense<0.000000e+00> : vector<32xf32>
    %175 = vector.multi_reduction <add>, %174, %cst_62 [1] : vector<32x128xf32> to vector<32xf32>
    %176 = vector.shape_cast %175 : vector<32xf32> to vector<32x1xf32>
    %cst_63 = arith.constant 1.280000e+02 : f32
    %177 = vector.broadcast %cst_63 : f32 to vector<32x1xf32>
    %178 = arith.divf %176, %177 : vector<32x1xf32>
    %179 = vector.broadcast %171 : vector<32x1xf32> to vector<32x128xf32>
    %180 = arith.subf %167, %179 : vector<32x128xf32>
    %cst_64 = arith.constant 9.99999974E-6 : f32
    %181 = vector.broadcast %cst_64 : f32 to vector<32x1xf32>
    %182 = arith.addf %178, %181 : vector<32x1xf32>
    %183 = math.rsqrt %182 : vector<32x1xf32>
    %184 = vector.broadcast %183 : vector<32x1xf32> to vector<32x128xf32>
    %185 = arith.mulf %180, %184 : vector<32x128xf32>
    %186 = vector.broadcast %2 : vector<1x128xf32> to vector<32x128xf32>
    %187 = arith.mulf %185, %186 : vector<32x128xf32>
    %188 = vector.broadcast %3 : vector<1x128xf32> to vector<32x128xf32>
    %189 = arith.addf %187, %188 : vector<32x128xf32>
    %190 = arith.truncf %189 : vector<32x128xf32> to vector<32x128xbf16>
    %c0_65 = arith.constant 0 : index
    %c0_66 = arith.constant 0 : index
    %191 = vector.load %arg8[%c0_65, %c0_66] : memref<128x256xbf16, #tpu.memory_space<vmem>>, vector<128x256xbf16>
    %cst_67 = arith.constant dense<0.000000e+00> : vector<32x256xf32>
    %192 = tpu.matmul %190, %191, %cst_67 {dimension_numbers = #tpu.dot_dimension_numbers<[1], [0], [0], [1], [0, 0, 1, 1], [], []>} : vector<32x128xbf16>, vector<128x256xbf16>, vector<32x256xf32> -> vector<32x256xf32>
    %193 = vector.broadcast %4 : vector<1x256xf32> to vector<32x256xf32>
    %194 = arith.addf %192, %193 : vector<32x256xf32>
    %cst_68 = arith.constant 0.000000e+00 : f32
    %195 = vector.broadcast %cst_68 : f32 to vector<32x256xf32>
    %196 = arith.maximumf %194, %195 : vector<32x256xf32>
    %197 = arith.truncf %196 : vector<32x256xf32> to vector<32x256xbf16>
    %c0_69 = arith.constant 0 : index
    %c0_70 = arith.constant 0 : index
    %198 = vector.load %arg10[%c0_69, %c0_70] : memref<256x128xbf16, #tpu.memory_space<vmem>>, vector<256x128xbf16>
    %cst_71 = arith.constant dense<0.000000e+00> : vector<32x128xf32>
    %199 = tpu.matmul %197, %198, %cst_71 {dimension_numbers = #tpu.dot_dimension_numbers<[1], [0], [0], [1], [0, 0, 1, 1], [], []>} : vector<32x256xbf16>, vector<256x128xbf16>, vector<32x128xf32> -> vector<32x128xf32>
    %200 = vector.broadcast %5 : vector<1x128xf32> to vector<32x128xf32>
    %201 = arith.addf %199, %200 : vector<32x128xf32>
    %202 = arith.addf %189, %201 : vector<32x128xf32>
    %cst_72 = arith.constant dense<0.000000e+00> : vector<32xf32>
    %203 = vector.multi_reduction <add>, %202, %cst_72 [1] : vector<32x128xf32> to vector<32xf32>
    %204 = vector.shape_cast %203 : vector<32xf32> to vector<32x1xf32>
    %cst_73 = arith.constant 1.280000e+02 : f32
    %205 = vector.broadcast %cst_73 : f32 to vector<32x1xf32>
    %206 = arith.divf %204, %205 : vector<32x1xf32>
    %207 = vector.broadcast %206 : vector<32x1xf32> to vector<32x128xf32>
    %208 = arith.subf %202, %207 : vector<32x128xf32>
    %209 = arith.mulf %208, %208 : vector<32x128xf32>
    %cst_74 = arith.constant dense<0.000000e+00> : vector<32xf32>
    %210 = vector.multi_reduction <add>, %209, %cst_74 [1] : vector<32x128xf32> to vector<32xf32>
    %211 = vector.shape_cast %210 : vector<32xf32> to vector<32x1xf32>
    %cst_75 = arith.constant 1.280000e+02 : f32
    %212 = vector.broadcast %cst_75 : f32 to vector<32x1xf32>
    %213 = arith.divf %211, %212 : vector<32x1xf32>
    %214 = vector.broadcast %206 : vector<32x1xf32> to vector<32x128xf32>
    %215 = arith.subf %202, %214 : vector<32x128xf32>
    %cst_76 = arith.constant 9.99999974E-6 : f32
    %216 = vector.broadcast %cst_76 : f32 to vector<32x1xf32>
    %217 = arith.addf %213, %216 : vector<32x1xf32>
    %218 = math.rsqrt %217 : vector<32x1xf32>
    %219 = vector.broadcast %218 : vector<32x1xf32> to vector<32x128xf32>
    %220 = arith.mulf %215, %219 : vector<32x128xf32>
    %221 = vector.broadcast %6 : vector<1x128xf32> to vector<32x128xf32>
    %222 = arith.mulf %220, %221 : vector<32x128xf32>
    %223 = vector.broadcast %7 : vector<1x128xf32> to vector<32x128xf32>
    %224 = arith.addf %222, %223 : vector<32x128xf32>
    %225 = vector.shape_cast %224 : vector<32x128xf32> to vector<2x16x128xf32>
    %c0_77 = arith.constant 0 : index
    %c0_78 = arith.constant 0 : index
    %c0_79 = arith.constant 0 : index
    %226 = vector.load %arg14[%c0_77, %c0_78, %c0_79] : memref<2x16x128xf32, #tpu.memory_space<vmem>>, vector<2x16x128xf32>
    tpu.vector_store %arg14[%c0_77, %c0_78, %c0_79], %225 {strides = array<i32>} : memref<2x16x128xf32, #tpu.memory_space<vmem>>, vector<2x16x128xf32>,
    return
  }
  func.func @transform_0(%arg0: i32) -> (i32, i32, i32) {
    %c0_i32 = arith.constant 0 : i32
    %c0_i32_0 = arith.constant 0 : i32
    %c0_i32_1 = arith.constant 0 : i32
    return %arg0, %c0_i32, %c0_i32_0 : i32, i32, i32
  }
  func.func @transform_1(%arg0: i32) -> (i32, i32) {
    %c0_i32 = arith.constant 0 : i32
    %c0_i32_0 = arith.constant 0 : i32
    %c0_i32_1 = arith.constant 0 : i32
    return %c0_i32, %c0_i32_0 : i32, i32
  }
  func.func @transform_2(%arg0: i32) -> (i32, i32) {
    %c0_i32 = arith.constant 0 : i32
    %c0_i32_0 = arith.constant 0 : i32
    %c0_i32_1 = arith.constant 0 : i32
    return %c0_i32, %c0_i32_0 : i32, i32
  }
  func.func @transform_3(%arg0: i32) -> (i32, i32) {
    %c0_i32 = arith.constant 0 : i32
    %c0_i32_0 = arith.constant 0 : i32
    %c0_i32_1 = arith.constant 0 : i32
    return %c0_i32, %c0_i32_0 : i32, i32
  }
  func.func @transform_4(%arg0: i32) -> (i32, i32) {
    %c0_i32 = arith.constant 0 : i32
    %c0_i32_0 = arith.constant 0 : i32
    %c0_i32_1 = arith.constant 0 : i32
    return %c0_i32, %c0_i32_0 : i32, i32
  }
  func.func @transform_5(%arg0: i32) -> (i32, i32) {
    %c0_i32 = arith.constant 0 : i32
    %c0_i32_0 = arith.constant 0 : i32
    %c0_i32_1 = arith.constant 0 : i32
    return %c0_i32, %c0_i32_0 : i32, i32
  }
  func.func @transform_6(%arg0: i32) -> (i32, i32) {
    %c0_i32 = arith.constant 0 : i32
    %c0_i32_0 = arith.constant 0 : i32
    %c0_i32_1 = arith.constant 0 : i32
    return %c0_i32, %c0_i32_0 : i32, i32
  }
  func.func @transform_7(%arg0: i32) -> (i32, i32) {
    %c0_i32 = arith.constant 0 : i32
    %c0_i32_0 = arith.constant 0 : i32
    %c0_i32_1 = arith.constant 0 : i32
    return %c0_i32, %c0_i32_0 : i32, i32
  }
  func.func @transform_8(%arg0: i32) -> (i32, i32) {
    %c0_i32 = arith.constant 0 : i32
    %c0_i32_0 = arith.constant 0 : i32
    %c0_i32_1 = arith.constant 0 : i32
    return %c0_i32, %c0_i32_0 : i32, i32
  }
  func.func @transform_9(%arg0: i32) -> (i32, i32) {
    %c0_i32 = arith.constant 0 : i32
    %c0_i32_0 = arith.constant 0 : i32
    %c0_i32_1 = arith.constant 0 : i32
    return %c0_i32, %c0_i32_0 : i32, i32
  }
  func.func @transform_10(%arg0: i32) -> (i32, i32) {
    %c0_i32 = arith.constant 0 : i32
    %c0_i32_0 = arith.constant 0 : i32
    %c0_i32_1 = arith.constant 0 : i32
    return %c0_i32, %c0_i32_0 : i32, i32
  }
  func.func @transform_11(%arg0: i32) -> (i32, i32) {
    %c0_i32 = arith.constant 0 : i32
    %c0_i32_0 = arith.constant 0 : i32
    %c0_i32_1 = arith.constant 0 : i32
    return %c0_i32, %c0_i32_0 : i32, i32
  }
  func.func @transform_12(%arg0: i32) -> (i32, i32) {
    %c0_i32 = arith.constant 0 : i32
    %c0_i32_0 = arith.constant 0 : i32
    %c0_i32_1 = arith.constant 0 : i32
    return %c0_i32, %c0_i32_0 : i32, i32
  }
  func.func @transform_13(%arg0: i32) -> (i32, i32, i32) {
    %c0_i32 = arith.constant 0 : i32
    %c0_i32_0 = arith.constant 0 : i32
    %c0_i32_1 = arith.constant 0 : i32
    return %arg0, %c0_i32, %c0_i32_0 : i32, i32, i32
  }
}

</mosaic_0001>

<bundles_post_ra>
// kernel: tpu_custom_call.1
= control target key start
LH: loop header
LB: loop body
LE: loop exit
PB: predicated region body
PF: predicated region fallthrough
CT: control target
= control target key end

     0   :  { %s4035_s0 = inlined_call_operand.hbm [shape: f32[4,16,128], index: 0, kind: input, shape index: {}]   ;;  %s4036_s1 = inlined_call_operand.hbm [shape: bf16[128,384], index: 1, kind: input, shape index: {}]   ;;  %s4037_s2 = inlined_call_operand.vmem [shape: f32[1,384], index: 2, kind: input, shape index: {}]   ;;  %s4038_s3 = inlined_call_operand.hbm [shape: bf16[128,128], index: 3, kind: input, shape index: {}]   ;;  %s4039_s4 = inlined_call_operand.vmem [shape: f32[1,128], index: 4, kind: input, shape index: {}]   ;;  %s4040_s5 = inlined_call_operand.vmem [shape: f32[1,128], index: 5, kind: input, shape index: {}]   ;;  %s4041_s6 = inlined_call_operand.vmem [shape: f32[1,128], index: 6, kind: input, shape index: {}]   ;;  %s4042_s7 = inlined_call_operand.hbm [shape: bf16[128,256], index: 7, kind: input, shape index: {}]   ;;  %s4043_s8 = inlined_call_operand.vmem [shape: f32[1,256], index: 8, kind: input, shape index: {}]   ;;  %s4044_s9 = inlined_call_operand.hbm [shape: bf16[256,128], index: 9, kind: input, shape index: {}]   ;;  %s4045_s10 = inlined_call_operand.vmem [shape: f32[1,128], index: 10, kind: input, shape index: {}]   ;;  %s4046_s11 = inlined_call_operand.vmem [shape: f32[1,128], index: 11, kind: input, shape index: {}]   ;;  %s4047_s12 = inlined_call_operand.vmem [shape: f32[1,128], index: 12, kind: input, shape index: {}]   ;;  %s4048_s13 = inlined_call_operand.hbm [shape: f32[4,16,128], index: 13, kind: output, shape index: {}]  }
   0x1   :  { %4057 = sst [smem:[#allocation20_spill]] %s4036_s1 }
   0x2   :  { %4058 = sst [smem:[#allocation21_spill]] %s4038_s3 }
   0x3   :  { %4059 = sst [smem:[#allocation22_spill]] %s4042_s7 }
   0x4   :  { %4060 = sst [smem:[#allocation23_spill]] %s4044_s9 }
   0x5   :  { %18 = vsyncpa [#allocation4], 0 }
   0x6   :  { %20 = vsyncpa [#allocation4 + $0x1], 0 }
   0x7   :  { %21 = vsyncpa [#allocation7], 0 }
   0x8   :  { %22 = vsyncpa [#allocation10], 0 }
   0x9   :  { %23 = vsyncpa [#allocation5], 0 }
   0xa   :  { %25 = vsyncpa [#allocation5 + $0x1], 0  ;;  %s3499_s25 = smov 0   ;;  %s3501_s26 = smov 0  }
   0xb   :  { %s3503_s27 = smov 0   ;;  %s3505_s28 = smov 0  }
   0xc LB: > { %4061 = sst [smem:[#allocation17_spill]] %s3403_s27  ;;  %s3520_s29 = sadd.s32 4294967295, %s3407_s28   ;;  %s3407_s28 = sphi %s3505_s28, %s4091_s28   ;;  %s3403_s27 = sphi %s3503_s27, %s4088_s27   ;;  %s3399_s26 = sphi %s3501_s26, %s4090_s26   ;;  %s3395_s25 = sphi %s3499_s25, %s4089_s25  }
   0xd   : > { %s2600_s30 = sadd.s32 4294967294, %s3407_s28   ;;  %p51_p0 = scmp.ne.s32.totalorder %s3399_s26, %s3395_s25 }
   0xe   : > { %p4049_p1 = scmp.eq.s32.totalorder %s3520_s29, 0  ;;  %p333_p3 = scmp.eq.s32.totalorder %s2600_s30, 1 }
   0xf   : > { %p2601_p5 = scmp.ge.s32.totalorder %s3407_s28, 1  ;;  %p340_p7 = scmp.lt.s32.totalorder %s3407_s28, 3 }
  0x10   : > { %p3529_p4 = por %p4049_p1, %p51_p0  ;;  %p3534_p6 = por %p333_p3, %p51_p0 }
  0x11   : > { %p3539_p8 = pnand %p2601_p5, %p340_p7  ;;  %s3409_s17 = smov [#allocation6]  }
  0x12   : > { %s4062_s14 = scalar_select %p3529_p4, 1, 0 }
  0x13   : > { %s4063_s15 = scalar_select %p3534_p6, 1, 0 }
  0x14   : > { %s4065_s16 = scalar_select %p3539_p8, 1, 0 }
  0x15   : > { %4064 = sst [smem:[#allocation18_spill]] %s4063_s15  ;;  %s352_s18 = sshll.u32 %s3409_s17, 4  ;;  %s353_s18 = int_to_ptr.vmem [resolvable:$true] %s352_s18 }
  0x16   : > { %p2956_p9 = pneg %p3539_p8  ;;  %s3410_s20 = smov [#allocation9]  }
  0x17   : > { %s390_s21 = sshll.u32 %s3410_s20, 4  ;;  %s3214_s22 = scalar_lea.vmem %s353_s18, 3072  ;;  %s391_s21 = int_to_ptr.vmem [resolvable:$true] %s390_s21 }
  0x18   : > { %p3548_p11 = pnand %p2956_p9, %p4049_p1  ;;  %p3215_p13 = scmp.ne.s32.totalorder %s353_s18, %s3214_s22 }
  0x19   : > { %p3222_p5 = scmp.lt.s32.totalorder %s353_s18, %s353_s18  ;;  %p3223_p7 = scmp.lt.s32.totalorder %s3214_s22, %s3214_s22 }
  0x1a   : > { %p3205_p12 = pneg %p3548_p11 }
  0x1b   : > { %p3224_p10 = por %p3223_p7, %p3222_p5 }
  0x1c   : > { %p3217_p0 = pnand %p3215_p13, %p3205_p12 }
  0x1e   : > { %p3218_p3 = pneg %p3217_p0 }
  0x20   : > { %p3225_p9 = pnand %p3224_p10, %p3218_p3 }
  0x22   : > { %3228 = shalt.err (!%p3225_p9)
}
  0x23   : > { %s3411_s23 = smov 192   ;;  %s3412_s24 = smov 12  }
  0x24   : > { %s4067_s1 = sld [smem:[#allocation20_spill]]  ;;  %s3240_s20 = scalar_lea.vmem %s391_s21, 2048 }
  0x25   : > { %p3241_p1 = scmp.ne.s32.totalorder %s391_s21, %s3240_s20  ;;  %p3248_p2 = scmp.lt.s32.totalorder %s391_s21, %s391_s21 }
  0x26   : > { %p3249_p6 = scmp.lt.s32.totalorder %s3240_s20, %s3240_s20 }
  0x27   : > { %p3243_p13 = pnand %p3241_p1, %p3205_p12 }
  0x28   : > { %p3250_p5 = por %p3249_p6, %p3248_p2 }
  0x29   : > { %p3244_p0 = pneg %p3243_p13 }
  0x2a   : > { %2959 = dma.hbm_to_vmem [thread:$0]  (!%p3548_p11), %s4067_s1, 3072, %s353_s18, [#allocation7], %s3411_s23, %s3411_s23, %s3412_s24  }
  0x2b   : > { %p3251_p10 = pnand %p3250_p5, %p3244_p0 }
  0x2d   : > { %3254 = shalt.err (!%p3251_p10)
}
  0x2e   : > { %s4051_s22 = smov 128   ;;  %s4052_s15 = smov 8  }
  0x2f   : > { %s4068_s7 = sld [smem:[#allocation22_spill]]  ;;  %s3415_s24 = smov [#allocation8]  }
  0x30   : > { %s368_s30 = sshll.u32 %s3415_s24, 4  ;;  %s369_s30 = int_to_ptr.vmem [resolvable:$true] %s368_s30 }
  0x31   : > { %s3266_s17 = scalar_lea.vmem %s369_s30, 1024  ;;  %p3274_p3 = scmp.lt.s32.totalorder %s369_s30, %s369_s30 }
  0x32   : > { %p3267_p1 = scmp.ne.s32.totalorder %s369_s30, %s3266_s17  ;;  %p3275_p7 = scmp.lt.s32.totalorder %s3266_s17, %s3266_s17 }
  0x34   : > { %p3269_p2 = pnand %p3267_p1, %p3205_p12  ;;  %p3276_p9 = por %p3275_p7, %p3274_p3 }
  0x35   : > { %2965 = dma.hbm_to_vmem [thread:$0]  (!%p3548_p11), %s4068_s7, 2048, %s391_s21, [#allocation10], %s4051_s22, %s4051_s22, %s4052_s15  }
  0x36   : > { %p3270_p6 = pneg %p3269_p2 }
  0x38   : > { %p3277_p13 = pnand %p3276_p9, %p3270_p6 }
  0x3a   : > { %3280 = shalt.err (!%p3277_p13)
}
  0x3b   : > { %s3416_s20 = smov 64   ;;  %s3417_s1 = smov 4  }
  0x3c   : > { %s4069_s3 = sld [smem:[#allocation21_spill]]  ;;  %s3418_s23 = smov [#allocation11]  }
  0x3d   : > { %s406_s24 = sshll.u32 %s3418_s23, 4  ;;  %s407_s24 = int_to_ptr.vmem [resolvable:$true] %s406_s24 }
  0x3e   : > { %s3292_s22 = scalar_lea.vmem %s407_s24, 2048  ;;  %p3300_p1 = scmp.lt.s32.totalorder %s407_s24, %s407_s24 }
  0x3f   : > { %p3293_p0 = scmp.ne.s32.totalorder %s407_s24, %s3292_s22  ;;  %p3301_p2 = scmp.lt.s32.totalorder %s3292_s22, %s3292_s22 }
  0x41   : > { %p3295_p5 = pnand %p3293_p0, %p3205_p12  ;;  %p3302_p6 = por %p3301_p2, %p3300_p1 }
  0x42   : > { %2962 = dma.hbm_to_vmem [thread:$0]  (!%p3548_p11), %s4069_s3, 1024, %s369_s30, [#allocation7], %s3416_s20, %s3416_s20, %s3417_s1  }
  0x43   : > { %p3296_p10 = pneg %p3295_p5 }
  0x45   : > { %p3303_p3 = pnand %p3302_p6, %p3296_p10 }
  0x47   : > { %3306 = shalt.err (!%p3303_p3)
}
  0x48   : > { %s4070_s9 = sld [smem:[#allocation23_spill]]  ;;  %s3590_s22 = sadd.s32 1, %s3407_s28  }
  0x49   : > { %s38_s30 = sadd.s32 1, %s3403_s27  ;;  %s35_s19 = ssub.s32 %s3407_s28, %s3590_s22 }
  0x4a   : > { %p45_p12 = scmp.ne.s32.totalorder %s3403_s27, %s3399_s26  ;;  %p36_p7 = scmp.eq.s32.totalorder %s35_s19, 0 }
  0x4b   : > { %p46_p9 = scmp.eq.s32.totalorder %s3407_s28, 0  ;;  %p4071_p13 = scmp.eq.s32.totalorder %s3520_s29, 1 }
  0x4c   : > { %p2981_p5 = scmp.lt.s32.totalorder %s3407_s28, 2  ;;  %s429_s18 = sand.u32 1, %s3403_s27  }
  0x4d   : > { %p3600_p0 = por %p4071_p13, %p45_p12  ;;  %p47_p10 = por %p46_p9, %p45_p12 }
  0x4e   : > { %2968 = dma.hbm_to_vmem [thread:$0]  (!%p3548_p11), %s4070_s9, 2048, %s407_s24, [#allocation10], %s3416_s20, %s3416_s20, %s3417_s1  }
  0x4f   : > { %s4072_s15 = scalar_select %p3600_p0, 1, 0 }
  0x50   : > { %s3606_s21 = scalar_select %p36_p7, %s3403_s27, %s38_s30  }
  0x51   : > { %s2607_s23 = sshll.u32 %s429_s18, 5  ;;  %s2717_s1 = sshll.u32 %s3407_s28, 9 }
  0x52   : > { %4073 = sst [smem:[#allocation19_spill]] %s3606_s21  ;;  %s3613_s17 = scalar_lea.hbm %s4035_s0, %s2717_s1 }
  0x53   : > { %s433_s19 = scalar_lea.vmem [#allocation3], %s2607_s23  ;;  %p3617_p11 = pnand %p2981_p5, %p47_p10 }
  0x54   : > { %s441_s3 = sshll.u32 %s433_s19, 4  ;;  %s3621_s30 = scalar_lea.sflag [#allocation4], %s429_s18  ;;  %s3615_s3 = int_to_ptr.vmem [resolvable:$true] %s441_s3 }
  0x55   : > { %s3307_s9 = scalar_lea.hbm %s3613_s17, 512  ;;  %p3309_p2 = pneg %p3617_p11 }
  0x56   : > { %p3308_p1 = scmp.ne.s32.totalorder %s3613_s17, %s3307_s9  ;;  %s3312_s23 = scalar_lea.hbm %s4035_s0, 1024 }
  0x57   : > { %p3313_p12 = scmp.lt.s32.totalorder %s3613_s17, %s4035_s0  ;;  %p3314_p7 = scmp.lt.s32.totalorder %s3312_s23, %s3307_s9 }
  0x58   : > { %p3310_p6 = pnand %p3309_p2, %p3308_p1 }
  0x59   : > { %p3315_p9 = por %p3314_p7, %p3313_p12 }
  0x5a   : > { %p3311_p3 = pneg %p3310_p6 }
  0x5c   : > { %p3316_p13 = pnand %p3315_p9, %p3311_p3 }
  0x5e   : > { %3319 = shalt.err (!%p3316_p13)
}
  0x5f   : > { %s3320_s18 = scalar_lea.vmem %s3615_s3, 512  ;;  %s3419_s21 = smov [#allocation3]  }
  0x60   : > { %p3321_p5 = scmp.ne.s32.totalorder %s3615_s3, %s3320_s18  ;;  %s3325_s27 = sshll.u32 %s3419_s21, 4  ;;  %s3326_s27 = int_to_ptr.vmem [resolvable:$false] %s3325_s27 }
  0x61   : > { %s3327_s1 = scalar_lea.vmem %s3326_s27, 1024  ;;  %p3328_p6 = scmp.lt.s32.totalorder %s3615_s3, %s3326_s27 }
  0x62   : > { %p3323_p10 = pnand %p3321_p5, %p3309_p2  ;;  %p3329_p0 = scmp.lt.s32.totalorder %s3327_s1, %s3320_s18 }
  0x64   : > { %p3324_p1 = pneg %p3323_p10  ;;  %p3330_p4 = por %p3329_p0, %p3328_p6 }
  0x66   : > { %p3331_p8 = pnand %p3330_p4, %p3324_p1 }
  0x68   : > { %3334 = shalt.err (!%p3331_p8)
}
  0x69   : > { %s4075_s9 = smov 8   ;;  %s4076_s20 = smov 128  }
  0x6a   : > { %2972 = dma.hbm_to_vmem [thread:$0]  (!%p3617_p11), %s3613_s17, 512, %s3615_s3, %s3621_s30, %s4076_s20, %s4076_s20, %s4075_s9  }
  0x6b   : > { %p4077_p2 = scmp.ne.s32.totalorder %s4065_s16, 0 }
  0x6c   : > { %s3648_s21 = sand.u32 (!%p4077_p2), 1, %s3399_s26   ;;  %p4078_p4 = scmp.ne.s32.totalorder (!%p4077_p2), %s4062_s14, 0 }
  0x6d   : > { %453 = sbr.rel (%p4077_p2) target bundleno = 2507 (0x9cb), region = 72  ;;  %s2612_s27 = sshll.u32 (!%p4077_p2), %s3648_s21, 5 }
  0x6e   : > { %s456_s23 = scalar_lea.sflag (!%p4077_p2), [#allocation4], %s3648_s21  ;;  %s3654_s7 = scalar_lea.vmem (!%p4077_p2), [#allocation3], %s2612_s27 }
  0x72   : > { %3378 = dma.done.wait (%p4078_p4), %s456_s23, 512  }
  0x73   : > { %3380 = vsyncadd (%p4078_p4), %s456_s23, 4294966784  ;;  %p4079_p8 = scmp.eq.s32.totalorder %s3520_s29, 0 }
  0x75   : > { %3382 = dma.done.wait (%p4079_p8), [#allocation7], 4096   ;;  %p4080_p0 = pmov %p4079_p8 }
  0x77   : > { %3384 = vsyncadd (%p4080_p0), [#allocation7], 4294963200  ;;  %p4081_p11 = pmov %p4080_p0 }
  0x78   : > { %p4082_p3 = pmov %p4080_p0 }
  0x79   : > { %3386 = dma.done.wait (%p4081_p11), [#allocation10], 4096  }
  0x7a   : > { %3388 = vsyncadd (%p4082_p3), [#allocation10], 4294963200  ;;  %v3420_v0 = vmov 0   ;;  %v3037_v1 = vld [vmem:[#allocation6 + $0xac] ss:$12 sps:$4 sm:$0xff]   ;;  %v529_v8 = vld [vmem:[%s3654_s7] sm:$0xff]  ;;  %v568_v32 = vlaneseq }
  0x7b   : > { %743 = vmatprep.mubr.bf16.mxu0 %v3420_v0  ;;  %v3039_v2 = vld [vmem:[#allocation6 + $0xa8] ss:$12 sps:$4 sm:$0xff]   ;;  %711 = vmatprep.subr.bf16.mxu0 %v3037_v1  ;;  %v3042_v4 = vld [vmem:[#allocation6 + $0x90] ss:$12 sps:$4 sm:$0xff]   ;;  %v3045_v6 = vld [vmem:[#allocation6 + $0x78] ss:$12 sps:$4 sm:$0xff]  }
  0x7c   : > { %v3040_v3 = vld [vmem:[#allocation6 + $0x94] ss:$12 sps:$4 sm:$0xff]   ;;  %712 = vmatpush1.bf16.msra.mxu0 %v3039_v2  ;;  %v3043_v5 = vld [vmem:[#allocation6 + $0x7c] ss:$12 sps:$4 sm:$0xff]   ;;  %v3046_v7 = vld [vmem:[#allocation6 + $0x64] ss:$12 sps:$4 sm:$0xff]  }
  0x7d   : > { %713 = vmatprep.subr.bf16.mxu0 %v3040_v3  ;;  %v3048_v9 = vld [vmem:[#allocation6 + $0x60] ss:$12 sps:$4 sm:$0xff]   ;;  %v3061_v13 = vld [vmem:[#allocation6 + $0xb0] ss:$12 sps:$4 sm:$0xff]   ;;  %v3062_v14 = vld [vmem:[#allocation6 + $0x98] ss:$12 sps:$4 sm:$0xff]  }
  0x7e   : > { %v3049_v10 = vld [vmem:[#allocation6 + $0x4c] ss:$12 sps:$4 sm:$0xff]   ;;  %v3051_v15 = vld [vmem:[#allocation6 + $0x48] ss:$12 sps:$4 sm:$0xff]   ;;  %2800 = vmatprep.subr.bf16.mxu1 %v3061_v13  ;;  %v3054_v18 = vld [vmem:[#allocation6 + $0x30] ss:$12 sps:$4 sm:$0xff]  }
  0x7f   : > { %v530_v11 = vld [vmem:[%s3654_s7 + $0x8] sm:$0xff]  ;;  %v3052_v16 = vld [vmem:[#allocation6 + $0x34] ss:$12 sps:$4 sm:$0xff]   ;;  %2801 = vmatpush3.bf16.msra.mxu1 %v3061_v13  ;;  %v3057_v21 = vld [vmem:[#allocation6 + $0x18] ss:$12 sps:$4 sm:$0xff]   ;;  %v3421_v31 = vmov 0.0  }
  0x80   : > { %714 = vmatpush1.bf16.msra.mxu0 %v3042_v4  ;;  %v533_v12 = vpack.c.bf16 %v530_v11, %v529_v8  ;;  %2802 = vmatprep.subr.bf16.mxu1 %v3062_v14  ;;  %v3063_v17 = vld [vmem:[#allocation6 + $0x80] ss:$12 sps:$4 sm:$0xff]   ;;  %v3055_v19 = vld [vmem:[#allocation6 + $0x1c] ss:$12 sps:$4 sm:$0xff]   ;;  %v3058_v22 = vld [vmem:[#allocation6 + $0x4] ss:$12 sps:$4 sm:$0xff]  }
  0x81   : > { %715 = vmatprep.subr.bf16.mxu0 %v3043_v5  ;;  %v3064_v20 = vld [vmem:[#allocation6 + $0x68] ss:$12 sps:$4 sm:$0xff]   ;;  %v3065_v23 = vld [vmem:[#allocation6 + $0x50] ss:$12 sps:$4 sm:$0xff]   ;;  %v3060_v24 = vld [vmem:[#allocation6] ss:$12 sps:$4 sm:$0xff]  }
  0x82   : > { %2816 = vmatprep.mubr.bf16.mxu1 %v533_v12  ;;  %v3066_v25 = vld [vmem:[#allocation6 + $0x38] ss:$12 sps:$4 sm:$0xff]   ;;  %v3067_v26 = vld [vmem:[#allocation6 + $0x20] ss:$12 sps:$4 sm:$0xff]   ;;  %v531_v27 = vld [vmem:[%s3654_s7 + $0x10] sm:$0xff]  ;;  %vm3422_vm0 = vmmov 0  }
  0x83   : > { %2803 = vmatpush3.bf16.msra.mxu1 %v3062_v14  ;;  %v532_v28 = vld [vmem:[%s3654_s7 + $0x18] sm:$0xff]  ;;  %v3068_v29 = vld [vmem:[#allocation6 + $0x8] ss:$12 sps:$4 sm:$0xff]   ;;  %v3680_v33 = vshrl.u32 %v568_v32, 7  ;;  %v521_v36 = vld [vmem:[%s4037_s2] sm:$0x7] }
  0x84   : > { %716 = vmatpush1.bf16.msra.mxu0 %v3045_v6  ;;  %2804 = vmatprep.subr.bf16.mxu1 %v3063_v17  ;;  %v534_v30 = vpack.c.bf16 %v532_v28, %v531_v27  ;;  %vm819_vm1 = vcmask 261120   ;;  %s3423_s16 = smov 64   ;;  %s3424_s17 = smov 96   ;;  %vm867_vm2 = vcmask 130048   ;;  %vm1317_vm3 = vcmask 523264  }
  0x85   : > { %717 = vmatprep.subr.bf16.mxu0 %v3046_v7  ;;  %v574_v34 = vsub.s32 1, %v3680_v33  ;;  %v570_v38 = vsub.s32 0, %v3680_v33  ;;  %s3425_s30 = smov 32   ;;  %v578_v60 = vsub.s32 2, %v3680_v33  ;;  %vm1320_vm4 = vcmask 785408   ;;  %s517_s19 = scalar_lea.vmem [#allocation12], %s2612_s27 }
  0x86   : > { %s2719_s18 = sshll.u32 %s3520_s29, 9  ;;  %s2489_s1 = sshll.u32 %s517_s19, 4  ;;  %s3992_s1 = int_to_ptr.vmem [resolvable:$true] %s2489_s1 }
  0x87   : > { %2805 = vmatpush3.bf16.msra.mxu1 %v3063_v17  ;;  %v575_v39 = vrot.slane %v521_v36, %v574_v34  ;;  %v571_v42 = vrot.slane %v521_v36, %v570_v38  ;;  %v579_v62 = vrot.slane %v521_v36, %v578_v60  ;;  %s3990_s27 = scalar_lea.hbm %s4048_s13, %s2719_s18  ;;  %s2475_s23 = scalar_lea.sflag [#allocation5], %s3648_s21 }
  0x88   : > { %718 = vmatpush1.bf16.msra.mxu0 %v3048_v9  ;;  %2806 = vmatprep.subr.bf16.mxu1 %v3064_v20  ;;  %p4083_p7 = scmp.ne.s32.totalorder %s4072_s15, 0  ;;  %s3426_s29 = smov [#allocation12]  }
  0x89   : > { %719 = vmatprep.subr.bf16.mxu0 %v3049_v10  ;;  %s3339_s3 = sshll.u32 %s3426_s29, 4  ;;  %s3340_s3 = int_to_ptr.vmem [resolvable:$false] %s3339_s3 }
  0x8a   : > { %s3341_s14 = scalar_lea.vmem %s3340_s3, 1024  ;;  %p3342_p5 = scmp.lt.s32.totalorder %s3992_s1, %s3340_s3 }
  0x8b   : > { %2807 = vmatpush3.bf16.msra.mxu1 %v3064_v20 }
  0x8c   : > { %720 = vmatpush1.bf16.msra.mxu0 %v3051_v15  ;;  %2808 = vmatprep.subr.bf16.mxu1 %v3065_v23 }
  0x8d   : > { %721 = vmatprep.subr.bf16.mxu0 %v3052_v16 }
  0x8f   : > { %2809 = vmatpush3.bf16.msra.mxu1 %v3065_v23 }
  0x90   : > { %722 = vmatpush1.bf16.msra.mxu0 %v3054_v18  ;;  %2810 = vmatprep.subr.bf16.mxu1 %v3066_v25 }
  0x91   : > { %723 = vmatprep.subr.bf16.mxu0 %v3055_v19 }
  0x93   : > { %2811 = vmatpush3.bf16.msra.mxu1 %v3066_v25 }
  0x94   : > { %724 = vmatpush1.bf16.msra.mxu0 %v3057_v21  ;;  %2812 = vmatprep.subr.bf16.mxu1 %v3067_v26 }
  0x95   : > { %725 = vmatprep.subr.bf16.mxu0 %v3058_v22 }
  0x97   : > { %2813 = vmatpush3.bf16.msra.mxu1 %v3067_v26 }
  0x98   : > { %726 = vmatpush1.bf16.msra.mxu0 %v3060_v24  ;;  %2814 = vmatprep.subr.bf16.mxu1 %v3068_v29 }
  0x99   : > { %2820 = vmatprep.subr.bf16.mxu0 %v3421_v31 }
  0x9b   : > { %744 = vmatmul.mubr.bf16.vlgmr.msra.gmra.mxu0 %v533_v12  ;;  %2815 = vmatpush3.bf16.msra.mxu1 %v3068_v29 }
  0x9c   : > { %753 = vmatprep.mubr.bf16.mxu0 %v3420_v0  ;;  %2832 = vmatprep.subr.bf16.mxu1 %v3421_v31 }
  0x9e   : > { %2817 = vmatmul.mubr.bf16.vlgmr.msra.gmra.mxu1 %v534_v30 }
  0x9f   : > { %2834 = vmatprep.mubr.msk.bf16.mxu1 %vm3422_vm0, %v3421_v31 }
  0xa3   : > { %754 = vmatmul.mubr.bf16.gmra.mxu0 %v534_v30 }
  0xa4   : > { %2822 = vmatprep.mubr.msk.bf16.mxu0 %vm3422_vm0, %v3421_v31 }
 0x15b   : > { %v745_v35 = vpop.f32.mrf.mxu0 }
 0x15c   : > { %v746_v49 = vadd.f32 %v745_v35, %v571_v42 }
 0x15d   : > { %v747_v37 = vpop.f32.mrf.mxu0 }
 0x15e   : > { %v748_v43 = vadd.f32 %v747_v37, %v575_v39  ;;  %v2818_v61 = vpop.f32.mrf.mxu1 }
 0x15f   : > { %v749_v40 = vpop.f32.mrf.mxu0  ;;  %v807_v1 = vadd.f32 %v2818_v61, %v579_v62 }
 0x160   : > { %v750_v46 = vadd.f32 %v749_v40, %v571_v42  ;;  %v798_v63 = vpop.f32.mrf.mxu1 }
 0x161   : > { %v751_v41 = vpop.f32.mrf.mxu0  ;;  %v799_v4 = vadd.f32 %v798_v63, %v579_v62 }
 0x162   : > { %v752_v44 = vadd.f32 %v751_v41, %v575_v39  ;;  %v813_v52 = vpack.c.bf16 %v750_v46, %v746_v49  ;;  %v2819_v2 = vpop.f32.mrf.mxu1 }
 0x163   : > { %v755_v45 = vpop.f32.mrf.mxu0  ;;  %v810_v3 = vadd.f32 %v2819_v2, %v579_v62 }
 0x164   : > { %v814_v47 = vpack.c.bf16 %v752_v44, %v748_v43  ;;  %v756_v53 = vadd.f32 %v755_v45, %v571_v42  ;;  %v801_v6 = vpop.f32.mrf.mxu1 }
 0x165   : > { %v757_v48 = vpop.f32.mrf.mxu0  ;;  %v3709_v5 = vpack.c.bf16 %v810_v3, %v807_v1  ;;  %v802_v7 = vadd.f32 %v801_v6, %v579_v62 }
 0x166   : > { %1063 = vrot.lane.b32.xlu1 %v814_v47, %s3423_s16  ;;  %940 = vrot.lane.b32.xlu0 %v814_v47, %s3424_s17  ;;  %v824_v50 = vsel %vm819_vm1, %v814_v47, 0  ;;  %v758_v55 = vadd.f32 %v757_v48, %v575_v39 }
 0x167   : > { %2821 = vmatpush3.bf16.xpose.msra.mxu0 %v824_v50  ;;  %v759_v51 = vpop.f32.mrf.mxu0  ;;  %v3711_v8 = vpack.c.bf16 %v802_v7, %v799_v4 }
 0x168   : > { %2826 = vmatprep.subr.bf16.mxu0 %v3421_v31  ;;  %v760_v56 = vadd.f32 %v759_v51, %v571_v42 }
 0x169   : > { %v761_v54 = vpop.f32.mrf.mxu0 }
 0x16a   : > { %1061 = vrot.lane.b32.xlu1 %v813_v52, %s3423_s16  ;;  %937 = vrot.lane.b32.xlu0 %v813_v52, %s3424_s17  ;;  %v762_v57 = vadd.f32 %v761_v54, %v575_v39  ;;  %v816_v58 = vpack.c.bf16 %v760_v56, %v756_v53 }
 0x16c   : > { %v817_v59 = vpack.c.bf16 %v762_v57, %v758_v55 }
 0x16e   : > { %1183 = vrot.lane.b32.xlu1 %v813_v52, %s3425_s30  ;;  %1185 = vrot.lane.b32.xlu0 %v814_v47, %s3425_s30  ;;  %v1336_v18 = vsel %vm819_vm1, %v817_v59, 0 }
 0x16f   : > { %2823 = vmatmul.mubr.msk.bf16.vlgmr.msra.gmra.mxu0 %vm819_vm1, %v813_v52 }
 0x170   : > { %2828 = vmatprep.mubr.msk.bf16.mxu0 %vm3422_vm0, %v3421_v31  ;;  %2827 = vmatpush3.bf16.msra.mxu0 %v3711_v8 }
 0x171   : > { %2838 = vmatprep.subr.bf16.mxu0 %v3421_v31 }
 0x172   : > { %1451 = vrot.lane.b32.xlu0 %v817_v59, %s3424_s17  ;;  %1448 = vrot.lane.b32.xlu1 %v816_v58, %s3424_s17 }
 0x176   : > { %1574 = vrot.lane.b32.xlu0 %v817_v59, %s3423_s16  ;;  %1572 = vrot.lane.b32.xlu1 %v816_v58, %s3423_s16 }
 0x17a   : > { %1696 = vrot.lane.b32.xlu0 %v817_v59, %s3425_s30  ;;  %1694 = vrot.lane.b32.xlu1 %v816_v58, %s3425_s30 }
 0x17e   : > { %1011 = vrot.lane.b32.xlu1 %v3711_v8, %s3424_s17 }
 0x1d8   : > { %v941_v9 = vpop.permute.xlu0 %940  ;;  %v1064_v11 = vpop.permute.xlu1 %1063 }
 0x1d9   : > { %v946_v10 = vsel %vm819_vm1, %v941_v9, 0  ;;  %v1069_v13 = vsel %vm819_vm1, %v1064_v11, 0 }
 0x1da   : > { %2833 = vmatpush3.bf16.xpose.msra.mxu1 %v946_v10 }
 0x1db   : > { %2844 = vmatprep.subr.bf16.mxu1 %v3421_v31 }
 0x1dc   : > { %v938_v12 = vpop.permute.xlu0 %937  ;;  %v1062_v15 = vpop.permute.xlu1 %1061 }
 0x1e0   : > { %v1186_v14 = vpop.permute.xlu0 %1185  ;;  %v1184_v17 = vpop.permute.xlu1 %1183 }
 0x1e1   : > { %2835 = vmatmul.mubr.msk.bf16.vlgmr.msra.gmra.mxu1 %vm819_vm1, %v938_v12  ;;  %v1191_v16 = vsel %vm819_vm1, %v1186_v14, 0 }
 0x1e2   : > { %2845 = vmatpush3.bf16.xpose.msra.mxu1 %v1069_v13  ;;  %2846 = vmatprep.mubr.msk.bf16.mxu1 %vm3422_vm0, %v3421_v31 }
 0x1e3   : > { %2856 = vmatprep.subr.bf16.mxu1 %v3421_v31 }
 0x1e4   : > { %v1452_v19 = vpop.permute.xlu0 %1451  ;;  %v1449_v22 = vpop.permute.xlu1 %1448 }
 0x1e5   : > { %v1457_v20 = vsel %vm819_vm1, %v1452_v19, 0 }
 0x1e8   : > { %v1575_v21 = vpop.permute.xlu0 %1574  ;;  %v1573_v25 = vpop.permute.xlu1 %1572 }
 0x1e9   : > { %2847 = vmatmul.mubr.msk.bf16.vlgmr.msra.gmra.mxu1 %vm819_vm1, %v1062_v15  ;;  %v1580_v23 = vsel %vm819_vm1, %v1575_v21, 0 }
 0x1ea   : > { %2857 = vmatpush3.bf16.xpose.msra.mxu1 %v1191_v16  ;;  %2858 = vmatprep.mubr.msk.bf16.mxu1 %vm3422_vm0, %v3421_v31 }
 0x1eb   : > { %2868 = vmatprep.subr.bf16.mxu1 %v3421_v31 }
 0x1ec   : > { %v1697_v24 = vpop.permute.xlu0 %1696  ;;  %v1695_v27 = vpop.permute.xlu1 %1694 }
 0x1ed   : > { %v1702_v26 = vsel %vm819_vm1, %v1697_v24, 0 }
 0x1f0   : > { %v1012_v55 = vpop.permute.xlu1 %1011 }
 0x1f1   : > { %2859 = vmatmul.mubr.msk.bf16.vlgmr.msra.gmra.mxu1 %vm819_vm1, %v1184_v17 }
 0x1f2   : > { %2869 = vmatpush3.bf16.xpose.msra.mxu1 %v1336_v18  ;;  %2870 = vmatprep.mubr.msk.bf16.mxu1 %vm3422_vm0, %v3421_v31 }
 0x1f3   : > { %2880 = vmatprep.subr.bf16.mxu1 %v3421_v31 }
 0x1f9   : > { %2871 = vmatmul.mubr.msk.bf16.vlgmr.msra.gmra.mxu1 %vm819_vm1, %v816_v58 }
 0x1fa   : > { %2881 = vmatpush3.bf16.xpose.msra.mxu1 %v1457_v20  ;;  %2882 = vmatprep.mubr.msk.bf16.mxu1 %vm3422_vm0, %v3421_v31 }
 0x1fb   : > { %2892 = vmatprep.subr.bf16.mxu1 %v3421_v31 }
 0x201   : > { %2883 = vmatmul.mubr.msk.bf16.vlgmr.msra.gmra.mxu1 %vm819_vm1, %v1449_v22 }
 0x202   : > { %2893 = vmatpush3.bf16.xpose.msra.mxu1 %v1580_v23  ;;  %2894 = vmatprep.mubr.msk.bf16.mxu1 %vm3422_vm0, %v3421_v31 }
 0x203   : > { %2904 = vmatprep.subr.bf16.mxu1 %v3421_v31 }
 0x209   : > { %2895 = vmatmul.mubr.msk.bf16.vlgmr.msra.gmra.mxu1 %vm819_vm1, %v1573_v25 }
 0x20a   : > { %2905 = vmatpush3.bf16.xpose.msra.mxu1 %v1702_v26  ;;  %2906 = vmatprep.mubr.msk.bf16.mxu1 %vm3422_vm0, %v3421_v31 }
 0x211   : > { %2907 = vmatmul.mubr.msk.bf16.vlgmr.msra.gmra.mxu1 %vm819_vm1, %v1695_v27 }
 0x22f   : > { %v860_v28 = vpop.f32.mrf.mxu0 }
 0x230   : > { %v868_v29 = vsel %vm867_vm2, %v860_v28, -inf }
 0x231   : > { %869 = vmax.xlane.f32.xlu0 %v868_v29  ;;  %v2824_v30 = vpop.f32.mrf.mxu0 }
 0x233   : > { %v863_v32 = vpop.f32.mrf.mxu0 }
 0x234   : > { %v871_v35 = vsel %vm867_vm2, %v863_v32, -inf }
 0x235   : > { %872 = vmax.xlane.f32.xlu1 %v871_v35  ;;  %v2825_v36 = vpop.f32.mrf.mxu0 }
 0x2a1   : > { %v3751_v37 = vpop.f32.mrf.mxu1 }
 0x2a2   : > { %v989_v39 = vsel %vm867_vm2, %v3751_v37, -inf }
 0x2a3   : > { %v2836_v40 = vpop.f32.mrf.mxu1  ;;  %990 = vmax.xlane.f32.xlu0 %v989_v39 }
 0x2a5   : > { %v3755_v41 = vpop.f32.mrf.mxu1 }
 0x2a6   : > { %v992_v42 = vsel %vm867_vm2, %v3755_v41, -inf }
 0x2a7   : > { %v2837_v43 = vpop.f32.mrf.mxu1  ;;  %993 = vmax.xlane.f32.xlu0 %v992_v42 }
 0x2a9   : > { %v3759_v44 = vpop.f32.mrf.mxu1 }
 0x2aa   : > { %v1112_v45 = vsel %vm867_vm2, %v3759_v44, -inf }
 0x2ab   : > { %v2848_v46 = vpop.f32.mrf.mxu1  ;;  %1113 = vmax.xlane.f32.xlu1 %v1112_v45 }
 0x2ad   : > { %v3763_v47 = vpop.f32.mrf.mxu1 }
 0x2ae   : > { %v1115_v48 = vsel %vm867_vm2, %v3763_v47, -inf }
 0x2af   : > { %v2849_v49 = vpop.f32.mrf.mxu1  ;;  %1116 = vmax.xlane.f32.xlu0 %v1115_v48 }
 0x2b1   : > { %v3767_v50 = vpop.f32.mrf.mxu1 }
 0x2b2   : > { %v1234_v51 = vsel %vm867_vm2, %v3767_v50, -inf }
 0x2b3   : > { %v2860_v52 = vpop.f32.mrf.mxu1  ;;  %1235 = vmax.xlane.f32.xlu1 %v1234_v51 }
 0x2b5   : > { %v3771_v53 = vpop.f32.mrf.mxu1 }
 0x2b6   : > { %v1237_v19 = vsel %vm867_vm2, %v3771_v53, -inf }
 0x2b7   : > { %v2861_v54 = vpop.f32.mrf.mxu1 }
 0x2b9   : > { %v3773_v56 = vpop.f32.mrf.mxu1 }
 0x2ba   : > { %v870_v57 = vpop.xlane.xlu0 %869  ;;  %v1379_v21 = vsel %vm867_vm2, %v3773_v56, -inf }
 0x2bb   : > { %v874_v58 = vsub.f32 %v860_v28, %v870_v57  ;;  %v2872_v59 = vpop.f32.mrf.mxu1 }
 0x2bd   : > { %v3775_v60 = vpop.f32.mrf.mxu1  ;;  %v876_v61 = vmul.f32 1.442695, %v874_v58 }
 0x2be   : > { %v873_v62 = vpop.xlane.xlu1 %872  ;;  %v1382_v20 = vsel %vm867_vm2, %v3775_v60, -inf }
 0x2bf   : > { %v875_v63 = vsub.f32 %v863_v32, %v873_v62  ;;  %v2873_v1 = vpop.f32.mrf.mxu1  ;;  %3119 = vpow2.f32 %v876_v61 }
 0x2c1   : > { %v878_v2 = vmul.f32 1.442695, %v875_v63  ;;  %v3777_v3 = vpop.f32.mrf.mxu1 }
 0x2c2   : > { %v1500_v22 = vsel %vm867_vm2, %v3777_v3, -inf }
 0x2c3   : > { %3121 = vpow2.f32 %v878_v2  ;;  %v2884_v4 = vpop.f32.mrf.mxu1 }
 0x2c4   : > { %1255 = vrot.lane.b32.xlu1 %v3711_v8, %s3425_s30 }
 0x2c5   : > { %1133 = vrot.lane.b32.xlu0 %v3711_v8, %s3423_s16  ;;  %v3783_v6 = vpop.f32.mrf.mxu1 }
 0x2c6   : > { %v1503_v24 = vsel %vm867_vm2, %v3783_v6, -inf }
 0x2c7   : > { %v2885_v7 = vpop.f32.mrf.mxu1 }
 0x2c9   : > { %v3785_v9 = vpop.f32.mrf.mxu1 }
 0x2ca   : > { %v1623_v23 = vsel %vm867_vm2, %v3785_v9, -inf }
 0x2cb   : > { %v2896_v10 = vpop.f32.mrf.mxu1 }
 0x2cc   : > { %v3789_v12 = vpop.eup %3119 }
 0x2cd   : > { %v3787_v11 = vpop.f32.mrf.mxu1 }
 0x2ce   : > { %v1626_v25 = vsel %vm867_vm2, %v3787_v11, -inf }
 0x2cf   : > { %v2897_v13 = vpop.f32.mrf.mxu1 }
 0x2d0   : > { %v3791_v14 = vpop.eup %3121 }
 0x2d1   : > { %v888_v15 = vpack.c.bf16 %v3791_v14, %v3789_v12  ;;  %v3795_v16 = vpop.f32.mrf.mxu1 }
 0x2d2   : > { %v1745_v26 = vsel %vm867_vm2, %v3795_v16, -inf }
 0x2d3   : > { %2829 = vmatmul.mubr.msk.bf16.vlgmr.msra.gmra.mxu0 %vm867_vm2, %v888_v15  ;;  %v2908_v8 = vpop.f32.mrf.mxu1 }
 0x2d4   : > { %2839 = vmatpush3.bf16.msra.mxu0 %v1012_v55  ;;  %2840 = vmatprep.mubr.msk.bf16.mxu0 %vm3422_vm0, %v3421_v31 }
 0x2d5   : > { %v3800_v17 = vpop.f32.mrf.mxu1  ;;  %2850 = vmatprep.subr.bf16.mxu0 %v3421_v31 }
 0x2d6   : > { %v1748_v27 = vsel %vm867_vm2, %v3800_v17, -inf }
 0x2d7   : > { %v2909_v18 = vpop.f32.mrf.mxu1 }
 0x2e4   : > { %1238 = vmax.xlane.f32.xlu0 %v1237_v19 }
 0x2e8   : > { %1383 = vmax.xlane.f32.xlu0 %v1382_v20  ;;  %1380 = vmax.xlane.f32.xlu1 %v1379_v21 }
 0x2ec   : > { %1501 = vmax.xlane.f32.xlu0 %v1500_v22  ;;  %1624 = vmax.xlane.f32.xlu1 %v1623_v23 }
 0x2f0   : > { %1504 = vmax.xlane.f32.xlu0 %v1503_v24 }
 0x2f4   : > { %1627 = vmax.xlane.f32.xlu0 %v1626_v25 }
 0x2f8   : > { %1746 = vmax.xlane.f32.xlu0 %v1745_v26 }
 0x2fc   : > { %1749 = vmax.xlane.f32.xlu0 %v1748_v27 }
 0x2fd   : > { %1522 = vrot.lane.b32.xlu1 %v3709_v5, %s3424_s17 }
 0x301   : > { %1766 = vrot.lane.b32.xlu1 %v3709_v5, %s3425_s30 }
 0x312   : > { %1644 = vrot.lane.b32.xlu0 %v3709_v5, %s3423_s16 }
 0x32c   : > { %v991_v28 = vpop.xlane.xlu0 %990 }
 0x32d   : > { %v995_v29 = vsub.f32 %v3751_v37, %v991_v28 }
 0x32f   : > { %v997_v30 = vmul.f32 1.442695, %v995_v29 }
 0x330   : > { %v994_v32 = vpop.xlane.xlu0 %993 }
 0x331   : > { %3123 = vpow2.f32 %v997_v30  ;;  %v996_v35 = vsub.f32 %v3755_v41, %v994_v32 }
 0x333   : > { %v999_v36 = vmul.f32 1.442695, %v996_v35 }
 0x334   : > { %v1114_v39 = vpop.xlane.xlu1 %1113 }
 0x335   : > { %3125 = vpow2.f32 %v999_v36  ;;  %v1118_v40 = vsub.f32 %v3759_v44, %v1114_v39 }
 0x337   : > { %v1120_v42 = vmul.f32 1.442695, %v1118_v40 }
 0x338   : > { %v1117_v43 = vpop.xlane.xlu0 %1116 }
 0x339   : > { %3127 = vpow2.f32 %v1120_v42  ;;  %v1119_v45 = vsub.f32 %v3763_v47, %v1117_v43 }
 0x33b   : > { %v1122_v46 = vmul.f32 1.442695, %v1119_v45 }
 0x33c   : > { %v1236_v48 = vpop.xlane.xlu1 %1235  ;;  %v1134_v55 = vpop.permute.xlu0 %1133 }
 0x33d   : > { %3129 = vpow2.f32 %v1122_v46  ;;  %v1240_v37 = vsub.f32 %v3767_v50, %v1236_v48 }
 0x33e   : > { %v3124_v49 = vpop.eup %3123 }
 0x33f   : > { %v1242_v51 = vmul.f32 1.442695, %v1240_v37  ;;  %v1001_v52 = vsel %vm867_vm2, %v3124_v49, 0.0 }
 0x340   : > { %1002 = vadd.xlane.f32.xlu1 %v1001_v52  ;;  %v1256_v61 = vpop.permute.xlu1 %1255 }
 0x341   : > { %3131 = vpow2.f32 %v1242_v51 }
 0x342   : > { %v3126_v41 = vpop.eup %3125 }
 0x343   : > { %v1004_v54 = vsel %vm867_vm2, %v3126_v41, 0.0  ;;  %v1009_v44 = vpack.c.bf16 %v3126_v41, %v3124_v49 }
 0x344   : > { %1005 = vadd.xlane.f32.xlu0 %v1004_v54 }
 0x345   : > { %2841 = vmatmul.mubr.msk.bf16.vlgmr.msra.gmra.mxu0 %vm867_vm2, %v1009_v44 }
 0x346   : > { %v3128_v47 = vpop.eup %3127  ;;  %2851 = vmatpush3.bf16.msra.mxu0 %v1134_v55  ;;  %2852 = vmatprep.mubr.msk.bf16.mxu0 %vm3422_vm0, %v3421_v31 }
 0x347   : > { %v1124_v50 = vsel %vm867_vm2, %v3128_v47, 0.0  ;;  %2862 = vmatprep.subr.bf16.mxu0 %v3421_v31 }
 0x348   : > { %1125 = vadd.xlane.f32.xlu1 %v1124_v50 }
 0x34a   : > { %v3130_v57 = vpop.eup %3129 }
 0x34b   : > { %v1127_v58 = vsel %vm867_vm2, %v3130_v57, 0.0  ;;  %v1132_v59 = vpack.c.bf16 %v3130_v57, %v3128_v47  ;;  %v880_v57 = vsel %vm867_vm2, %v3789_v12, 0.0 }
 0x34c   : > { %1128 = vadd.xlane.f32.xlu1 %v1127_v58 }
 0x34d   : > { %2853 = vmatmul.mubr.msk.bf16.vlgmr.msra.gmra.mxu0 %vm867_vm2, %v1132_v59 }
 0x34e   : > { %v3132_v62 = vpop.eup %3131  ;;  %2863 = vmatpush3.bf16.msra.mxu0 %v1256_v61  ;;  %2864 = vmatprep.mubr.msk.bf16.mxu0 %vm3422_vm0, %v3421_v31 }
 0x34f   : > { %v1246_v63 = vsel %vm867_vm2, %v3132_v62, 0.0  ;;  %2874 = vmatprep.subr.bf16.mxu0 %v3421_v31 }
 0x350   : > { %1247 = vadd.xlane.f32.xlu1 %v1246_v63 }
 0x36d   : > { %v1239_v1 = vpop.xlane.xlu0 %1238 }
 0x36e   : > { %v1241_v2 = vsub.f32 %v3771_v53, %v1239_v1 }
 0x370   : > { %v1244_v4 = vmul.f32 1.442695, %v1241_v2 }
 0x371   : > { %v1384_v7 = vpop.xlane.xlu0 %1383  ;;  %v1381_v10 = vpop.xlane.xlu1 %1380 }
 0x372   : > { %3133 = vpow2.f32 %v1244_v4  ;;  %v1386_v13 = vsub.f32 %v3775_v60, %v1384_v7  ;;  %v1385_v15 = vsub.f32 %v3773_v56, %v1381_v10 }
 0x374   : > { %v1389_v8 = vmul.f32 1.442695, %v1386_v13  ;;  %v1387_v18 = vmul.f32 1.442695, %v1385_v15 }
 0x375   : > { %v1502_v19 = vpop.xlane.xlu0 %1501  ;;  %v1625_v20 = vpop.xlane.xlu1 %1624 }
 0x376   : > { %v1506_v21 = vsub.f32 %v3777_v3, %v1502_v19  ;;  %v1629_v22 = vsub.f32 %v3785_v9, %v1625_v20  ;;  %3135 = vpow2.f32 %v1389_v8 }
 0x377   : > { %3137 = vpow2.f32 %v1387_v18 }
 0x378   : > { %v1508_v23 = vmul.f32 1.442695, %v1506_v21  ;;  %v1631_v53 = vmul.f32 1.442695, %v1629_v22 }
 0x379   : > { %v1505_v24 = vpop.xlane.xlu0 %1504 }
 0x37a   : > { %3139 = vpow2.f32 %v1508_v23  ;;  %v1507_v25 = vsub.f32 %v3783_v6, %v1505_v24 }
 0x37b   : > { %3141 = vpow2.f32 %v1631_v53 }
 0x37c   : > { %v1510_v60 = vmul.f32 1.442695, %v1507_v25 }
 0x37d   : > { %v1628_v26 = vpop.xlane.xlu0 %1627 }
 0x37e   : > { %3143 = vpow2.f32 %v1510_v60  ;;  %v1630_v56 = vsub.f32 %v3787_v11, %v1628_v26 }
 0x37f   : > { %v3134_v27 = vpop.eup %3133 }
 0x380   : > { %v1633_v28 = vmul.f32 1.442695, %v1630_v56  ;;  %v1249_v3 = vsel %vm867_vm2, %v3134_v27, 0.0  ;;  %v1254_v29 = vpack.c.bf16 %v3134_v27, %v3132_v62  ;;  %v883_v62 = vsel %vm867_vm2, %v3791_v14, 0.0 }
 0x381   : > { %1250 = vadd.xlane.f32.xlu0 %v1249_v3  ;;  %v1747_v9 = vpop.xlane.xlu0 %1746 }
 0x382   : > { %3145 = vpow2.f32 %v1633_v28  ;;  %v1751_v30 = vsub.f32 %v3795_v16, %v1747_v9  ;;  %2865 = vmatmul.mubr.msk.bf16.vlgmr.msra.gmra.mxu0 %vm867_vm2, %v1254_v29 }
 0x383   : > { %2875 = vmatpush3.bf16.msra.mxu0 %v3709_v5  ;;  %2876 = vmatprep.mubr.msk.bf16.mxu0 %vm3422_vm0, %v3421_v31  ;;  %v3136_v6 = vpop.eup %3135  ;;  %v1523_v5 = vpop.permute.xlu1 %1522 }
 0x384   : > { %v1753_v32 = vmul.f32 1.442695, %v1751_v30  ;;  %2886 = vmatprep.subr.bf16.mxu0 %v3421_v31  ;;  %v3138_v11 = vpop.eup %3137  ;;  %v1394_v12 = vsel %vm867_vm2, %v3136_v6, 0.0 }
 0x385   : > { %v1750_v35 = vpop.xlane.xlu0 %1749  ;;  %v1399_v42 = vpack.c.bf16 %v3136_v6, %v3138_v11  ;;  %v1391_v63 = vsel %vm867_vm2, %v3138_v11, 0.0 }
 0x386   : > { %3147 = vpow2.f32 %v1753_v32  ;;  %v1752_v36 = vsub.f32 %v3800_v17, %v1750_v35 }
 0x387   : > { %v3140_v39 = vpop.eup %3139  ;;  %v1767_v61 = vpop.permute.xlu1 %1766 }
 0x388   : > { %v1755_v40 = vmul.f32 1.442695, %v1752_v36  ;;  %v1512_v16 = vsel %vm867_vm2, %v3140_v39, 0.0  ;;  %v3142_v43 = vpop.eup %3141 }
 0x389   : > { %1513 = vadd.xlane.f32.xlu1 %v1512_v16  ;;  %v1635_v17 = vsel %vm867_vm2, %v3142_v43, 0.0  ;;  %v1645_v51 = vpop.permute.xlu0 %1644  ;;  %v3069_v16 = vld [vmem:[#allocation8 + $0x38] sm:$0xff]  }
 0x38a   : > { %3149 = vpow2.f32 %v1755_v40  ;;  %2877 = vmatmul.mubr.msk.bf16.vlgmr.msra.gmra.mxu0 %vm867_vm2, %v1399_v42  ;;  %2916 = vmatprep.subr.bf16.mxu1 %v3069_v16 }
 0x38b   : > { %v3144_v45 = vpop.eup %3143  ;;  %2887 = vmatpush3.bf16.msra.mxu0 %v1523_v5  ;;  %2888 = vmatprep.mubr.msk.bf16.mxu0 %vm3422_vm0, %v3421_v31 }
 0x38c   : > { %v1515_v46 = vsel %vm867_vm2, %v3144_v45, 0.0  ;;  %2898 = vmatprep.subr.bf16.mxu0 %v3421_v31  ;;  %v1520_v49 = vpack.c.bf16 %v3144_v45, %v3140_v39  ;;  %2917 = vmatpush3.bf16.msra.mxu1 %v3069_v16 }
 0x38d   : > { %1516 = vadd.xlane.f32.xlu0 %v1515_v46  ;;  %1636 = vadd.xlane.f32.xlu1 %v1635_v17 }
 0x38f   : > { %v3146_v48 = vpop.eup %3145 }
 0x390   : > { %v1638_v37 = vsel %vm867_vm2, %v3146_v48, 0.0  ;;  %v1643_v58 = vpack.c.bf16 %v3146_v48, %v3142_v43 }
 0x391   : > { %1639 = vadd.xlane.f32.xlu0 %v1638_v37 }
 0x392   : > { %2889 = vmatmul.mubr.msk.bf16.vlgmr.msra.gmra.mxu0 %vm867_vm2, %v1520_v49 }
 0x393   : > { %v3148_v52 = vpop.eup %3147  ;;  %v3869_v41 = vpop.f32.mrf.mxu0  ;;  %2899 = vmatpush3.bf16.msra.mxu0 %v1645_v51  ;;  %2900 = vmatprep.mubr.msk.bf16.mxu0 %vm3422_vm0, %v3421_v31 }
 0x394   : > { %v1757_v54 = vsel %vm867_vm2, %v3148_v52, 0.0  ;;  %2910 = vmatprep.subr.bf16.mxu0 %v3421_v31 }
 0x395   : > { %v2830_v44 = vpop.f32.mrf.mxu0  ;;  %1758 = vadd.xlane.f32.xlu1 %v1757_v54 }
 0x396   : > { %v3071_v44 = vld [vmem:[#allocation8 + $0x30] sm:$0xff]  }
 0x397   : > { %v3150_v55 = vpop.eup %3149  ;;  %v3875_v47 = vpop.f32.mrf.mxu0  ;;  %2918 = vmatprep.subr.bf16.mxu1 %v3071_v44 }
 0x398   : > { %v1760_v50 = vsel %vm867_vm2, %v3150_v55, 0.0  ;;  %v1765_v1 = vpack.c.bf16 %v3150_v55, %v3148_v52  ;;  %2919 = vmatpush3.bf16.msra.mxu1 %v3071_v44 }
 0x399   : > { %v2831_v59 = vpop.f32.mrf.mxu0  ;;  %1761 = vadd.xlane.f32.xlu0 %v1760_v50  ;;  %881 = vadd.xlane.f32.xlu1 %v880_v57  ;;  %v3072_v57 = vld [vmem:[#allocation8 + $0x28] sm:$0xff]  }
 0x39a   : > { %2901 = vmatmul.mubr.msk.bf16.vlgmr.msra.gmra.mxu0 %vm867_vm2, %v1643_v58  ;;  %2920 = vmatprep.subr.bf16.mxu1 %v3072_v57 }
 0x39b   : > { %2911 = vmatpush3.bf16.msra.mxu0 %v1767_v61  ;;  %2912 = vmatprep.mubr.msk.bf16.mxu0 %vm3422_vm0, %v3421_v31 }
 0x39c   : > { %2921 = vmatpush3.bf16.msra.mxu1 %v3072_v57 }
 0x39d   : > { %884 = vadd.xlane.f32.xlu0 %v883_v62  ;;  %1392 = vadd.xlane.f32.xlu1 %v1391_v63 }
 0x3a1   : > { %1395 = vadd.xlane.f32.xlu0 %v1394_v12 }
 0x3a2   : > { %2913 = vmatmul.mubr.msk.bf16.vlgmr.msra.gmra.mxu0 %vm867_vm2, %v1765_v1 }
 0x3a3   : > { %2186 = vmatprep.mubr.bf16.mxu0 %v3420_v0 }
 0x3c9   : > { %v1003_v2 = vpop.xlane.xlu1 %1002 }
 0x3ca   : > { %3151 = vrcp.f32 %v1003_v2  ;;  %v3073_v2 = vld [vmem:[#allocation8 + $0x20] sm:$0xff]  }
 0x3cb   : > { %2922 = vmatprep.subr.bf16.mxu1 %v3073_v2 }
 0x3cc   : > { %2923 = vmatpush3.bf16.msra.mxu1 %v3073_v2 }
 0x3cd   : > { %v1006_v4 = vpop.xlane.xlu0 %1005 }
 0x3ce   : > { %3153 = vrcp.f32 %v1006_v4 }
 0x3d1   : > { %v1126_v7 = vpop.xlane.xlu1 %1125 }
 0x3d2   : > { %3155 = vrcp.f32 %v1126_v7 }
 0x3d5   : > { %v1129_v31 = vpop.xlane.xlu1 %1128 }
 0x3d6   : > { %3157 = vrcp.f32 %v1129_v31  ;;  %v3074_v31 = vld [vmem:[#allocation8 + $0x18] sm:$0xff]  }
 0x3d7   : > { %v3152_v13 = vpop.eup %3151  ;;  %2924 = vmatprep.subr.bf16.mxu1 %v3074_v31 }
 0x3d8   : > { %2925 = vmatpush3.bf16.msra.mxu1 %v3074_v31  ;;  %v3200_v31 = vld [vmem:[%s3654_s7 + $0x8] sm:$0xff] }
 0x3d9   : > { %v1248_v28 = vpop.xlane.xlu1 %1247 }
 0x3da   : > { %3159 = vrcp.f32 %v1248_v28 }
 0x3db   : > { %v3154_v15 = vpop.eup %3153 }
 0x3df   : > { %v3156_v53 = vpop.eup %3155 }
 0x3e3   : > { %v3158_v24 = vpop.eup %3157 }
 0x3e7   : > { %v3160_v5 = vpop.eup %3159 }
 0x405   : > { %v1051_v14 = vpop.f32.mrf.mxu0 }
 0x406   : > { %v1058_v18 = vmul.f32 %v3152_v13, %v1051_v14 }
 0x407   : > { %v2842_v10 = vpop.f32.mrf.mxu0 }
 0x409   : > { %v1054_v8 = vpop.f32.mrf.mxu0 }
 0x40a   : > { %v1059_v19 = vmul.f32 %v3154_v15, %v1054_v8  ;;  %v1251_v3 = vpop.xlane.xlu0 %1250 }
 0x40b   : > { %v2843_v20 = vpop.f32.mrf.mxu0  ;;  %3161 = vrcp.f32 %v1251_v3 }
 0x40c   : > { %v1060_v21 = vpack.c.bf16 %v1059_v19, %v1058_v18  ;;  %v3075_v20 = vld [vmem:[#allocation8 + $0x10] sm:$0xff]  }
 0x40d   : > { %v1173_v22 = vpop.f32.mrf.mxu0  ;;  %2926 = vmatprep.subr.bf16.mxu1 %v3075_v20 }
 0x40e   : > { %1306 = vrot.lane.b32.xlu1 %v1060_v21, %s3425_s30  ;;  %v1180_v60 = vmul.f32 %v3156_v53, %v1173_v22  ;;  %2927 = vmatpush3.bf16.msra.mxu1 %v3075_v20 }
 0x40f   : > { %v2854_v23 = vpop.f32.mrf.mxu0 }
 0x411   : > { %v1176_v25 = vpop.f32.mrf.mxu0 }
 0x412   : > { %v1181_v26 = vmul.f32 %v3158_v24, %v1176_v25  ;;  %v1514_v29 = vpop.xlane.xlu1 %1513 }
 0x413   : > { %v2855_v56 = vpop.f32.mrf.mxu0 }
 0x414   : > { %v1182_v27 = vpack.c.bf16 %v1181_v26, %v1180_v60  ;;  %v3076_v60 = vld [vmem:[#allocation8 + $0x8] sm:$0xff]   ;;  %v3077_v26 = vld [vmem:[#allocation8] sm:$0xff]  }
 0x415   : > { %2928 = vmatprep.subr.bf16.mxu1 %v3076_v60 }
 0x416   : > { %1309 = vrot.lane.b32.xlu0 %v1182_v27, %s3423_s16  ;;  %v1517_v9 = vpop.xlane.xlu0 %1516  ;;  %v1637_v30 = vpop.xlane.xlu1 %1636  ;;  %2929 = vmatpush3.bf16.msra.mxu1 %v3076_v60 }
 0x417   : > { %2930 = vmatprep.subr.bf16.mxu1 %v3077_v26 }
 0x418   : > { %v3162_v45 = vpop.eup %3161 }
 0x41a   : > { %v1640_v6 = vpop.xlane.xlu0 %1639  ;;  %2931 = vmatpush3.bf16.msra.mxu1 %v3077_v26 }
 0x41e   : > { %v1759_v32 = vpop.xlane.xlu1 %1758 }
 0x422   : > { %v1762_v11 = vpop.xlane.xlu0 %1761  ;;  %v3891_v35 = vpop.xlane.xlu1 %881 }
 0x426   : > { %v3893_v36 = vpop.xlane.xlu0 %884  ;;  %v1393_v39 = vpop.xlane.xlu1 %1392 }
 0x427   : > { %3163 = vrcp.f32 %v1393_v39 }
 0x42a   : > { %v1396_v40 = vpop.xlane.xlu0 %1395 }
 0x42b   : > { %3165 = vrcp.f32 %v1396_v40 }
 0x42c   : > { %3167 = vrcp.f32 %v1514_v29 }
 0x42d   : > { %3169 = vrcp.f32 %v1517_v9 }
 0x42e   : > { %3171 = vrcp.f32 %v1637_v30 }
 0x42f   : > { %3173 = vrcp.f32 %v1640_v6 }
 0x430   : > { %3175 = vrcp.f32 %v1759_v32 }
 0x431   : > { %3177 = vrcp.f32 %v1762_v11 }
 0x432   : > { %3179 = vrcp.f32 %v3893_v36 }
 0x433   : > { %3181 = vrcp.f32 %v3891_v35 }
 0x434   : > { %v3164_v54 = vpop.eup %3163 }
 0x438   : > { %v3166_v55 = vpop.eup %3165 }
 0x439   : > { %v3168_v1 = vpop.eup %3167 }
 0x43a   : > { %v3170_v4 = vpop.eup %3169 }
 0x43b   : > { %v3172_v19 = vpop.eup %3171 }
 0x43c   : > { %v3174_v21 = vpop.eup %3173 }
 0x43d   : > { %v3176_v28 = vpop.eup %3175 }
 0x43e   : > { %v3178_v3 = vpop.eup %3177 }
 0x43f   : > { %v3180_v11 = vpop.eup %3179 }
 0x440   : > { %v3182_v39 = vpop.eup %3181  ;;  %v934_v40 = vmul.f32 %v3180_v11, %v3875_v47  ;;  %v3087_v11 = vld [vmem:[#allocation9 + $0x54] ss:$8 sps:$4 sm:$0xff]  }
 0x441   : > { %v933_v16 = vmul.f32 %v3182_v39, %v3869_v41  ;;  %v3085_v39 = vld [vmem:[#allocation9 + $0x50] ss:$8 sps:$4 sm:$0xff]  }
 0x442   : > { %v1295_v42 = vpop.f32.mrf.mxu0 }
 0x443   : > { %v1302_v17 = vmul.f32 %v3160_v5, %v1295_v42 }
 0x444   : > { %v2866_v43 = vpop.f32.mrf.mxu0 }
 0x445   : > { %v935_v43 = vpack.c.bf16 %v934_v40, %v933_v16  ;;  %v3090_v40 = vld [vmem:[#allocation9 + $0x44] ss:$8 sps:$4 sm:$0xff]   ;;  %v3088_v16 = vld [vmem:[#allocation9 + $0x40] ss:$8 sps:$4 sm:$0xff]  }
 0x446   : > { %v1298_v46 = vpop.f32.mrf.mxu0 }
 0x447   : > { %v1303_v48 = vmul.f32 %v3162_v45, %v1298_v46 }
 0x448   : > { %v2867_v37 = vpop.f32.mrf.mxu0 }
 0x449   : > { %v1304_v49 = vpack.c.bf16 %v1303_v48, %v1302_v17 }
 0x44a   : > { %v1437_v51 = vpop.f32.mrf.mxu0 }
 0x44b   : > { %1312 = vrot.lane.b32.xlu1 %v1304_v49, %s3424_s17  ;;  %v3896_v58 = vmul.f32 %v3164_v54, %v1437_v51 }
 0x44c   : > { %v2878_v52 = vpop.f32.mrf.mxu0 }
 0x44e   : > { %v1440_v50 = vpop.f32.mrf.mxu0 }
 0x44f   : > { %v3898_v59 = vmul.f32 %v3166_v55, %v1440_v50 }
 0x450   : > { %v2879_v61 = vpop.f32.mrf.mxu0 }
 0x451   : > { %v1446_v62 = vpack.c.bf16 %v3898_v59, %v3896_v58  ;;  %v2662_v58 = vld [vmem:[%s4039_s4] ss:$0 sm:$0xff] }
 0x452   : > { %v1562_v63 = vpop.f32.mrf.mxu0 }
 0x453   : > { %v1569_v14 = vmul.f32 %v3168_v1, %v1562_v63 }
 0x454   : > { %v2890_v12 = vpop.f32.mrf.mxu0 }
 0x455   : > { %v3199_v12 = vld [vmem:[%s3654_s7] sm:$0xff] }
 0x456   : > { %v1565_v7 = vpop.f32.mrf.mxu0 }
 0x457   : > { %v1570_v10 = vmul.f32 %v3170_v4, %v1565_v7 }
 0x458   : > { %v2891_v13 = vpop.f32.mrf.mxu0 }
 0x459   : > { %v1571_v15 = vpack.c.bf16 %v1570_v10, %v1569_v14  ;;  %v3201_v10 = vld [vmem:[%s3654_s7 + $0x10] sm:$0xff] }
 0x45a   : > { %v1684_v8 = vpop.f32.mrf.mxu0 }
 0x45b   : > { %1817 = vrot.lane.b32.xlu1 %v1571_v15, %s3425_s30  ;;  %v1691_v23 = vmul.f32 %v3172_v19, %v1684_v8  ;;  %v3202_v15 = vld [vmem:[%s3654_s7 + $0x18] sm:$0xff]  ;;  %s3335_s7 = scalar_lea.vmem %s3992_s1, 512 }
 0x45c   : > { %v2902_v18 = vpop.f32.mrf.mxu0  ;;  %v3081_v19 = vld [vmem:[#allocation9 + $0x74] ss:$8 sps:$4 sm:$0xff]   ;;  %p3336_p12 = scmp.ne.s32.totalorder %s3992_s1, %s3335_s7  ;;  %p3343_p10 = scmp.lt.s32.totalorder %s3341_s14, %s3335_s7 }
 0x45d   : > { %v3079_v18 = vld [vmem:[#allocation9 + $0x70] ss:$8 sps:$4 sm:$0xff]   ;;  %2154 = vmatprep.subr.bf16.mxu0 %v3081_v19 }
 0x45e   : > { %v1687_v22 = vpop.f32.mrf.mxu0  ;;  %2155 = vmatpush1.bf16.msra.mxu0 %v3079_v18  ;;  %v2674_v19 = vld [vmem:[%s4041_s6] ss:$0 sm:$0xff]  ;;  %p3337_p9 = pnand %p3336_p12, %p4083_p7  ;;  %p3344_p1 = por %p3343_p10, %p3342_p5 }
 0x45f   : > { %v1692_v53 = vmul.f32 %v3174_v21, %v1687_v22 }
 0x460   : > { %v2903_v24 = vpop.f32.mrf.mxu0  ;;  %p3338_p13 = pneg %p3337_p9 }
 0x461   : > { %v1693_v25 = vpack.c.bf16 %v1692_v53, %v1691_v23 }
 0x462   : > { %v1806_v56 = vpop.f32.mrf.mxu0  ;;  %p3345_p6 = pnand %p3344_p1, %p3338_p13 }
 0x463   : > { %1820 = vrot.lane.b32.xlu0 %v1693_v25, %s3423_s16  ;;  %v1813_v9 = vmul.f32 %v3176_v28, %v1806_v56 }
 0x464   : > { %v2914_v27 = vpop.f32.mrf.mxu0 }
 0x466   : > { %v1809_v29 = vpop.f32.mrf.mxu0 }
 0x467   : > { %v1814_v30 = vmul.f32 %v3178_v3, %v1809_v29 }
 0x468   : > { %v2915_v6 = vpop.f32.mrf.mxu0 }
 0x469   : > { %v1815_v32 = vpack.c.bf16 %v1814_v30, %v1813_v9  ;;  %v3084_v6 = vld [vmem:[#allocation9 + $0x64] ss:$8 sps:$4 sm:$0xff]  }
 0x46a   : > { %2156 = vmatprep.subr.bf16.mxu0 %v3084_v6  ;;  %v3117_v6 = vld [vmem:[#allocation11 + $0x40] sm:$0xff]  }
 0x46b   : > { %1823 = vrot.lane.b32.xlu1 %v1815_v32, %s3424_s17  ;;  %v3082_v32 = vld [vmem:[#allocation9 + $0x60] ss:$8 sps:$4 sm:$0xff]  }
 0x46c   : > { %2157 = vmatpush1.bf16.msra.mxu0 %v3082_v32  ;;  %v3118_v32 = vld [vmem:[#allocation11] sm:$0xff]  }
 0x46d   : > { %2158 = vmatprep.subr.bf16.mxu0 %v3087_v11 }
 0x470   : > { %2159 = vmatpush1.bf16.msra.mxu0 %v3085_v39 }
 0x471   : > { %2160 = vmatprep.subr.bf16.mxu0 %v3090_v40 }
 0x474   : > { %2161 = vmatpush1.bf16.msra.mxu0 %v3088_v16 }
 0x480   : > { %v1307_v42 = vpop.permute.xlu1 %1306 }
 0x481   : > { %v1316_v45 = vsel %vm819_vm1, %v935_v43, %v1307_v42  ;;  %v3091_v42 = vld [vmem:[#allocation9 + $0x30] ss:$8 sps:$4 sm:$0xff]   ;;  %v3093_v43 = vld [vmem:[#allocation9 + $0x34] ss:$8 sps:$4 sm:$0xff]  }
 0x482   : > { %2162 = vmatprep.subr.bf16.mxu0 %v3093_v43 }
 0x483   : > { %2163 = vmatpush1.bf16.msra.mxu0 %v3091_v42 }
 0x488   : > { %v1310_v5 = vpop.permute.xlu0 %1309 }
 0x489   : > { %v1319_v46 = vsel %vm1317_vm3, %v1316_v45, %v1310_v5  ;;  %v3096_v5 = vld [vmem:[#allocation9 + $0x24] ss:$8 sps:$4 sm:$0xff]   ;;  %v3094_v45 = vld [vmem:[#allocation9 + $0x20] ss:$8 sps:$4 sm:$0xff]  }
 0x48a   : > { %2164 = vmatprep.subr.bf16.mxu0 %v3096_v5 }
 0x48b   : > { %2165 = vmatpush1.bf16.msra.mxu0 %v3094_v45 }
 0x4bd   : > { %v1313_v17 = vpop.permute.xlu1 %1312 }
 0x4be   : > { %v1322_v36 = vsel %vm1320_vm4, %v1319_v46, %v1313_v17  ;;  %v3099_v46 = vld [vmem:[#allocation9 + $0x14] ss:$8 sps:$4 sm:$0xff]   ;;  %v3097_v17 = vld [vmem:[#allocation9 + $0x10] ss:$8 sps:$4 sm:$0xff]  }
 0x4bf   : > { %v2650_v48 = vcombine.low %v1322_v36, %v1322_v36  ;;  %v2651_v35 = vcombine.high %v1322_v36, %v1322_v36  ;;  %2166 = vmatprep.subr.bf16.mxu0 %v3099_v46  ;;  %v3102_v36 = vld [vmem:[#allocation9 + $0x4] ss:$8 sps:$4 sm:$0xff]  }
 0x4c0   : > { %2167 = vmatpush1.bf16.msra.mxu0 %v3097_v17 }
 0x4c1   : > { %1330 = vst [vmem:[#allocation2] sm:$0xf] %v2650_v48  ;;  %1331 = vst [vmem:[#allocation2 + $0x4] sm:$0xf] %v2651_v35  ;;  %v3100_v48 = vld [vmem:[#allocation9] ss:$8 sps:$4 sm:$0xff]   ;;  %2168 = vmatprep.subr.bf16.mxu0 %v3102_v36 }
 0x4c2   : > { %v3103_v35 = vld [vmem:[#allocation11 + $0x78] sm:$0xff]  }
 0x4c3   : > { %2772 = vmatprep.subr.bf16.mxu1 %v3103_v35 }
 0x4c4   : > { %2169 = vmatpush1.bf16.msra.mxu0 %v3100_v48 }
 0x4c8   : > { %v3070_v37 = vld [vmem:[#allocation2] sm:$0xff]  }
 0x4c9   : > { %2932 = vmatprep.mubr.bf16.mxu1 %v3070_v37  ;;  %v3104_v37 = vld [vmem:[#allocation11 + $0x38] sm:$0xff]  }
 0x4cd   : > { %v1818_v47 = vpop.permute.xlu1 %1817 }
 0x4ce   : > { %v1827_v49 = vsel %vm819_vm1, %v1446_v62, %v1818_v47  ;;  %v3105_v47 = vld [vmem:[#allocation11 + $0x70] sm:$0xff]  }
 0x4d5   : > { %v1821_v41 = vpop.permute.xlu0 %1820 }
 0x4d6   : > { %v1829_v51 = vsel %vm1317_vm3, %v1827_v49, %v1821_v41  ;;  %v3106_v41 = vld [vmem:[#allocation11 + $0x30] sm:$0xff]   ;;  %v3107_v49 = vld [vmem:[#allocation11 + $0x68] sm:$0xff]  }
 0x4dd   : > { %v1824_v52 = vpop.permute.xlu1 %1823 }
 0x4de   : > { %v1831_v54 = vsel %vm1320_vm4, %v1829_v51, %v1824_v52  ;;  %v3108_v51 = vld [vmem:[#allocation11 + $0x28] sm:$0xff]   ;;  %v3109_v52 = vld [vmem:[#allocation11 + $0x60] sm:$0xff]  }
 0x4df   : > { %v2660_v44 = vcombine.low %v1831_v54, %v1831_v54  ;;  %v2661_v55 = vcombine.high %v1831_v54, %v1831_v54  ;;  %v3110_v54 = vld [vmem:[#allocation11 + $0x20] sm:$0xff]  }
 0x4e1   : > { %1839 = vst [vmem:[#allocation2 + $0x8] sm:$0xf] %v2660_v44  ;;  %1840 = vst [vmem:[#allocation2 + $0xc] sm:$0xf] %v2661_v55  ;;  %v3111_v44 = vld [vmem:[#allocation11 + $0x58] sm:$0xff]  }
 0x4e2   : > { %v3112_v55 = vld [vmem:[#allocation11 + $0x18] sm:$0xff]  }
 0x4e8   : > { %v3078_v50 = vld [vmem:[#allocation2 + $0x8] sm:$0xff]  }
 0x4e9   : > { %2933 = vmatmul.mubr.bf16.vlgmr.msra.gmra.mxu1 %v3078_v50 }
 0x4ea   : > { %2773 = vmatpush3.bf16.msra.mxu1 %v3104_v37 }
 0x4eb   : > { %2774 = vmatprep.subr.bf16.mxu1 %v3105_v47 }
 0x4ee   : > { %2775 = vmatpush3.bf16.msra.mxu1 %v3106_v41 }
 0x4ef   : > { %2776 = vmatprep.subr.bf16.mxu1 %v3107_v49 }
 0x4f2   : > { %2777 = vmatpush3.bf16.msra.mxu1 %v3108_v51 }
 0x4f3   : > { %2778 = vmatprep.subr.bf16.mxu1 %v3109_v52 }
 0x4f6   : > { %2779 = vmatpush3.bf16.msra.mxu1 %v3110_v54 }
 0x4f7   : > { %2780 = vmatprep.subr.bf16.mxu1 %v3111_v44 }
 0x4fa   : > { %2781 = vmatpush3.bf16.msra.mxu1 %v3112_v55 }
 0x5a9   : > { %v2934_v57 = vpop.f32.mrf.mxu1 }
 0x5aa   : > { %v1970_v63 = vadd.f32 %v2934_v57, %v2662_v58 }
 0x5ab   : > { %v1961_v59 = vpop.f32.mrf.mxu1 }
 0x5ac   : > { %v1962_v61 = vadd.f32 %v2662_v58, %v1961_v59  ;;  %v1978_v13 = vadd.f32 %v3201_v10, %v1970_v63  ;;  %v2673_v10 = vld [vmem:[%s4040_s5] ss:$0 sm:$0xff] }
 0x5ad   : > { %v2935_v62 = vpop.f32.mrf.mxu1 }
 0x5ae   : > { %v1976_v1 = vadd.f32 %v3199_v12, %v1962_v61  ;;  %v1973_v7 = vadd.f32 %v2935_v62, %v2662_v58 }
 0x5af   : > { %v1964_v2 = vpop.f32.mrf.mxu1 }
 0x5b0   : > { %v1965_v4 = vadd.f32 %v2662_v58, %v1964_v2  ;;  %1980 = vadd.xlane.f32.xlu0 %v1976_v1  ;;  %v1979_v8 = vadd.f32 %v3202_v15, %v1973_v7 }
 0x5b2   : > { %v1977_v14 = vadd.f32 %v3200_v31, %v1965_v4 }
 0x5b4   : > { %1982 = vadd.xlane.f32.xlu1 %v1977_v14  ;;  %1984 = vadd.xlane.f32.xlu0 %v1978_v13 }
 0x5b8   : > { %1986 = vadd.xlane.f32.xlu0 %v1979_v8 }
 0x639   : > { %v1981_v20 = vpop.xlane.xlu0 %1980 }
 0x63a   : > { %v1989_v21 = vmul.f32 0.0078125, %v1981_v20 }
 0x63c   : > { %v3925_v22 = vsub.f32 %v1976_v1, %v1989_v21 }
 0x63d   : > { %v1983_v23 = vpop.xlane.xlu1 %1982  ;;  %v1985_v53 = vpop.xlane.xlu0 %1984 }
 0x63e   : > { %v1990_v24 = vmul.f32 0.0078125, %v1983_v23  ;;  %v1991_v25 = vmul.f32 0.0078125, %v1985_v53  ;;  %v1997_v60 = vmul.f32 %v3925_v22, %v3925_v22 }
 0x640   : > { %v3929_v26 = vsub.f32 %v1977_v14, %v1990_v24  ;;  %v3931_v56 = vsub.f32 %v1978_v13, %v1991_v25  ;;  %2001 = vadd.xlane.f32.xlu1 %v1997_v60 }
 0x641   : > { %v1987_v27 = vpop.xlane.xlu0 %1986 }
 0x642   : > { %v1992_v28 = vmul.f32 0.0078125, %v1987_v27  ;;  %v1998_v3 = vmul.f32 %v3929_v26, %v3929_v26  ;;  %v1999_v29 = vmul.f32 %v3931_v56, %v3931_v56 }
 0x644   : > { %v3937_v9 = vsub.f32 %v1979_v8, %v1992_v28  ;;  %2003 = vadd.xlane.f32.xlu0 %v1998_v3  ;;  %2005 = vadd.xlane.f32.xlu1 %v1999_v29  ;;  %v3113_v29 = vld [vmem:[#allocation11 + $0x50] sm:$0xff]  }
 0x645   : > { %2782 = vmatprep.subr.bf16.mxu1 %v3113_v29 }
 0x646   : > { %v2000_v30 = vmul.f32 %v3937_v9, %v3937_v9 }
 0x648   : > { %2007 = vadd.xlane.f32.xlu0 %v2000_v30  ;;  %v3116_v30 = vld [vmem:[#allocation11 + $0x8] sm:$0xff]  }
 0x6c9   : > { %v2002_v50 = vpop.xlane.xlu1 %2001 }
 0x6ca   : > { %v2009_v57 = vmul.f32 0.0078125, %v2002_v50 }
 0x6cc   : > { %v2013_v58 = vadd.f32 1e-05, %v2009_v57 }
 0x6cd   : > { %v2006_v59 = vpop.xlane.xlu1 %2005  ;;  %v2004_v61 = vpop.xlane.xlu0 %2003 }
 0x6ce   : > { %3183 = vrsqrt.f32 %v2013_v58  ;;  %v2011_v62 = vmul.f32 0.0078125, %v2006_v59  ;;  %v2010_v63 = vmul.f32 0.0078125, %v2004_v61 }
 0x6d0   : > { %v2014_v12 = vadd.f32 1e-05, %v2010_v63  ;;  %v2015_v1 = vadd.f32 1e-05, %v2011_v62  ;;  %v2691_v63 = vld [vmem:[%s4045_s10] ss:$0 sm:$0xff] }
 0x6d1   : > { %v2008_v2 = vpop.xlane.xlu0 %2007 }
 0x6d2   : > { %v2012_v4 = vmul.f32 0.0078125, %v2008_v2  ;;  %3185 = vrsqrt.f32 %v2014_v12 }
 0x6d3   : > { %3187 = vrsqrt.f32 %v2015_v1 }
 0x6d4   : > { %v2016_v7 = vadd.f32 1e-05, %v2012_v4 }
 0x6d6   : > { %3189 = vrsqrt.f32 %v2016_v7 }
 0x6db   : > { %v3184_v31 = vpop.eup %3183 }
 0x6dc   : > { %v2021_v14 = vmul.f32 %v3184_v31, %v3925_v22 }
 0x6de   : > { %v2031_v8 = vmul.f32 %v2673_v10, %v2021_v14 }
 0x6df   : > { %v3186_v13 = vpop.eup %3185 }
 0x6e0   : > { %v2022_v15 = vmul.f32 %v3186_v13, %v3929_v26  ;;  %v3188_v18 = vpop.eup %3187  ;;  %v3950_v53 = vadd.f32 %v2674_v19, %v2031_v8 }
 0x6e1   : > { %v2023_v24 = vmul.f32 %v3188_v18, %v3931_v56  ;;  %v3115_v56 = vld [vmem:[#allocation11 + $0x48] sm:$0xff]  }
 0x6e2   : > { %v2032_v21 = vmul.f32 %v2673_v10, %v2022_v15 }
 0x6e3   : > { %v3190_v20 = vpop.eup %3189  ;;  %v2033_v26 = vmul.f32 %v2673_v10, %v2023_v24 }
 0x6e4   : > { %v2024_v23 = vmul.f32 %v3190_v20, %v3937_v9  ;;  %v3952_v22 = vadd.f32 %v2674_v19, %v2032_v21  ;;  %v3114_v9 = vld [vmem:[#allocation11 + $0x10] sm:$0xff]  }
 0x6e5   : > { %v3960_v28 = vadd.f32 %v2674_v19, %v2033_v26  ;;  %2783 = vmatpush3.bf16.msra.mxu1 %v3114_v9 }
 0x6e6   : > { %v2045_v25 = vpack.c.bf16 %v3952_v22, %v3950_v53  ;;  %v2034_v60 = vmul.f32 %v2673_v10, %v2024_v23  ;;  %2784 = vmatprep.subr.bf16.mxu1 %v3115_v56 }
 0x6e8   : > { %2187 = vmatmul.mubr.bf16.vlgmr.msra.gmra.mxu0 %v2045_v25  ;;  %v3958_v27 = vadd.f32 %v2674_v19, %v2034_v60 }
 0x6e9   : > { %2196 = vmatprep.mubr.bf16.mxu0 %v3420_v0  ;;  %2785 = vmatpush3.bf16.msra.mxu1 %v3116_v30  ;;  %v525_v0 = vld [vmem:[%s4043_s8] sm:$0x3] }
 0x6ea   : > { %v2046_v3 = vpack.c.bf16 %v3958_v27, %v3960_v28  ;;  %2786 = vmatprep.subr.bf16.mxu1 %v3117_v6  ;;  %v2071_v39 = vrot.slane %v525_v0, %v574_v34  ;;  %v2067_v40 = vrot.slane %v525_v0, %v570_v38 }
 0x6ed   : > { %2787 = vmatpush3.bf16.msra.mxu1 %v3118_v32 }
 0x6f0   : > { %2197 = vmatmul.mubr.bf16.gmra.mxu0 %v2046_v3 }
 0x7a8   : > { %v2188_v11 = vpop.f32.mrf.mxu0 }
 0x7a9   : > { %v2189_v45 = vadd.f32 %v2188_v11, %v2067_v40 }
 0x7aa   : > { %v2190_v16 = vpop.f32.mrf.mxu0 }
 0x7ab   : > { %v2191_v43 = vadd.f32 %v2190_v16, %v2071_v39  ;;  %v2207_v47 = vmax.f32 %v2189_v45, 0.0 }
 0x7ac   : > { %v2192_v42 = vpop.f32.mrf.mxu0 }
 0x7ad   : > { %v2193_v5 = vadd.f32 %v2192_v42, %v2067_v40  ;;  %v2208_v35 = vmax.f32 %v2191_v43, 0.0 }
 0x7ae   : > { %v2194_v46 = vpop.f32.mrf.mxu0 }
 0x7af   : > { %v2195_v17 = vadd.f32 %v2194_v46, %v2071_v39  ;;  %v2209_v36 = vmax.f32 %v2193_v5, 0.0 }
 0x7b0   : > { %v2198_v48 = vpop.f32.mrf.mxu0 }
 0x7b1   : > { %v2210_v37 = vmax.f32 %v2195_v17, 0.0  ;;  %v2215_v51 = vpack.c.bf16 %v2209_v36, %v2207_v47  ;;  %v2199_v33 = vadd.f32 %v2198_v48, %v2067_v40 }
 0x7b2   : > { %v2200_v41 = vpop.f32.mrf.mxu0 }
 0x7b3   : > { %v2216_v49 = vpack.c.bf16 %v2210_v37, %v2208_v35  ;;  %v2201_v34 = vadd.f32 %v2200_v41, %v2071_v39  ;;  %v2211_v58 = vmax.f32 %v2199_v33, 0.0 }
 0x7b4   : > { %v2202_v52 = vpop.f32.mrf.mxu0 }
 0x7b5   : > { %v2203_v54 = vadd.f32 %v2202_v52, %v2067_v40  ;;  %2385 = vmatprep.mubr.bf16.mxu1 %v2216_v49  ;;  %v2212_v50 = vmax.f32 %v2201_v34, 0.0  ;;  %v2708_v49 = vld [vmem:[%s4046_s11] ss:$0 sm:$0xff] }
 0x7b6   : > { %v2204_v38 = vpop.f32.mrf.mxu0  ;;  %2386 = vmatmul.mubr.bf16.vlgmr.msra.gmra.mxu1 %v2215_v51  ;;  %v2709_v52 = vld [vmem:[%s4047_s12] ss:$0 sm:$0xff] }
 0x7b7   : > { %v2205_v44 = vadd.f32 %v2204_v38, %v2071_v39  ;;  %v2213_v55 = vmax.f32 %v2203_v54, 0.0 }
 0x7b9   : > { %v2214_v57 = vmax.f32 %v2205_v44, 0.0  ;;  %v2217_v61 = vpack.c.bf16 %v2213_v55, %v2211_v58 }
 0x7bb   : > { %v2218_v59 = vpack.c.bf16 %v2214_v57, %v2212_v50 }
 0x7bd   : > { %2393 = vmatprep.mubr.bf16.mxu1 %v2218_v59 }
 0x7be   : > { %2394 = vmatmul.mubr.bf16.gmra.mxu1 %v2217_v61 }
 0x876   : > { %v2788_v62 = vpop.f32.mrf.mxu1 }
 0x878   : > { %v2789_v12 = vpop.f32.mrf.mxu1 }
 0x879   : > { %v2790_v1 = vadd.f32 %v2789_v12, %v2788_v62 }
 0x87a   : > { %v2791_v2 = vpop.f32.mrf.mxu1 }
 0x87b   : > { %v2388_v4 = vadd.f32 %v2790_v1, %v2691_v63 }
 0x87c   : > { %v2792_v7 = vpop.f32.mrf.mxu1 }
 0x87d   : > { %v2793_v31 = vadd.f32 %v2792_v7, %v2791_v2  ;;  %v2402_v14 = vadd.f32 %v2388_v4, %v3950_v53 }
 0x87e   : > { %v2794_v10 = vpop.f32.mrf.mxu1 }
 0x87f   : > { %v2391_v13 = vadd.f32 %v2793_v31, %v2691_v63  ;;  %2406 = vadd.xlane.f32.xlu1 %v2402_v14 }
 0x880   : > { %v2795_v15 = vpop.f32.mrf.mxu1 }
 0x881   : > { %v2796_v8 = vadd.f32 %v2795_v15, %v2794_v10  ;;  %v2403_v18 = vadd.f32 %v2391_v13, %v3952_v22 }
 0x882   : > { %v2797_v19 = vpop.f32.mrf.mxu1 }
 0x883   : > { %v2396_v20 = vadd.f32 %v2796_v8, %v2691_v63  ;;  %2408 = vadd.xlane.f32.xlu0 %v2403_v18 }
 0x884   : > { %v2798_v21 = vpop.f32.mrf.mxu1 }
 0x885   : > { %v2799_v23 = vadd.f32 %v2798_v21, %v2797_v19  ;;  %v2404_v24 = vadd.f32 %v2396_v20, %v3960_v28 }
 0x887   : > { %v2399_v25 = vadd.f32 %v2799_v23, %v2691_v63  ;;  %2410 = vadd.xlane.f32.xlu1 %v2404_v24 }
 0x889   : > { %v2405_v60 = vadd.f32 %v2399_v25, %v3958_v27 }
 0x88b   : > { %2412 = vadd.xlane.f32.xlu0 %v2405_v60 }
 0x908   : > { %v2407_v53 = vpop.xlane.xlu1 %2406 }
 0x909   : > { %v2414_v26 = vmul.f32 0.0078125, %v2407_v53 }
 0x90b   : > { %v2418_v3 = vsub.f32 %v2402_v14, %v2414_v26 }
 0x90c   : > { %v2409_v29 = vpop.xlane.xlu0 %2408 }
 0x90d   : > { %v2415_v9 = vmul.f32 0.0078125, %v2409_v29  ;;  %v2422_v56 = vmul.f32 %v2418_v3, %v2418_v3 }
 0x90f   : > { %v2419_v30 = vsub.f32 %v2403_v18, %v2415_v9  ;;  %2426 = vadd.xlane.f32.xlu1 %v2422_v56 }
 0x910   : > { %v2411_v22 = vpop.xlane.xlu1 %2410 }
 0x911   : > { %v2416_v6 = vmul.f32 0.0078125, %v2411_v22  ;;  %v2423_v32 = vmul.f32 %v2419_v30, %v2419_v30 }
 0x913   : > { %v2420_v0 = vsub.f32 %v2404_v24, %v2416_v6  ;;  %2428 = vadd.xlane.f32.xlu0 %v2423_v32 }
 0x914   : > { %v2413_v11 = vpop.xlane.xlu0 %2412 }
 0x915   : > { %v2417_v28 = vmul.f32 0.0078125, %v2413_v11  ;;  %v2424_v39 = vmul.f32 %v2420_v0, %v2420_v0 }
 0x917   : > { %v2421_v40 = vsub.f32 %v2405_v60, %v2417_v28  ;;  %2430 = vadd.xlane.f32.xlu1 %v2424_v39 }
 0x919   : > { %v2425_v27 = vmul.f32 %v2421_v40, %v2421_v40 }
 0x91b   : > { %2432 = vadd.xlane.f32.xlu0 %v2425_v27 }
 0x998   : > { %v2427_v16 = vpop.xlane.xlu1 %2426 }
 0x999   : > { %v2434_v42 = vmul.f32 0.0078125, %v2427_v16 }
 0x99b   : > { %v2438_v43 = vadd.f32 1e-05, %v2434_v42 }
 0x99c   : > { %v2429_v5 = vpop.xlane.xlu0 %2428 }
 0x99d   : > { %3191 = vrsqrt.f32 %v2438_v43  ;;  %v2435_v45 = vmul.f32 0.0078125, %v2429_v5 }
 0x99f   : > { %v2439_v46 = vadd.f32 1e-05, %v2435_v45 }
 0x9a0   : > { %v2431_v17 = vpop.xlane.xlu1 %2430 }
 0x9a1   : > { %3193 = vrsqrt.f32 %v2439_v46  ;;  %v2436_v36 = vmul.f32 0.0078125, %v2431_v17 }
 0x9a3   : > { %v2440_v48 = vadd.f32 1e-05, %v2436_v36 }
 0x9a4   : > { %v2433_v35 = vpop.xlane.xlu0 %2432 }
 0x9a5   : > { %3195 = vrsqrt.f32 %v2440_v48  ;;  %v2437_v37 = vmul.f32 0.0078125, %v2433_v35 }
 0x9a7   : > { %v2441_v47 = vadd.f32 1e-05, %v2437_v37 }
 0x9a9   : > { %3197 = vrsqrt.f32 %v2441_v47 }
 0x9aa   : > { %v3192_v41 = vpop.eup %3191 }
 0x9ab   : > { %v2446_v51 = vmul.f32 %v3192_v41, %v2418_v3 }
 0x9ad   : > { %v2456_v34 = vmul.f32 %v2708_v49, %v2446_v51 }
 0x9ae   : > { %v3194_v54 = vpop.eup %3193 }
 0x9af   : > { %v2466_v33 = vadd.f32 %v2709_v52, %v2456_v34  ;;  %v2447_v38 = vmul.f32 %v3194_v54, %v2419_v30 }
 0x9b1   : > { %2470 = vst [vmem:[%s517_s19] sm:$0xff] %v2466_v33  ;;  %v2457_v44 = vmul.f32 %v2708_v49, %v2447_v38 }
 0x9b2   : > { %v3196_v55 = vpop.eup %3195 }
 0x9b3   : > { %v2467_v50 = vadd.f32 %v2709_v52, %v2457_v44  ;;  %v2448_v57 = vmul.f32 %v3196_v55, %v2420_v0 }
 0x9b5   : > { %2471 = vst [vmem:[%s517_s19 + $0x8] sm:$0xff] %v2467_v50  ;;  %v2458_v58 = vmul.f32 %v2708_v49, %v2448_v57 }
 0x9b6   : > { %v3198_v59 = vpop.eup %3197 }
 0x9b7   : > { %v2468_v61 = vadd.f32 %v2709_v52, %v2458_v58  ;;  %v2449_v62 = vmul.f32 %v3198_v59, %v2421_v40 }
 0x9b9   : > { %2472 = vst [vmem:[%s517_s19 + $0x10] sm:$0xff] %v2468_v61  ;;  %v2459_v63 = vmul.f32 %v2708_v49, %v2449_v62 }
 0x9bb   : > { %v2469_v12 = vadd.f32 %v2709_v52, %v2459_v63 }
 0x9bd   : > { %2473 = vst [vmem:[%s517_s19 + $0x18] sm:$0xff] %v2469_v12 }
 0x9be   : > { %3348 = shalt.err (!%p3345_p6)
}
 0x9bf   : > { %s3349_s16 = scalar_lea.hbm %s3990_s27, 512  ;;  %s3353_s24 = scalar_lea.hbm %s4048_s13, 1024 }
 0x9c0   : > { %p3350_p2 = scmp.ne.s32.totalorder %s3990_s27, %s3349_s16  ;;  %p3354_p0 = scmp.lt.s32.totalorder %s3990_s27, %s4048_s13 }
 0x9c1   : > { %p3355_p11 = scmp.lt.s32.totalorder %s3353_s24, %s3349_s16 }
 0x9c2   : > { %p3351_p4 = pnand %p3350_p2, %p4083_p7 }
 0x9c3   : > { %p3356_p3 = por %p3355_p11, %p3354_p0 }
 0x9c4   : > { %p3352_p8 = pneg %p3351_p4 }
 0x9c6   : > { %p3357_p12 = pnand %p3356_p3, %p3352_p8 }
 0x9c8   : > { %3360 = shalt.err (!%p3357_p12)
}
 0x9c9   : > { %s3427_s9 = smov 128   ;;  %s3428_s20 = smov 8  }
 0x9ca   : > { %2954 = dma.vmem_to_hbm [thread:$0]  (%p4083_p7), %s3992_s1, 512, %s3990_s27, %s2475_s23, %s3427_s9, %s3427_s9, %s3428_s20  }
 0x9cb PF: > { %s4084_s7 = sld [smem:[#allocation18_spill]]  ;;  %s2504_s29 = sand.u32 1, %s3395_s25  }
 0x9cc   : > { %p4086_p13 = scmp.ge.s32.totalorder %s3407_s28, 2  ;;  %s2505_s3 = scalar_lea.sflag [#allocation5], %s2504_s29 }
 0x9d1   : > { %p4085_p9 = scmp.ne.s32.totalorder %s4084_s7, 0 }
 0x9d3   : > { %p2974_p5 = pnand %p4086_p13, %p4085_p9 }
 0x9d5   : > { %p2975_p10 = pneg %p2974_p5 }
 0x9d7   : > { %3390 = dma.done.wait (%p2975_p10), %s2505_s3, 512  }
 0x9d8   : > { %3392 = vsyncadd (%p2975_p10), %s2505_s3, 4294966784  ;;  %s4087_s14 = sld [smem:[#allocation17_spill]]  ;;  %p28_p1 = scmp.ge.s32.totalorder %s3590_s22, 4  }
 0x9d9   : > { %s4088_s27 = sld [smem:[#allocation19_spill]]  ;;  %s4089_s25 = smov %s3399_s26 }
 0x9da   : > { %s4091_s28 = smov %s3590_s22  ;;  %30 = sbr.rel (!%p28_p1) target bundleno = 12 (0xc), region = 133 }
 0x9de   : > { %s4090_s26 = smov %s4087_s14 }
 0x9df   :  { %2510 = vsyncpa [#allocation4], 1 }
 0x9e0   :  { %2512 = vsyncpa [#allocation4 + $0x1], 1 }
 0x9e1   :  { %2513 = vsyncpa [#allocation7], 1 }
 0x9e2   :  { %2514 = vsyncpa [#allocation10], 1 }
 0x9e3   :  { %2515 = vsyncpa [#allocation5], 1 }
 0x9e4   :  { %2517 = vsyncpa [#allocation5 + $0x1], 1 }

// kernel: tpu_custom_call.1
= control target key start
LH: loop header
LB: loop body
LE: loop exit
PB: predicated region body
PF: predicated region fallthrough
CT: control target
= control target key end

     0   :  { %s4035_s0 = inlined_call_operand.hbm [shape: f32[4,16,128], index: 0, kind: input, shape index: {}]   ;;  %s4036_s1 = inlined_call_operand.hbm [shape: bf16[128,384], index: 1, kind: input, shape index: {}]   ;;  %s4037_s2 = inlined_call_operand.vmem [shape: f32[1,384], index: 2, kind: input, shape index: {}]   ;;  %s4038_s3 = inlined_call_operand.hbm [shape: bf16[128,128], index: 3, kind: input, shape index: {}]   ;;  %s4039_s4 = inlined_call_operand.vmem [shape: f32[1,128], index: 4, kind: input, shape index: {}]   ;;  %s4040_s5 = inlined_call_operand.vmem [shape: f32[1,128], index: 5, kind: input, shape index: {}]   ;;  %s4041_s6 = inlined_call_operand.vmem [shape: f32[1,128], index: 6, kind: input, shape index: {}]   ;;  %s4042_s7 = inlined_call_operand.hbm [shape: bf16[128,256], index: 7, kind: input, shape index: {}]   ;;  %s4043_s8 = inlined_call_operand.vmem [shape: f32[1,256], index: 8, kind: input, shape index: {}]   ;;  %s4044_s9 = inlined_call_operand.hbm [shape: bf16[256,128], index: 9, kind: input, shape index: {}]   ;;  %s4045_s10 = inlined_call_operand.vmem [shape: f32[1,128], index: 10, kind: input, shape index: {}]   ;;  %s4046_s11 = inlined_call_operand.vmem [shape: f32[1,128], index: 11, kind: input, shape index: {}]   ;;  %s4047_s12 = inlined_call_operand.vmem [shape: f32[1,128], index: 12, kind: input, shape index: {}]   ;;  %s4048_s13 = inlined_call_operand.hbm [shape: f32[4,16,128], index: 13, kind: output, shape index: {}]  }
   0x1   :  { %4057 = sst [smem:[#allocation20_spill]] %s4036_s1 }
   0x2   :  { %4058 = sst [smem:[#allocation21_spill]] %s4038_s3 }
   0x3   :  { %4059 = sst [smem:[#allocation22_spill]] %s4042_s7 }
   0x4   :  { %4060 = sst [smem:[#allocation23_spill]] %s4044_s9 }
   0x5   :  { %18 = vsyncpa [#allocation4], 0 }
   0x6   :  { %20 = vsyncpa [#allocation4 + $0x1], 0 }
   0x7   :  { %21 = vsyncpa [#allocation7], 0 }
   0x8   :  { %22 = vsyncpa [#allocation10], 0 }
   0x9   :  { %23 = vsyncpa [#allocation5], 0 }
   0xa   :  { %25 = vsyncpa [#allocation5 + $0x1], 0  ;;  %s3499_s25 = smov 0   ;;  %s3501_s26 = smov 0  }
   0xb   :  { %s3503_s27 = smov 0   ;;  %s3505_s28 = smov 0  }
   0xc LB: > { %4061 = sst [smem:[#allocation17_spill]] %s3403_s27  ;;  %s3520_s29 = sadd.s32 4294967295, %s3407_s28   ;;  %s3407_s28 = sphi %s3505_s28, %s4091_s28   ;;  %s3403_s27 = sphi %s3503_s27, %s4088_s27   ;;  %s3399_s26 = sphi %s3501_s26, %s4090_s26   ;;  %s3395_s25 = sphi %s3499_s25, %s4089_s25  }
   0xd   : > { %s2600_s30 = sadd.s32 4294967294, %s3407_s28   ;;  %p51_p0 = scmp.ne.s32.totalorder %s3399_s26, %s3395_s25 }
   0xe   : > { %p4049_p1 = scmp.eq.s32.totalorder %s3520_s29, 0  ;;  %p333_p3 = scmp.eq.s32.totalorder %s2600_s30, 1 }
   0xf   : > { %p2601_p5 = scmp.ge.s32.totalorder %s3407_s28, 1  ;;  %p340_p7 = scmp.lt.s32.totalorder %s3407_s28, 3 }
  0x10   : > { %p3529_p4 = por %p4049_p1, %p51_p0  ;;  %p3534_p6 = por %p333_p3, %p51_p0 }
  0x11   : > { %p3539_p8 = pnand %p2601_p5, %p340_p7  ;;  %s3409_s17 = smov [#allocation6]  }
  0x12   : > { %s4062_s14 = scalar_select %p3529_p4, 1, 0 }
  0x13   : > { %s4063_s15 = scalar_select %p3534_p6, 1, 0 }
  0x14   : > { %s4065_s16 = scalar_select %p3539_p8, 1, 0 }
  0x15   : > { %4064 = sst [smem:[#allocation18_spill]] %s4063_s15  ;;  %s352_s18 = sshll.u32 %s3409_s17, 4  ;;  %s353_s18 = int_to_ptr.vmem [resolvable:$true] %s352_s18 }
  0x16   : > { %p2956_p9 = pneg %p3539_p8  ;;  %s3410_s20 = smov [#allocation9]  }
  0x17   : > { %s390_s21 = sshll.u32 %s3410_s20, 4  ;;  %s3214_s22 = scalar_lea.vmem %s353_s18, 3072  ;;  %s391_s21 = int_to_ptr.vmem [resolvable:$true] %s390_s21 }
  0x18   : > { %p3548_p11 = pnand %p2956_p9, %p4049_p1  ;;  %p3215_p13 = scmp.ne.s32.totalorder %s353_s18, %s3214_s22 }
  0x19   : > { %p3222_p5 = scmp.lt.s32.totalorder %s353_s18, %s353_s18  ;;  %p3223_p7 = scmp.lt.s32.totalorder %s3214_s22, %s3214_s22 }
  0x1a   : > { %p3205_p12 = pneg %p3548_p11 }
  0x1b   : > { %p3224_p10 = por %p3223_p7, %p3222_p5 }
  0x1c   : > { %p3217_p0 = pnand %p3215_p13, %p3205_p12 }
  0x1e   : > { %p3218_p3 = pneg %p3217_p0 }
  0x20   : > { %p3225_p9 = pnand %p3224_p10, %p3218_p3 }
  0x22   : > { %3228 = shalt.err (!%p3225_p9)
}
  0x23   : > { %s3411_s23 = smov 192   ;;  %s3412_s24 = smov 12  }
  0x24   : > { %s4067_s1 = sld [smem:[#allocation20_spill]]  ;;  %s3240_s20 = scalar_lea.vmem %s391_s21, 2048 }
  0x25   : > { %p3241_p1 = scmp.ne.s32.totalorder %s391_s21, %s3240_s20  ;;  %p3248_p2 = scmp.lt.s32.totalorder %s391_s21, %s391_s21 }
  0x26   : > { %p3249_p6 = scmp.lt.s32.totalorder %s3240_s20, %s3240_s20 }
  0x27   : > { %p3243_p13 = pnand %p3241_p1, %p3205_p12 }
  0x28   : > { %p3250_p5 = por %p3249_p6, %p3248_p2 }
  0x29   : > { %p3244_p0 = pneg %p3243_p13 }
  0x2a   : > { %2959 = dma.hbm_to_vmem [thread:$0]  (!%p3548_p11), %s4067_s1, 3072, %s353_s18, [#allocation7], %s3411_s23, %s3411_s23, %s3412_s24  }
  0x2b   : > { %p3251_p10 = pnand %p3250_p5, %p3244_p0 }
  0x2d   : > { %3254 = shalt.err (!%p3251_p10)
}
  0x2e   : > { %s4051_s22 = smov 128   ;;  %s4052_s15 = smov 8  }
  0x2f   : > { %s4068_s7 = sld [smem:[#allocation22_spill]]  ;;  %s3415_s24 = smov [#allocation8]  }
  0x30   : > { %s368_s30 = sshll.u32 %s3415_s24, 4  ;;  %s369_s30 = int_to_ptr.vmem [resolvable:$true] %s368_s30 }
  0x31   : > { %s3266_s17 = scalar_lea.vmem %s369_s30, 1024  ;;  %p3274_p3 = scmp.lt.s32.totalorder %s369_s30, %s369_s30 }
  0x32   : > { %p3267_p1 = scmp.ne.s32.totalorder %s369_s30, %s3266_s17  ;;  %p3275_p7 = scmp.lt.s32.totalorder %s3266_s17, %s3266_s17 }
  0x34   : > { %p3269_p2 = pnand %p3267_p1, %p3205_p12  ;;  %p3276_p9 = por %p3275_p7, %p3274_p3 }
  0x35   : > { %2965 = dma.hbm_to_vmem [thread:$0]  (!%p3548_p11), %s4068_s7, 2048, %s391_s21, [#allocation10], %s4051_s22, %s4051_s22, %s4052_s15  }
  0x36   : > { %p3270_p6 = pneg %p3269_p2 }
  0x38   : > { %p3277_p13 = pnand %p3276_p9, %p3270_p6 }
  0x3a   : > { %3280 = shalt.err (!%p3277_p13)
}
  0x3b   : > { %s3416_s20 = smov 64   ;;  %s3417_s1 = smov 4  }
  0x3c   : > { %s4069_s3 = sld [smem:[#allocation21_spill]]  ;;  %s3418_s23 = smov [#allocation11]  }
  0x3d   : > { %s406_s24 = sshll.u32 %s3418_s23, 4  ;;  %s407_s24 = int_to_ptr.vmem [resolvable:$true] %s406_s24 }
  0x3e   : > { %s3292_s22 = scalar_lea.vmem %s407_s24, 2048  ;;  %p3300_p1 = scmp.lt.s32.totalorder %s407_s24, %s407_s24 }
  0x3f   : > { %p3293_p0 = scmp.ne.s32.totalorder %s407_s24, %s3292_s22  ;;  %p3301_p2 = scmp.lt.s32.totalorder %s3292_s22, %s3292_s22 }
  0x41   : > { %p3295_p5 = pnand %p3293_p0, %p3205_p12  ;;  %p3302_p6 = por %p3301_p2, %p3300_p1 }
  0x42   : > { %2962 = dma.hbm_to_vmem [thread:$0]  (!%p3548_p11), %s4069_s3, 1024, %s369_s30, [#allocation7], %s3416_s20, %s3416_s20, %s3417_s1  }
  0x43   : > { %p3296_p10 = pneg %p3295_p5 }
  0x45   : > { %p3303_p3 = pnand %p3302_p6, %p3296_p10 }
  0x47   : > { %3306 = shalt.err (!%p3303_p3)
}
  0x48   : > { %s4070_s9 = sld [smem:[#allocation23_spill]]  ;;  %s3590_s22 = sadd.s32 1, %s3407_s28  }
  0x49   : > { %s38_s30 = sadd.s32 1, %s3403_s27  ;;  %s35_s19 = ssub.s32 %s3407_s28, %s3590_s22 }
  0x4a   : > { %p45_p12 = scmp.ne.s32.totalorder %s3403_s27, %s3399_s26  ;;  %p36_p7 = scmp.eq.s32.totalorder %s35_s19, 0 }
  0x4b   : > { %p46_p9 = scmp.eq.s32.totalorder %s3407_s28, 0  ;;  %p4071_p13 = scmp.eq.s32.totalorder %s3520_s29, 1 }
  0x4c   : > { %p2981_p5 = scmp.lt.s32.totalorder %s3407_s28, 2  ;;  %s429_s18 = sand.u32 1, %s3403_s27  }
  0x4d   : > { %p3600_p0 = por %p4071_p13, %p45_p12  ;;  %p47_p10 = por %p46_p9, %p45_p12 }
  0x4e   : > { %2968 = dma.hbm_to_vmem [thread:$0]  (!%p3548_p11), %s4070_s9, 2048, %s407_s24, [#allocation10], %s3416_s20, %s3416_s20, %s3417_s1  }
  0x4f   : > { %s4072_s15 = scalar_select %p3600_p0, 1, 0 }
  0x50   : > { %s3606_s21 = scalar_select %p36_p7, %s3403_s27, %s38_s30  }
  0x51   : > { %s2607_s23 = sshll.u32 %s429_s18, 5  ;;  %s2717_s1 = sshll.u32 %s3407_s28, 9 }
  0x52   : > { %4073 = sst [smem:[#allocation19_spill]] %s3606_s21  ;;  %s3613_s17 = scalar_lea.hbm %s4035_s0, %s2717_s1 }
  0x53   : > { %s433_s19 = scalar_lea.vmem [#allocation3], %s2607_s23  ;;  %p3617_p11 = pnand %p2981_p5, %p47_p10 }
  0x54   : > { %s441_s3 = sshll.u32 %s433_s19, 4  ;;  %s3621_s30 = scalar_lea.sflag [#allocation4], %s429_s18  ;;  %s3615_s3 = int_to_ptr.vmem [resolvable:$true] %s441_s3 }
  0x55   : > { %s3307_s9 = scalar_lea.hbm %s3613_s17, 512  ;;  %p3309_p2 = pneg %p3617_p11 }
  0x56   : > { %p3308_p1 = scmp.ne.s32.totalorder %s3613_s17, %s3307_s9  ;;  %s3312_s23 = scalar_lea.hbm %s4035_s0, 1024 }
  0x57   : > { %p3313_p12 = scmp.lt.s32.totalorder %s3613_s17, %s4035_s0  ;;  %p3314_p7 = scmp.lt.s32.totalorder %s3312_s23, %s3307_s9 }
  0x58   : > { %p3310_p6 = pnand %p3309_p2, %p3308_p1 }
  0x59   : > { %p3315_p9 = por %p3314_p7, %p3313_p12 }
  0x5a   : > { %p3311_p3 = pneg %p3310_p6 }
  0x5c   : > { %p3316_p13 = pnand %p3315_p9, %p3311_p3 }
  0x5e   : > { %3319 = shalt.err (!%p3316_p13)
}
  0x5f   : > { %s3320_s18 = scalar_lea.vmem %s3615_s3, 512  ;;  %s3419_s21 = smov [#allocation3]  }
  0x60   : > { %p3321_p5 = scmp.ne.s32.totalorder %s3615_s3, %s3320_s18  ;;  %s3325_s27 = sshll.u32 %s3419_s21, 4  ;;  %s3326_s27 = int_to_ptr.vmem [resolvable:$false] %s3325_s27 }
  0x61   : > { %s3327_s1 = scalar_lea.vmem %s3326_s27, 1024  ;;  %p3328_p6 = scmp.lt.s32.totalorder %s3615_s3, %s3326_s27 }
  0x62   : > { %p3323_p10 = pnand %p3321_p5, %p3309_p2  ;;  %p3329_p0 = scmp.lt.s32.totalorder %s3327_s1, %s3320_s18 }
  0x64   : > { %p3324_p1 = pneg %p3323_p10  ;;  %p3330_p4 = por %p3329_p0, %p3328_p6 }
  0x66   : > { %p3331_p8 = pnand %p3330_p4, %p3324_p1 }
  0x68   : > { %3334 = shalt.err (!%p3331_p8)
}
  0x69   : > { %s4075_s9 = smov 8   ;;  %s4076_s20 = smov 128  }
  0x6a   : > { %2972 = dma.hbm_to_vmem [thread:$0]  (!%p3617_p11), %s3613_s17, 512, %s3615_s3, %s3621_s30, %s4076_s20, %s4076_s20, %s4075_s9  }
  0x6b   : > { %p4077_p2 = scmp.ne.s32.totalorder %s4065_s16, 0 }
  0x6c   : > { %s3648_s21 = sand.u32 (!%p4077_p2), 1, %s3399_s26   ;;  %p4078_p4 = scmp.ne.s32.totalorder (!%p4077_p2), %s4062_s14, 0 }
  0x6d   : > { %453 = sbr.rel (%p4077_p2) target bundleno = 2507 (0x9cb), region = 72  ;;  %s2612_s27 = sshll.u32 (!%p4077_p2), %s3648_s21, 5 }
  0x6e   : > { %s456_s23 = scalar_lea.sflag (!%p4077_p2), [#allocation4], %s3648_s21  ;;  %s3654_s7 = scalar_lea.vmem (!%p4077_p2), [#allocation3], %s2612_s27 }
  0x72   : > { %3378 = dma.done.wait (%p4078_p4), %s456_s23, 512  }
  0x73   : > { %3380 = vsyncadd (%p4078_p4), %s456_s23, 4294966784  ;;  %p4079_p8 = scmp.eq.s32.totalorder %s3520_s29, 0 }
  0x75   : > { %3382 = dma.done.wait (%p4079_p8), [#allocation7], 4096   ;;  %p4080_p0 = pmov %p4079_p8 }
  0x77   : > { %3384 = vsyncadd (%p4080_p0), [#allocation7], 4294963200  ;;  %p4081_p11 = pmov %p4080_p0 }
  0x78   : > { %p4082_p3 = pmov %p4080_p0 }
  0x79   : > { %3386 = dma.done.wait (%p4081_p11), [#allocation10], 4096  }
  0x7a   : > { %3388 = vsyncadd (%p4082_p3), [#allocation10], 4294963200  ;;  %v3420_v0 = vmov 0   ;;  %v3037_v1 = vld [vmem:[#allocation6 + $0xac] ss:$12 sps:$4 sm:$0xff]   ;;  %v529_v8 = vld [vmem:[%s3654_s7] sm:$0xff]  ;;  %v568_v32 = vlaneseq }
  0x7b   : > { %743 = vmatprep.mubr.bf16.mxu0 %v3420_v0  ;;  %v3039_v2 = vld [vmem:[#allocation6 + $0xa8] ss:$12 sps:$4 sm:$0xff]   ;;  %711 = vmatprep.subr.bf16.mxu0 %v3037_v1  ;;  %v3042_v4 = vld [vmem:[#allocation6 + $0x90] ss:$12 sps:$4 sm:$0xff]   ;;  %v3045_v6 = vld [vmem:[#allocation6 + $0x78] ss:$12 sps:$4 sm:$0xff]  }
  0x7c   : > { %v3040_v3 = vld [vmem:[#allocation6 + $0x94] ss:$12 sps:$4 sm:$0xff]   ;;  %712 = vmatpush1.bf16.msra.mxu0 %v3039_v2  ;;  %v3043_v5 = vld [vmem:[#allocation6 + $0x7c] ss:$12 sps:$4 sm:$0xff]   ;;  %v3046_v7 = vld [vmem:[#allocation6 + $0x64] ss:$12 sps:$4 sm:$0xff]  }
  0x7d   : > { %713 = vmatprep.subr.bf16.mxu0 %v3040_v3  ;;  %v3048_v9 = vld [vmem:[#allocation6 + $0x60] ss:$12 sps:$4 sm:$0xff]   ;;  %v3061_v13 = vld [vmem:[#allocation6 + $0xb0] ss:$12 sps:$4 sm:$0xff]   ;;  %v3062_v14 = vld [vmem:[#allocation6 + $0x98] ss:$12 sps:$4 sm:$0xff]  }
  0x7e   : > { %v3049_v10 = vld [vmem:[#allocation6 + $0x4c] ss:$12 sps:$4 sm:$0xff]   ;;  %v3051_v15 = vld [vmem:[#allocation6 + $0x48] ss:$12 sps:$4 sm:$0xff]   ;;  %2800 = vmatprep.subr.bf16.mxu1 %v3061_v13  ;;  %v3054_v18 = vld [vmem:[#allocation6 + $0x30] ss:$12 sps:$4 sm:$0xff]  }
  0x7f   : > { %v530_v11 = vld [vmem:[%s3654_s7 + $0x8] sm:$0xff]  ;;  %v3052_v16 = vld [vmem:[#allocation6 + $0x34] ss:$12 sps:$4 sm:$0xff]   ;;  %2801 = vmatpush3.bf16.msra.mxu1 %v3061_v13  ;;  %v3057_v21 = vld [vmem:[#allocation6 + $0x18] ss:$12 sps:$4 sm:$0xff]   ;;  %v3421_v31 = vmov 0.0  }
  0x80   : > { %714 = vmatpush1.bf16.msra.mxu0 %v3042_v4  ;;  %v533_v12 = vpack.c.bf16 %v530_v11, %v529_v8  ;;  %2802 = vmatprep.subr.bf16.mxu1 %v3062_v14  ;;  %v3063_v17 = vld [vmem:[#allocation6 + $0x80] ss:$12 sps:$4 sm:$0xff]   ;;  %v3055_v19 = vld [vmem:[#allocation6 + $0x1c] ss:$12 sps:$4 sm:$0xff]   ;;  %v3058_v22 = vld [vmem:[#allocation6 + $0x4] ss:$12 sps:$4 sm:$0xff]  }
  0x81   : > { %715 = vmatprep.subr.bf16.mxu0 %v3043_v5  ;;  %v3064_v20 = vld [vmem:[#allocation6 + $0x68] ss:$12 sps:$4 sm:$0xff]   ;;  %v3065_v23 = vld [vmem:[#allocation6 + $0x50] ss:$12 sps:$4 sm:$0xff]   ;;  %v3060_v24 = vld [vmem:[#allocation6] ss:$12 sps:$4 sm:$0xff]  }
  0x82   : > { %2816 = vmatprep.mubr.bf16.mxu1 %v533_v12  ;;  %v3066_v25 = vld [vmem:[#allocation6 + $0x38] ss:$12 sps:$4 sm:$0xff]   ;;  %v3067_v26 = vld [vmem:[#allocation6 + $0x20] ss:$12 sps:$4 sm:$0xff]   ;;  %v531_v27 = vld [vmem:[%s3654_s7 + $0x10] sm:$0xff]  ;;  %vm3422_vm0 = vmmov 0  }
  0x83   : > { %2803 = vmatpush3.bf16.msra.mxu1 %v3062_v14  ;;  %v532_v28 = vld [vmem:[%s3654_s7 + $0x18] sm:$0xff]  ;;  %v3068_v29 = vld [vmem:[#allocation6 + $0x8] ss:$12 sps:$4 sm:$0xff]   ;;  %v3680_v33 = vshrl.u32 %v568_v32, 7  ;;  %v521_v36 = vld [vmem:[%s4037_s2] sm:$0x7] }
  0x84   : > { %716 = vmatpush1.bf16.msra.mxu0 %v3045_v6  ;;  %2804 = vmatprep.subr.bf16.mxu1 %v3063_v17  ;;  %v534_v30 = vpack.c.bf16 %v532_v28, %v531_v27  ;;  %vm819_vm1 = vcmask 261120   ;;  %s3423_s16 = smov 64   ;;  %s3424_s17 = smov 96   ;;  %vm867_vm2 = vcmask 130048   ;;  %vm1317_vm3 = vcmask 523264  }
  0x85   : > { %717 = vmatprep.subr.bf16.mxu0 %v3046_v7  ;;  %v574_v34 = vsub.s32 1, %v3680_v33  ;;  %v570_v38 = vsub.s32 0, %v3680_v33  ;;  %s3425_s30 = smov 32   ;;  %v578_v60 = vsub.s32 2, %v3680_v33  ;;  %vm1320_vm4 = vcmask 785408   ;;  %s517_s19 = scalar_lea.vmem [#allocation12], %s2612_s27 }
  0x86   : > { %s2719_s18 = sshll.u32 %s3520_s29, 9  ;;  %s2489_s1 = sshll.u32 %s517_s19, 4  ;;  %s3992_s1 = int_to_ptr.vmem [resolvable:$true] %s2489_s1 }
  0x87   : > { %2805 = vmatpush3.bf16.msra.mxu1 %v3063_v17  ;;  %v575_v39 = vrot.slane %v521_v36, %v574_v34  ;;  %v571_v42 = vrot.slane %v521_v36, %v570_v38  ;;  %v579_v62 = vrot.slane %v521_v36, %v578_v60  ;;  %s3990_s27 = scalar_lea.hbm %s4048_s13, %s2719_s18  ;;  %s2475_s23 = scalar_lea.sflag [#allocation5], %s3648_s21 }
  0x88   : > { %718 = vmatpush1.bf16.msra.mxu0 %v3048_v9  ;;  %2806 = vmatprep.subr.bf16.mxu1 %v3064_v20  ;;  %p4083_p7 = scmp.ne.s32.totalorder %s4072_s15, 0  ;;  %s3426_s29 = smov [#allocation12]  }
  0x89   : > { %719 = vmatprep.subr.bf16.mxu0 %v3049_v10  ;;  %s3339_s3 = sshll.u32 %s3426_s29, 4  ;;  %s3340_s3 = int_to_ptr.vmem [resolvable:$false] %s3339_s3 }
  0x8a   : > { %s3341_s14 = scalar_lea.vmem %s3340_s3, 1024  ;;  %p3342_p5 = scmp.lt.s32.totalorder %s3992_s1, %s3340_s3 }
  0x8b   : > { %2807 = vmatpush3.bf16.msra.mxu1 %v3064_v20 }
  0x8c   : > { %720 = vmatpush1.bf16.msra.mxu0 %v3051_v15  ;;  %2808 = vmatprep.subr.bf16.mxu1 %v3065_v23 }
  0x8d   : > { %721 = vmatprep.subr.bf16.mxu0 %v3052_v16 }
  0x8f   : > { %2809 = vmatpush3.bf16.msra.mxu1 %v3065_v23 }
  0x90   : > { %722 = vmatpush1.bf16.msra.mxu0 %v3054_v18  ;;  %2810 = vmatprep.subr.bf16.mxu1 %v3066_v25 }
  0x91   : > { %723 = vmatprep.subr.bf16.mxu0 %v3055_v19 }
  0x93   : > { %2811 = vmatpush3.bf16.msra.mxu1 %v3066_v25 }
  0x94   : > { %724 = vmatpush1.bf16.msra.mxu0 %v3057_v21  ;;  %2812 = vmatprep.subr.bf16.mxu1 %v3067_v26 }
  0x95   : > { %725 = vmatprep.subr.bf16.mxu0 %v3058_v22 }
  0x97   : > { %2813 = vmatpush3.bf16.msra.mxu1 %v3067_v26 }
  0x98   : > { %726 = vmatpush1.bf16.msra.mxu0 %v3060_v24  ;;  %2814 = vmatprep.subr.bf16.mxu1 %v3068_v29 }
  0x99   : > { %2820 = vmatprep.subr.bf16.mxu0 %v3421_v31 }
  0x9b   : > { %744 = vmatmul.mubr.bf16.vlgmr.msra.gmra.mxu0 %v533_v12  ;;  %2815 = vmatpush3.bf16.msra.mxu1 %v3068_v29 }
  0x9c   : > { %753 = vmatprep.mubr.bf16.mxu0 %v3420_v0  ;;  %2832 = vmatprep.subr.bf16.mxu1 %v3421_v31 }
  0x9e   : > { %2817 = vmatmul.mubr.bf16.vlgmr.msra.gmra.mxu1 %v534_v30 }
  0x9f   : > { %2834 = vmatprep.mubr.msk.bf16.mxu1 %vm3422_vm0, %v3421_v31 }
  0xa3   : > { %754 = vmatmul.mubr.bf16.gmra.mxu0 %v534_v30 }
  0xa4   : > { %2822 = vmatprep.mubr.msk.bf16.mxu0 %vm3422_vm0, %v3421_v31 }
 0x15b   : > { %v745_v35 = vpop.f32.mrf.mxu0 }
 0x15c   : > { %v746_v49 = vadd.f32 %v745_v35, %v571_v42 }
 0x15d   : > { %v747_v37 = vpop.f32.mrf.mxu0 }
 0x15e   : > { %v748_v43 = vadd.f32 %v747_v37, %v575_v39  ;;  %v2818_v61 = vpop.f32.mrf.mxu1 }
 0x15f   : > { %v749_v40 = vpop.f32.mrf.mxu0  ;;  %v807_v1 = vadd.f32 %v2818_v61, %v579_v62 }
 0x160   : > { %v750_v46 = vadd.f32 %v749_v40, %v571_v42  ;;  %v798_v63 = vpop.f32.mrf.mxu1 }
 0x161   : > { %v751_v41 = vpop.f32.mrf.mxu0  ;;  %v799_v4 = vadd.f32 %v798_v63, %v579_v62 }
 0x162   : > { %v752_v44 = vadd.f32 %v751_v41, %v575_v39  ;;  %v813_v52 = vpack.c.bf16 %v750_v46, %v746_v49  ;;  %v2819_v2 = vpop.f32.mrf.mxu1 }
 0x163   : > { %v755_v45 = vpop.f32.mrf.mxu0  ;;  %v810_v3 = vadd.f32 %v2819_v2, %v579_v62 }
 0x164   : > { %v814_v47 = vpack.c.bf16 %v752_v44, %v748_v43  ;;  %v756_v53 = vadd.f32 %v755_v45, %v571_v42  ;;  %v801_v6 = vpop.f32.mrf.mxu1 }
 0x165   : > { %v757_v48 = vpop.f32.mrf.mxu0  ;;  %v3709_v5 = vpack.c.bf16 %v810_v3, %v807_v1  ;;  %v802_v7 = vadd.f32 %v801_v6, %v579_v62 }
 0x166   : > { %1063 = vrot.lane.b32.xlu1 %v814_v47, %s3423_s16  ;;  %940 = vrot.lane.b32.xlu0 %v814_v47, %s3424_s17  ;;  %v824_v50 = vsel %vm819_vm1, %v814_v47, 0  ;;  %v758_v55 = vadd.f32 %v757_v48, %v575_v39 }
 0x167   : > { %2821 = vmatpush3.bf16.xpose.msra.mxu0 %v824_v50  ;;  %v759_v51 = vpop.f32.mrf.mxu0  ;;  %v3711_v8 = vpack.c.bf16 %v802_v7, %v799_v4 }
 0x168   : > { %2826 = vmatprep.subr.bf16.mxu0 %v3421_v31  ;;  %v760_v56 = vadd.f32 %v759_v51, %v571_v42 }
 0x169   : > { %v761_v54 = vpop.f32.mrf.mxu0 }
 0x16a   : > { %1061 = vrot.lane.b32.xlu1 %v813_v52, %s3423_s16  ;;  %937 = vrot.lane.b32.xlu0 %v813_v52, %s3424_s17  ;;  %v762_v57 = vadd.f32 %v761_v54, %v575_v39  ;;  %v816_v58 = vpack.c.bf16 %v760_v56, %v756_v53 }
 0x16c   : > { %v817_v59 = vpack.c.bf16 %v762_v57, %v758_v55 }
 0x16e   : > { %1183 = vrot.lane.b32.xlu1 %v813_v52, %s3425_s30  ;;  %1185 = vrot.lane.b32.xlu0 %v814_v47, %s3425_s30  ;;  %v1336_v18 = vsel %vm819_vm1, %v817_v59, 0 }
 0x16f   : > { %2823 = vmatmul.mubr.msk.bf16.vlgmr.msra.gmra.mxu0 %vm819_vm1, %v813_v52 }
 0x170   : > { %2828 = vmatprep.mubr.msk.bf16.mxu0 %vm3422_vm0, %v3421_v31  ;;  %2827 = vmatpush3.bf16.msra.mxu0 %v3711_v8 }
 0x171   : > { %2838 = vmatprep.subr.bf16.mxu0 %v3421_v31 }
 0x172   : > { %1451 = vrot.lane.b32.xlu0 %v817_v59, %s3424_s17  ;;  %1448 = vrot.lane.b32.xlu1 %v816_v58, %s3424_s17 }
 0x176   : > { %1574 = vrot.lane.b32.xlu0 %v817_v59, %s3423_s16  ;;  %1572 = vrot.lane.b32.xlu1 %v816_v58, %s3423_s16 }
 0x17a   : > { %1696 = vrot.lane.b32.xlu0 %v817_v59, %s3425_s30  ;;  %1694 = vrot.lane.b32.xlu1 %v816_v58, %s3425_s30 }
 0x17e   : > { %1011 = vrot.lane.b32.xlu1 %v3711_v8, %s3424_s17 }
 0x1d8   : > { %v941_v9 = vpop.permute.xlu0 %940  ;;  %v1064_v11 = vpop.permute.xlu1 %1063 }
 0x1d9   : > { %v946_v10 = vsel %vm819_vm1, %v941_v9, 0  ;;  %v1069_v13 = vsel %vm819_vm1, %v1064_v11, 0 }
 0x1da   : > { %2833 = vmatpush3.bf16.xpose.msra.mxu1 %v946_v10 }
 0x1db   : > { %2844 = vmatprep.subr.bf16.mxu1 %v3421_v31 }
 0x1dc   : > { %v938_v12 = vpop.permute.xlu0 %937  ;;  %v1062_v15 = vpop.permute.xlu1 %1061 }
 0x1e0   : > { %v1186_v14 = vpop.permute.xlu0 %1185  ;;  %v1184_v17 = vpop.permute.xlu1 %1183 }
 0x1e1   : > { %2835 = vmatmul.mubr.msk.bf16.vlgmr.msra.gmra.mxu1 %vm819_vm1, %v938_v12  ;;  %v1191_v16 = vsel %vm819_vm1, %v1186_v14, 0 }
 0x1e2   : > { %2845 = vmatpush3.bf16.xpose.msra.mxu1 %v1069_v13  ;;  %2846 = vmatprep.mubr.msk.bf16.mxu1 %vm3422_vm0, %v3421_v31 }
 0x1e3   : > { %2856 = vmatprep.subr.bf16.mxu1 %v3421_v31 }
 0x1e4   : > { %v1452_v19 = vpop.permute.xlu0 %1451  ;;  %v1449_v22 = vpop.permute.xlu1 %1448 }
 0x1e5   : > { %v1457_v20 = vsel %vm819_vm1, %v1452_v19, 0 }
 0x1e8   : > { %v1575_v21 = vpop.permute.xlu0 %1574  ;;  %v1573_v25 = vpop.permute.xlu1 %1572 }
 0x1e9   : > { %2847 = vmatmul.mubr.msk.bf16.vlgmr.msra.gmra.mxu1 %vm819_vm1, %v1062_v15  ;;  %v1580_v23 = vsel %vm819_vm1, %v1575_v21, 0 }
 0x1ea   : > { %2857 = vmatpush3.bf16.xpose.msra.mxu1 %v1191_v16  ;;  %2858 = vmatprep.mubr.msk.bf16.mxu1 %vm3422_vm0, %v3421_v31 }
 0x1eb   : > { %2868 = vmatprep.subr.bf16.mxu1 %v3421_v31 }
 0x1ec   : > { %v1697_v24 = vpop.permute.xlu0 %1696  ;;  %v1695_v27 = vpop.permute.xlu1 %1694 }
 0x1ed   : > { %v1702_v26 = vsel %vm819_vm1, %v1697_v24, 0 }
 0x1f0   : > { %v1012_v55 = vpop.permute.xlu1 %1011 }
 0x1f1   : > { %2859 = vmatmul.mubr.msk.bf16.vlgmr.msra.gmra.mxu1 %vm819_vm1, %v1184_v17 }
 0x1f2   : > { %2869 = vmatpush3.bf16.xpose.msra.mxu1 %v1336_v18  ;;  %2870 = vmatprep.mubr.msk.bf16.mxu1 %vm3422_vm0, %v3421_v31 }
 0x1f3   : > { %2880 = vmatprep.subr.bf16.mxu1 %v3421_v31 }
 0x1f9   : > { %2871 = vmatmul.mubr.msk.bf16.vlgmr.msra.gmra.mxu1 %vm819_vm1, %v816_v58 }
 0x1fa   : > { %2881 = vmatpush3.bf16.xpose.msra.mxu1 %v1457_v20  ;;  %2882 = vmatprep.mubr.msk.bf16.mxu1 %vm3422_vm0, %v3421_v31 }
 0x1fb   : > { %2892 = vmatprep.subr.bf16.mxu1 %v3421_v31 }
 0x201   : > { %2883 = vmatmul.mubr.msk.bf16.vlgmr.msra.gmra.mxu1 %vm819_vm1, %v1449_v22 }
 0x202   : > { %2893 = vmatpush3.bf16.xpose.msra.mxu1 %v1580_v23  ;;  %2894 = vmatprep.mubr.msk.bf16.mxu1 %vm3422_vm0, %v3421_v31 }
 0x203   : > { %2904 = vmatprep.subr.bf16.mxu1 %v3421_v31 }
 0x209   : > { %2895 = vmatmul.mubr.msk.bf16.vlgmr.msra.gmra.mxu1 %vm819_vm1, %v1573_v25 }
 0x20a   : > { %2905 = vmatpush3.bf16.xpose.msra.mxu1 %v1702_v26  ;;  %2906 = vmatprep.mubr.msk.bf16.mxu1 %vm3422_vm0, %v3421_v31 }
 0x211   : > { %2907 = vmatmul.mubr.msk.bf16.vlgmr.msra.gmra.mxu1 %vm819_vm1, %v1695_v27 }
 0x22f   : > { %v860_v28 = vpop.f32.mrf.mxu0 }
 0x230   : > { %v868_v29 = vsel %vm867_vm2, %v860_v28, -inf }
 0x231   : > { %869 = vmax.xlane.f32.xlu0 %v868_v29  ;;  %v2824_v30 = vpop.f32.mrf.mxu0 }
 0x233   : > { %v863_v32 = vpop.f32.mrf.mxu0 }
 0x234   : > { %v871_v35 = vsel %vm867_vm2, %v863_v32, -inf }
 0x235   : > { %872 = vmax.xlane.f32.xlu1 %v871_v35  ;;  %v2825_v36 = vpop.f32.mrf.mxu0 }
 0x2a1   : > { %v3751_v37 = vpop.f32.mrf.mxu1 }
 0x2a2   : > { %v989_v39 = vsel %vm867_vm2, %v3751_v37, -inf }
 0x2a3   : > { %v2836_v40 = vpop.f32.mrf.mxu1  ;;  %990 = vmax.xlane.f32.xlu0 %v989_v39 }
 0x2a5   : > { %v3755_v41 = vpop.f32.mrf.mxu1 }
 0x2a6   : > { %v992_v42 = vsel %vm867_vm2, %v3755_v41, -inf }
 0x2a7   : > { %v2837_v43 = vpop.f32.mrf.mxu1  ;;  %993 = vmax.xlane.f32.xlu0 %v992_v42 }
 0x2a9   : > { %v3759_v44 = vpop.f32.mrf.mxu1 }
 0x2aa   : > { %v1112_v45 = vsel %vm867_vm2, %v3759_v44, -inf }
 0x2ab   : > { %v2848_v46 = vpop.f32.mrf.mxu1  ;;  %1113 = vmax.xlane.f32.xlu1 %v1112_v45 }
 0x2ad   : > { %v3763_v47 = vpop.f32.mrf.mxu1 }
 0x2ae   : > { %v1115_v48 = vsel %vm867_vm2, %v3763_v47, -inf }
 0x2af   : > { %v2849_v49 = vpop.f32.mrf.mxu1  ;;  %1116 = vmax.xlane.f32.xlu0 %v1115_v48 }
 0x2b1   : > { %v3767_v50 = vpop.f32.mrf.mxu1 }
 0x2b2   : > { %v1234_v51 = vsel %vm867_vm2, %v3767_v50, -inf }
 0x2b3   : > { %v2860_v52 = vpop.f32.mrf.mxu1  ;;  %1235 = vmax.xlane.f32.xlu1 %v1234_v51 }
 0x2b5   : > { %v3771_v53 = vpop.f32.mrf.mxu1 }
 0x2b6   : > { %v1237_v19 = vsel %vm867_vm2, %v3771_v53, -inf }
 0x2b7   : > { %v2861_v54 = vpop.f32.mrf.mxu1 }
 0x2b9   : > { %v3773_v56 = vpop.f32.mrf.mxu1 }
 0x2ba   : > { %v870_v57 = vpop.xlane.xlu0 %869  ;;  %v1379_v21 = vsel %vm867_vm2, %v3773_v56, -inf }
 0x2bb   : > { %v874_v58 = vsub.f32 %v860_v28, %v870_v57  ;;  %v2872_v59 = vpop.f32.mrf.mxu1 }
 0x2bd   : > { %v3775_v60 = vpop.f32.mrf.mxu1  ;;  %v876_v61 = vmul.f32 1.442695, %v874_v58 }
 0x2be   : > { %v873_v62 = vpop.xlane.xlu1 %872  ;;  %v1382_v20 = vsel %vm867_vm2, %v3775_v60, -inf }
 0x2bf   : > { %v875_v63 = vsub.f32 %v863_v32, %v873_v62  ;;  %v2873_v1 = vpop.f32.mrf.mxu1  ;;  %3119 = vpow2.f32 %v876_v61 }
 0x2c1   : > { %v878_v2 = vmul.f32 1.442695, %v875_v63  ;;  %v3777_v3 = vpop.f32.mrf.mxu1 }
 0x2c2   : > { %v1500_v22 = vsel %vm867_vm2, %v3777_v3, -inf }
 0x2c3   : > { %3121 = vpow2.f32 %v878_v2  ;;  %v2884_v4 = vpop.f32.mrf.mxu1 }
 0x2c4   : > { %1255 = vrot.lane.b32.xlu1 %v3711_v8, %s3425_s30 }
 0x2c5   : > { %1133 = vrot.lane.b32.xlu0 %v3711_v8, %s3423_s16  ;;  %v3783_v6 = vpop.f32.mrf.mxu1 }
 0x2c6   : > { %v1503_v24 = vsel %vm867_vm2, %v3783_v6, -inf }
 0x2c7   : > { %v2885_v7 = vpop.f32.mrf.mxu1 }
 0x2c9   : > { %v3785_v9 = vpop.f32.mrf.mxu1 }
 0x2ca   : > { %v1623_v23 = vsel %vm867_vm2, %v3785_v9, -inf }
 0x2cb   : > { %v2896_v10 = vpop.f32.mrf.mxu1 }
 0x2cc   : > { %v3789_v12 = vpop.eup %3119 }
 0x2cd   : > { %v3787_v11 = vpop.f32.mrf.mxu1 }
 0x2ce   : > { %v1626_v25 = vsel %vm867_vm2, %v3787_v11, -inf }
 0x2cf   : > { %v2897_v13 = vpop.f32.mrf.mxu1 }
 0x2d0   : > { %v3791_v14 = vpop.eup %3121 }
 0x2d1   : > { %v888_v15 = vpack.c.bf16 %v3791_v14, %v3789_v12  ;;  %v3795_v16 = vpop.f32.mrf.mxu1 }
 0x2d2   : > { %v1745_v26 = vsel %vm867_vm2, %v3795_v16, -inf }
 0x2d3   : > { %2829 = vmatmul.mubr.msk.bf16.vlgmr.msra.gmra.mxu0 %vm867_vm2, %v888_v15  ;;  %v2908_v8 = vpop.f32.mrf.mxu1 }
 0x2d4   : > { %2839 = vmatpush3.bf16.msra.mxu0 %v1012_v55  ;;  %2840 = vmatprep.mubr.msk.bf16.mxu0 %vm3422_vm0, %v3421_v31 }
 0x2d5   : > { %v3800_v17 = vpop.f32.mrf.mxu1  ;;  %2850 = vmatprep.subr.bf16.mxu0 %v3421_v31 }
 0x2d6   : > { %v1748_v27 = vsel %vm867_vm2, %v3800_v17, -inf }
 0x2d7   : > { %v2909_v18 = vpop.f32.mrf.mxu1 }
 0x2e4   : > { %1238 = vmax.xlane.f32.xlu0 %v1237_v19 }
 0x2e8   : > { %1383 = vmax.xlane.f32.xlu0 %v1382_v20  ;;  %1380 = vmax.xlane.f32.xlu1 %v1379_v21 }
 0x2ec   : > { %1501 = vmax.xlane.f32.xlu0 %v1500_v22  ;;  %1624 = vmax.xlane.f32.xlu1 %v1623_v23 }
 0x2f0   : > { %1504 = vmax.xlane.f32.xlu0 %v1503_v24 }
 0x2f4   : > { %1627 = vmax.xlane.f32.xlu0 %v1626_v25 }
 0x2f8   : > { %1746 = vmax.xlane.f32.xlu0 %v1745_v26 }
 0x2fc   : > { %1749 = vmax.xlane.f32.xlu0 %v1748_v27 }
 0x2fd   : > { %1522 = vrot.lane.b32.xlu1 %v3709_v5, %s3424_s17 }
 0x301   : > { %1766 = vrot.lane.b32.xlu1 %v3709_v5, %s3425_s30 }
 0x312   : > { %1644 = vrot.lane.b32.xlu0 %v3709_v5, %s3423_s16 }
 0x32c   : > { %v991_v28 = vpop.xlane.xlu0 %990 }
 0x32d   : > { %v995_v29 = vsub.f32 %v3751_v37, %v991_v28 }
 0x32f   : > { %v997_v30 = vmul.f32 1.442695, %v995_v29 }
 0x330   : > { %v994_v32 = vpop.xlane.xlu0 %993 }
 0x331   : > { %3123 = vpow2.f32 %v997_v30  ;;  %v996_v35 = vsub.f32 %v3755_v41, %v994_v32 }
 0x333   : > { %v999_v36 = vmul.f32 1.442695, %v996_v35 }
 0x334   : > { %v1114_v39 = vpop.xlane.xlu1 %1113 }
 0x335   : > { %3125 = vpow2.f32 %v999_v36  ;;  %v1118_v40 = vsub.f32 %v3759_v44, %v1114_v39 }
 0x337   : > { %v1120_v42 = vmul.f32 1.442695, %v1118_v40 }
 0x338   : > { %v1117_v43 = vpop.xlane.xlu0 %1116 }
 0x339   : > { %3127 = vpow2.f32 %v1120_v42  ;;  %v1119_v45 = vsub.f32 %v3763_v47, %v1117_v43 }
 0x33b   : > { %v1122_v46 = vmul.f32 1.442695, %v1119_v45 }
 0x33c   : > { %v1236_v48 = vpop.xlane.xlu1 %1235  ;;  %v1134_v55 = vpop.permute.xlu0 %1133 }
 0x33d   : > { %3129 = vpow2.f32 %v1122_v46  ;;  %v1240_v37 = vsub.f32 %v3767_v50, %v1236_v48 }
 0x33e   : > { %v3124_v49 = vpop.eup %3123 }
 0x33f   : > { %v1242_v51 = vmul.f32 1.442695, %v1240_v37  ;;  %v1001_v52 = vsel %vm867_vm2, %v3124_v49, 0.0 }
 0x340   : > { %1002 = vadd.xlane.f32.xlu1 %v1001_v52  ;;  %v1256_v61 = vpop.permute.xlu1 %1255 }
 0x341   : > { %3131 = vpow2.f32 %v1242_v51 }
 0x342   : > { %v3126_v41 = vpop.eup %3125 }
 0x343   : > { %v1004_v54 = vsel %vm867_vm2, %v3126_v41, 0.0  ;;  %v1009_v44 = vpack.c.bf16 %v3126_v41, %v3124_v49 }
 0x344   : > { %1005 = vadd.xlane.f32.xlu0 %v1004_v54 }
 0x345   : > { %2841 = vmatmul.mubr.msk.bf16.vlgmr.msra.gmra.mxu0 %vm867_vm2, %v1009_v44 }
 0x346   : > { %v3128_v47 = vpop.eup %3127  ;;  %2851 = vmatpush3.bf16.msra.mxu0 %v1134_v55  ;;  %2852 = vmatprep.mubr.msk.bf16.mxu0 %vm3422_vm0, %v3421_v31 }
 0x347   : > { %v1124_v50 = vsel %vm867_vm2, %v3128_v47, 0.0  ;;  %2862 = vmatprep.subr.bf16.mxu0 %v3421_v31 }
 0x348   : > { %1125 = vadd.xlane.f32.xlu1 %v1124_v50 }
 0x34a   : > { %v3130_v57 = vpop.eup %3129 }
 0x34b   : > { %v1127_v58 = vsel %vm867_vm2, %v3130_v57, 0.0  ;;  %v1132_v59 = vpack.c.bf16 %v3130_v57, %v3128_v47  ;;  %v880_v57 = vsel %vm867_vm2, %v3789_v12, 0.0 }
 0x34c   : > { %1128 = vadd.xlane.f32.xlu1 %v1127_v58 }
 0x34d   : > { %2853 = vmatmul.mubr.msk.bf16.vlgmr.msra.gmra.mxu0 %vm867_vm2, %v1132_v59 }
 0x34e   : > { %v3132_v62 = vpop.eup %3131  ;;  %2863 = vmatpush3.bf16.msra.mxu0 %v1256_v61  ;;  %2864 = vmatprep.mubr.msk.bf16.mxu0 %vm3422_vm0, %v3421_v31 }
 0x34f   : > { %v1246_v63 = vsel %vm867_vm2, %v3132_v62, 0.0  ;;  %2874 = vmatprep.subr.bf16.mxu0 %v3421_v31 }
 0x350   : > { %1247 = vadd.xlane.f32.xlu1 %v1246_v63 }
 0x36d   : > { %v1239_v1 = vpop.xlane.xlu0 %1238 }
 0x36e   : > { %v1241_v2 = vsub.f32 %v3771_v53, %v1239_v1 }
 0x370   : > { %v1244_v4 = vmul.f32 1.442695, %v1241_v2 }
 0x371   : > { %v1384_v7 = vpop.xlane.xlu0 %1383  ;;  %v1381_v10 = vpop.xlane.xlu1 %1380 }
 0x372   : > { %3133 = vpow2.f32 %v1244_v4  ;;  %v1386_v13 = vsub.f32 %v3775_v60, %v1384_v7  ;;  %v1385_v15 = vsub.f32 %v3773_v56, %v1381_v10 }
 0x374   : > { %v1389_v8 = vmul.f32 1.442695, %v1386_v13  ;;  %v1387_v18 = vmul.f32 1.442695, %v1385_v15 }
 0x375   : > { %v1502_v19 = vpop.xlane.xlu0 %1501  ;;  %v1625_v20 = vpop.xlane.xlu1 %1624 }
 0x376   : > { %v1506_v21 = vsub.f32 %v3777_v3, %v1502_v19  ;;  %v1629_v22 = vsub.f32 %v3785_v9, %v1625_v20  ;;  %3135 = vpow2.f32 %v1389_v8 }
 0x377   : > { %3137 = vpow2.f32 %v1387_v18 }
 0x378   : > { %v1508_v23 = vmul.f32 1.442695, %v1506_v21  ;;  %v1631_v53 = vmul.f32 1.442695, %v1629_v22 }
 0x379   : > { %v1505_v24 = vpop.xlane.xlu0 %1504 }
 0x37a   : > { %3139 = vpow2.f32 %v1508_v23  ;;  %v1507_v25 = vsub.f32 %v3783_v6, %v1505_v24 }
 0x37b   : > { %3141 = vpow2.f32 %v1631_v53 }
 0x37c   : > { %v1510_v60 = vmul.f32 1.442695, %v1507_v25 }
 0x37d   : > { %v1628_v26 = vpop.xlane.xlu0 %1627 }
 0x37e   : > { %3143 = vpow2.f32 %v1510_v60  ;;  %v1630_v56 = vsub.f32 %v3787_v11, %v1628_v26 }
 0x37f   : > { %v3134_v27 = vpop.eup %3133 }
 0x380   : > { %v1633_v28 = vmul.f32 1.442695, %v1630_v56  ;;  %v1249_v3 = vsel %vm867_vm2, %v3134_v27, 0.0  ;;  %v1254_v29 = vpack.c.bf16 %v3134_v27, %v3132_v62  ;;  %v883_v62 = vsel %vm867_vm2, %v3791_v14, 0.0 }
 0x381   : > { %1250 = vadd.xlane.f32.xlu0 %v1249_v3  ;;  %v1747_v9 = vpop.xlane.xlu0 %1746 }
 0x382   : > { %3145 = vpow2.f32 %v1633_v28  ;;  %v1751_v30 = vsub.f32 %v3795_v16, %v1747_v9  ;;  %2865 = vmatmul.mubr.msk.bf16.vlgmr.msra.gmra.mxu0 %vm867_vm2, %v1254_v29 }
 0x383   : > { %2875 = vmatpush3.bf16.msra.mxu0 %v3709_v5  ;;  %2876 = vmatprep.mubr.msk.bf16.mxu0 %vm3422_vm0, %v3421_v31  ;;  %v3136_v6 = vpop.eup %3135  ;;  %v1523_v5 = vpop.permute.xlu1 %1522 }
 0x384   : > { %v1753_v32 = vmul.f32 1.442695, %v1751_v30  ;;  %2886 = vmatprep.subr.bf16.mxu0 %v3421_v31  ;;  %v3138_v11 = vpop.eup %3137  ;;  %v1394_v12 = vsel %vm867_vm2, %v3136_v6, 0.0 }
 0x385   : > { %v1750_v35 = vpop.xlane.xlu0 %1749  ;;  %v1399_v42 = vpack.c.bf16 %v3136_v6, %v3138_v11  ;;  %v1391_v63 = vsel %vm867_vm2, %v3138_v11, 0.0 }
 0x386   : > { %3147 = vpow2.f32 %v1753_v32  ;;  %v1752_v36 = vsub.f32 %v3800_v17, %v1750_v35 }
 0x387   : > { %v3140_v39 = vpop.eup %3139  ;;  %v1767_v61 = vpop.permute.xlu1 %1766 }
 0x388   : > { %v1755_v40 = vmul.f32 1.442695, %v1752_v36  ;;  %v1512_v16 = vsel %vm867_vm2, %v3140_v39, 0.0  ;;  %v3142_v43 = vpop.eup %3141 }
 0x389   : > { %1513 = vadd.xlane.f32.xlu1 %v1512_v16  ;;  %v1635_v17 = vsel %vm867_vm2, %v3142_v43, 0.0  ;;  %v1645_v51 = vpop.permute.xlu0 %1644  ;;  %v3069_v16 = vld [vmem:[#allocation8 + $0x38] sm:$0xff]  }
 0x38a   : > { %3149 = vpow2.f32 %v1755_v40  ;;  %2877 = vmatmul.mubr.msk.bf16.vlgmr.msra.gmra.mxu0 %vm867_vm2, %v1399_v42  ;;  %2916 = vmatprep.subr.bf16.mxu1 %v3069_v16 }
 0x38b   : > { %v3144_v45 = vpop.eup %3143  ;;  %2887 = vmatpush3.bf16.msra.mxu0 %v1523_v5  ;;  %2888 = vmatprep.mubr.msk.bf16.mxu0 %vm3422_vm0, %v3421_v31 }
 0x38c   : > { %v1515_v46 = vsel %vm867_vm2, %v3144_v45, 0.0  ;;  %2898 = vmatprep.subr.bf16.mxu0 %v3421_v31  ;;  %v1520_v49 = vpack.c.bf16 %v3144_v45, %v3140_v39  ;;  %2917 = vmatpush3.bf16.msra.mxu1 %v3069_v16 }
 0x38d   : > { %1516 = vadd.xlane.f32.xlu0 %v1515_v46  ;;  %1636 = vadd.xlane.f32.xlu1 %v1635_v17 }
 0x38f   : > { %v3146_v48 = vpop.eup %3145 }
 0x390   : > { %v1638_v37 = vsel %vm867_vm2, %v3146_v48, 0.0  ;;  %v1643_v58 = vpack.c.bf16 %v3146_v48, %v3142_v43 }
 0x391   : > { %1639 = vadd.xlane.f32.xlu0 %v1638_v37 }
 0x392   : > { %2889 = vmatmul.mubr.msk.bf16.vlgmr.msra.gmra.mxu0 %vm867_vm2, %v1520_v49 }
 0x393   : > { %v3148_v52 = vpop.eup %3147  ;;  %v3869_v41 = vpop.f32.mrf.mxu0  ;;  %2899 = vmatpush3.bf16.msra.mxu0 %v1645_v51  ;;  %2900 = vmatprep.mubr.msk.bf16.mxu0 %vm3422_vm0, %v3421_v31 }
 0x394   : > { %v1757_v54 = vsel %vm867_vm2, %v3148_v52, 0.0  ;;  %2910 = vmatprep.subr.bf16.mxu0 %v3421_v31 }
 0x395   : > { %v2830_v44 = vpop.f32.mrf.mxu0  ;;  %1758 = vadd.xlane.f32.xlu1 %v1757_v54 }
 0x396   : > { %v3071_v44 = vld [vmem:[#allocation8 + $0x30] sm:$0xff]  }
 0x397   : > { %v3150_v55 = vpop.eup %3149  ;;  %v3875_v47 = vpop.f32.mrf.mxu0  ;;  %2918 = vmatprep.subr.bf16.mxu1 %v3071_v44 }
 0x398   : > { %v1760_v50 = vsel %vm867_vm2, %v3150_v55, 0.0  ;;  %v1765_v1 = vpack.c.bf16 %v3150_v55, %v3148_v52  ;;  %2919 = vmatpush3.bf16.msra.mxu1 %v3071_v44 }
 0x399   : > { %v2831_v59 = vpop.f32.mrf.mxu0  ;;  %1761 = vadd.xlane.f32.xlu0 %v1760_v50  ;;  %881 = vadd.xlane.f32.xlu1 %v880_v57  ;;  %v3072_v57 = vld [vmem:[#allocation8 + $0x28] sm:$0xff]  }
 0x39a   : > { %2901 = vmatmul.mubr.msk.bf16.vlgmr.msra.gmra.mxu0 %vm867_vm2, %v1643_v58  ;;  %2920 = vmatprep.subr.bf16.mxu1 %v3072_v57 }
 0x39b   : > { %2911 = vmatpush3.bf16.msra.mxu0 %v1767_v61  ;;  %2912 = vmatprep.mubr.msk.bf16.mxu0 %vm3422_vm0, %v3421_v31 }
 0x39c   : > { %2921 = vmatpush3.bf16.msra.mxu1 %v3072_v57 }
 0x39d   : > { %884 = vadd.xlane.f32.xlu0 %v883_v62  ;;  %1392 = vadd.xlane.f32.xlu1 %v1391_v63 }
 0x3a1   : > { %1395 = vadd.xlane.f32.xlu0 %v1394_v12 }
 0x3a2   : > { %2913 = vmatmul.mubr.msk.bf16.vlgmr.msra.gmra.mxu0 %vm867_vm2, %v1765_v1 }
 0x3a3   : > { %2186 = vmatprep.mubr.bf16.mxu0 %v3420_v0 }
 0x3c9   : > { %v1003_v2 = vpop.xlane.xlu1 %1002 }
 0x3ca   : > { %3151 = vrcp.f32 %v1003_v2  ;;  %v3073_v2 = vld [vmem:[#allocation8 + $0x20] sm:$0xff]  }
 0x3cb   : > { %2922 = vmatprep.subr.bf16.mxu1 %v3073_v2 }
 0x3cc   : > { %2923 = vmatpush3.bf16.msra.mxu1 %v3073_v2 }
 0x3cd   : > { %v1006_v4 = vpop.xlane.xlu0 %1005 }
 0x3ce   : > { %3153 = vrcp.f32 %v1006_v4 }
 0x3d1   : > { %v1126_v7 = vpop.xlane.xlu1 %1125 }
 0x3d2   : > { %3155 = vrcp.f32 %v1126_v7 }
 0x3d5   : > { %v1129_v31 = vpop.xlane.xlu1 %1128 }
 0x3d6   : > { %3157 = vrcp.f32 %v1129_v31  ;;  %v3074_v31 = vld [vmem:[#allocation8 + $0x18] sm:$0xff]  }
 0x3d7   : > { %v3152_v13 = vpop.eup %3151  ;;  %2924 = vmatprep.subr.bf16.mxu1 %v3074_v31 }
 0x3d8   : > { %2925 = vmatpush3.bf16.msra.mxu1 %v3074_v31  ;;  %v3200_v31 = vld [vmem:[%s3654_s7 + $0x8] sm:$0xff] }
 0x3d9   : > { %v1248_v28 = vpop.xlane.xlu1 %1247 }
 0x3da   : > { %3159 = vrcp.f32 %v1248_v28 }
 0x3db   : > { %v3154_v15 = vpop.eup %3153 }
 0x3df   : > { %v3156_v53 = vpop.eup %3155 }
 0x3e3   : > { %v3158_v24 = vpop.eup %3157 }
 0x3e7   : > { %v3160_v5 = vpop.eup %3159 }
 0x405   : > { %v1051_v14 = vpop.f32.mrf.mxu0 }
 0x406   : > { %v1058_v18 = vmul.f32 %v3152_v13, %v1051_v14 }
 0x407   : > { %v2842_v10 = vpop.f32.mrf.mxu0 }
 0x409   : > { %v1054_v8 = vpop.f32.mrf.mxu0 }
 0x40a   : > { %v1059_v19 = vmul.f32 %v3154_v15, %v1054_v8  ;;  %v1251_v3 = vpop.xlane.xlu0 %1250 }
 0x40b   : > { %v2843_v20 = vpop.f32.mrf.mxu0  ;;  %3161 = vrcp.f32 %v1251_v3 }
 0x40c   : > { %v1060_v21 = vpack.c.bf16 %v1059_v19, %v1058_v18  ;;  %v3075_v20 = vld [vmem:[#allocation8 + $0x10] sm:$0xff]  }
 0x40d   : > { %v1173_v22 = vpop.f32.mrf.mxu0  ;;  %2926 = vmatprep.subr.bf16.mxu1 %v3075_v20 }
 0x40e   : > { %1306 = vrot.lane.b32.xlu1 %v1060_v21, %s3425_s30  ;;  %v1180_v60 = vmul.f32 %v3156_v53, %v1173_v22  ;;  %2927 = vmatpush3.bf16.msra.mxu1 %v3075_v20 }
 0x40f   : > { %v2854_v23 = vpop.f32.mrf.mxu0 }
 0x411   : > { %v1176_v25 = vpop.f32.mrf.mxu0 }
 0x412   : > { %v1181_v26 = vmul.f32 %v3158_v24, %v1176_v25  ;;  %v1514_v29 = vpop.xlane.xlu1 %1513 }
 0x413   : > { %v2855_v56 = vpop.f32.mrf.mxu0 }
 0x414   : > { %v1182_v27 = vpack.c.bf16 %v1181_v26, %v1180_v60  ;;  %v3076_v60 = vld [vmem:[#allocation8 + $0x8] sm:$0xff]   ;;  %v3077_v26 = vld [vmem:[#allocation8] sm:$0xff]  }
 0x415   : > { %2928 = vmatprep.subr.bf16.mxu1 %v3076_v60 }
 0x416   : > { %1309 = vrot.lane.b32.xlu0 %v1182_v27, %s3423_s16  ;;  %v1517_v9 = vpop.xlane.xlu0 %1516  ;;  %v1637_v30 = vpop.xlane.xlu1 %1636  ;;  %2929 = vmatpush3.bf16.msra.mxu1 %v3076_v60 }
 0x417   : > { %2930 = vmatprep.subr.bf16.mxu1 %v3077_v26 }
 0x418   : > { %v3162_v45 = vpop.eup %3161 }
 0x41a   : > { %v1640_v6 = vpop.xlane.xlu0 %1639  ;;  %2931 = vmatpush3.bf16.msra.mxu1 %v3077_v26 }
 0x41e   : > { %v1759_v32 = vpop.xlane.xlu1 %1758 }
 0x422   : > { %v1762_v11 = vpop.xlane.xlu0 %1761  ;;  %v3891_v35 = vpop.xlane.xlu1 %881 }
 0x426   : > { %v3893_v36 = vpop.xlane.xlu0 %884  ;;  %v1393_v39 = vpop.xlane.xlu1 %1392 }
 0x427   : > { %3163 = vrcp.f32 %v1393_v39 }
 0x42a   : > { %v1396_v40 = vpop.xlane.xlu0 %1395 }
 0x42b   : > { %3165 = vrcp.f32 %v1396_v40 }
 0x42c   : > { %3167 = vrcp.f32 %v1514_v29 }
 0x42d   : > { %3169 = vrcp.f32 %v1517_v9 }
 0x42e   : > { %3171 = vrcp.f32 %v1637_v30 }
 0x42f   : > { %3173 = vrcp.f32 %v1640_v6 }
 0x430   : > { %3175 = vrcp.f32 %v1759_v32 }
 0x431   : > { %3177 = vrcp.f32 %v1762_v11 }
 0x432   : > { %3179 = vrcp.f32 %v3893_v36 }
 0x433   : > { %3181 = vrcp.f32 %v3891_v35 }
 0x434   : > { %v3164_v54 = vpop.eup %3163 }
 0x438   : > { %v3166_v55 = vpop.eup %3165 }
 0x439   : > { %v3168_v1 = vpop.eup %3167 }
 0x43a   : > { %v3170_v4 = vpop.eup %3169 }
 0x43b   : > { %v3172_v19 = vpop.eup %3171 }
 0x43c   : > { %v3174_v21 = vpop.eup %3173 }
 0x43d   : > { %v3176_v28 = vpop.eup %3175 }
 0x43e   : > { %v3178_v3 = vpop.eup %3177 }
 0x43f   : > { %v3180_v11 = vpop.eup %3179 }
 0x440   : > { %v3182_v39 = vpop.eup %3181  ;;  %v934_v40 = vmul.f32 %v3180_v11, %v3875_v47  ;;  %v3087_v11 = vld [vmem:[#allocation9 + $0x54] ss:$8 sps:$4 sm:$0xff]  }
 0x441   : > { %v933_v16 = vmul.f32 %v3182_v39, %v3869_v41  ;;  %v3085_v39 = vld [vmem:[#allocation9 + $0x50] ss:$8 sps:$4 sm:$0xff]  }
 0x442   : > { %v1295_v42 = vpop.f32.mrf.mxu0 }
 0x443   : > { %v1302_v17 = vmul.f32 %v3160_v5, %v1295_v42 }
 0x444   : > { %v2866_v43 = vpop.f32.mrf.mxu0 }
 0x445   : > { %v935_v43 = vpack.c.bf16 %v934_v40, %v933_v16  ;;  %v3090_v40 = vld [vmem:[#allocation9 + $0x44] ss:$8 sps:$4 sm:$0xff]   ;;  %v3088_v16 = vld [vmem:[#allocation9 + $0x40] ss:$8 sps:$4 sm:$0xff]  }
 0x446   : > { %v1298_v46 = vpop.f32.mrf.mxu0 }
 0x447   : > { %v1303_v48 = vmul.f32 %v3162_v45, %v1298_v46 }
 0x448   : > { %v2867_v37 = vpop.f32.mrf.mxu0 }
 0x449   : > { %v1304_v49 = vpack.c.bf16 %v1303_v48, %v1302_v17 }
 0x44a   : > { %v1437_v51 = vpop.f32.mrf.mxu0 }
 0x44b   : > { %1312 = vrot.lane.b32.xlu1 %v1304_v49, %s3424_s17  ;;  %v3896_v58 = vmul.f32 %v3164_v54, %v1437_v51 }
 0x44c   : > { %v2878_v52 = vpop.f32.mrf.mxu0 }
 0x44e   : > { %v1440_v50 = vpop.f32.mrf.mxu0 }
 0x44f   : > { %v3898_v59 = vmul.f32 %v3166_v55, %v1440_v50 }
 0x450   : > { %v2879_v61 = vpop.f32.mrf.mxu0 }
 0x451   : > { %v1446_v62 = vpack.c.bf16 %v3898_v59, %v3896_v58  ;;  %v2662_v58 = vld [vmem:[%s4039_s4] ss:$0 sm:$0xff] }
 0x452   : > { %v1562_v63 = vpop.f32.mrf.mxu0 }
 0x453   : > { %v1569_v14 = vmul.f32 %v3168_v1, %v1562_v63 }
 0x454   : > { %v2890_v12 = vpop.f32.mrf.mxu0 }
 0x455   : > { %v3199_v12 = vld [vmem:[%s3654_s7] sm:$0xff] }
 0x456   : > { %v1565_v7 = vpop.f32.mrf.mxu0 }
 0x457   : > { %v1570_v10 = vmul.f32 %v3170_v4, %v1565_v7 }
 0x458   : > { %v2891_v13 = vpop.f32.mrf.mxu0 }
 0x459   : > { %v1571_v15 = vpack.c.bf16 %v1570_v10, %v1569_v14  ;;  %v3201_v10 = vld [vmem:[%s3654_s7 + $0x10] sm:$0xff] }
 0x45a   : > { %v1684_v8 = vpop.f32.mrf.mxu0 }
 0x45b   : > { %1817 = vrot.lane.b32.xlu1 %v1571_v15, %s3425_s30  ;;  %v1691_v23 = vmul.f32 %v3172_v19, %v1684_v8  ;;  %v3202_v15 = vld [vmem:[%s3654_s7 + $0x18] sm:$0xff]  ;;  %s3335_s7 = scalar_lea.vmem %s3992_s1, 512 }
 0x45c   : > { %v2902_v18 = vpop.f32.mrf.mxu0  ;;  %v3081_v19 = vld [vmem:[#allocation9 + $0x74] ss:$8 sps:$4 sm:$0xff]   ;;  %p3336_p12 = scmp.ne.s32.totalorder %s3992_s1, %s3335_s7  ;;  %p3343_p10 = scmp.lt.s32.totalorder %s3341_s14, %s3335_s7 }
 0x45d   : > { %v3079_v18 = vld [vmem:[#allocation9 + $0x70] ss:$8 sps:$4 sm:$0xff]   ;;  %2154 = vmatprep.subr.bf16.mxu0 %v3081_v19 }
 0x45e   : > { %v1687_v22 = vpop.f32.mrf.mxu0  ;;  %2155 = vmatpush1.bf16.msra.mxu0 %v3079_v18  ;;  %v2674_v19 = vld [vmem:[%s4041_s6] ss:$0 sm:$0xff]  ;;  %p3337_p9 = pnand %p3336_p12, %p4083_p7  ;;  %p3344_p1 = por %p3343_p10, %p3342_p5 }
 0x45f   : > { %v1692_v53 = vmul.f32 %v3174_v21, %v1687_v22 }
 0x460   : > { %v2903_v24 = vpop.f32.mrf.mxu0  ;;  %p3338_p13 = pneg %p3337_p9 }
 0x461   : > { %v1693_v25 = vpack.c.bf16 %v1692_v53, %v1691_v23 }
 0x462   : > { %v1806_v56 = vpop.f32.mrf.mxu0  ;;  %p3345_p6 = pnand %p3344_p1, %p3338_p13 }
 0x463   : > { %1820 = vrot.lane.b32.xlu0 %v1693_v25, %s3423_s16  ;;  %v1813_v9 = vmul.f32 %v3176_v28, %v1806_v56 }
 0x464   : > { %v2914_v27 = vpop.f32.mrf.mxu0 }
 0x466   : > { %v1809_v29 = vpop.f32.mrf.mxu0 }
 0x467   : > { %v1814_v30 = vmul.f32 %v3178_v3, %v1809_v29 }
 0x468   : > { %v2915_v6 = vpop.f32.mrf.mxu0 }
 0x469   : > { %v1815_v32 = vpack.c.bf16 %v1814_v30, %v1813_v9  ;;  %v3084_v6 = vld [vmem:[#allocation9 + $0x64] ss:$8 sps:$4 sm:$0xff]  }
 0x46a   : > { %2156 = vmatprep.subr.bf16.mxu0 %v3084_v6  ;;  %v3117_v6 = vld [vmem:[#allocation11 + $0x40] sm:$0xff]  }
 0x46b   : > { %1823 = vrot.lane.b32.xlu1 %v1815_v32, %s3424_s17  ;;  %v3082_v32 = vld [vmem:[#allocation9 + $0x60] ss:$8 sps:$4 sm:$0xff]  }
 0x46c   : > { %2157 = vmatpush1.bf16.msra.mxu0 %v3082_v32  ;;  %v3118_v32 = vld [vmem:[#allocation11] sm:$0xff]  }
 0x46d   : > { %2158 = vmatprep.subr.bf16.mxu0 %v3087_v11 }
 0x470   : > { %2159 = vmatpush1.bf16.msra.mxu0 %v3085_v39 }
 0x471   : > { %2160 = vmatprep.subr.bf16.mxu0 %v3090_v40 }
 0x474   : > { %2161 = vmatpush1.bf16.msra.mxu0 %v3088_v16 }
 0x480   : > { %v1307_v42 = vpop.permute.xlu1 %1306 }
 0x481   : > { %v1316_v45 = vsel %vm819_vm1, %v935_v43, %v1307_v42  ;;  %v3091_v42 = vld [vmem:[#allocation9 + $0x30] ss:$8 sps:$4 sm:$0xff]   ;;  %v3093_v43 = vld [vmem:[#allocation9 + $0x34] ss:$8 sps:$4 sm:$0xff]  }
 0x482   : > { %2162 = vmatprep.subr.bf16.mxu0 %v3093_v43 }
 0x483   : > { %2163 = vmatpush1.bf16.msra.mxu0 %v3091_v42 }
 0x488   : > { %v1310_v5 = vpop.permute.xlu0 %1309 }
 0x489   : > { %v1319_v46 = vsel %vm1317_vm3, %v1316_v45, %v1310_v5  ;;  %v3096_v5 = vld [vmem:[#allocation9 + $0x24] ss:$8 sps:$4 sm:$0xff]   ;;  %v3094_v45 = vld [vmem:[#allocation9 + $0x20] ss:$8 sps:$4 sm:$0xff]  }
 0x48a   : > { %2164 = vmatprep.subr.bf16.mxu0 %v3096_v5 }
 0x48b   : > { %2165 = vmatpush1.bf16.msra.mxu0 %v3094_v45 }
 0x4bd   : > { %v1313_v17 = vpop.permute.xlu1 %1312 }
 0x4be   : > { %v1322_v36 = vsel %vm1320_vm4, %v1319_v46, %v1313_v17  ;;  %v3099_v46 = vld [vmem:[#allocation9 + $0x14] ss:$8 sps:$4 sm:$0xff]   ;;  %v3097_v17 = vld [vmem:[#allocation9 + $0x10] ss:$8 sps:$4 sm:$0xff]  }
 0x4bf   : > { %v2650_v48 = vcombine.low %v1322_v36, %v1322_v36  ;;  %v2651_v35 = vcombine.high %v1322_v36, %v1322_v36  ;;  %2166 = vmatprep.subr.bf16.mxu0 %v3099_v46  ;;  %v3102_v36 = vld [vmem:[#allocation9 + $0x4] ss:$8 sps:$4 sm:$0xff]  }
 0x4c0   : > { %2167 = vmatpush1.bf16.msra.mxu0 %v3097_v17 }
 0x4c1   : > { %1330 = vst [vmem:[#allocation2] sm:$0xf] %v2650_v48  ;;  %1331 = vst [vmem:[#allocation2 + $0x4] sm:$0xf] %v2651_v35  ;;  %v3100_v48 = vld [vmem:[#allocation9] ss:$8 sps:$4 sm:$0xff]   ;;  %2168 = vmatprep.subr.bf16.mxu0 %v3102_v36 }
 0x4c2   : > { %v3103_v35 = vld [vmem:[#allocation11 + $0x78] sm:$0xff]  }
 0x4c3   : > { %2772 = vmatprep.subr.bf16.mxu1 %v3103_v35 }
 0x4c4   : > { %2169 = vmatpush1.bf16.msra.mxu0 %v3100_v48 }
 0x4c8   : > { %v3070_v37 = vld [vmem:[#allocation2] sm:$0xff]  }
 0x4c9   : > { %2932 = vmatprep.mubr.bf16.mxu1 %v3070_v37  ;;  %v3104_v37 = vld [vmem:[#allocation11 + $0x38] sm:$0xff]  }
 0x4cd   : > { %v1818_v47 = vpop.permute.xlu1 %1817 }
 0x4ce   : > { %v1827_v49 = vsel %vm819_vm1, %v1446_v62, %v1818_v47  ;;  %v3105_v47 = vld [vmem:[#allocation11 + $0x70] sm:$0xff]  }
 0x4d5   : > { %v1821_v41 = vpop.permute.xlu0 %1820 }
 0x4d6   : > { %v1829_v51 = vsel %vm1317_vm3, %v1827_v49, %v1821_v41  ;;  %v3106_v41 = vld [vmem:[#allocation11 + $0x30] sm:$0xff]   ;;  %v3107_v49 = vld [vmem:[#allocation11 + $0x68] sm:$0xff]  }
 0x4dd   : > { %v1824_v52 = vpop.permute.xlu1 %1823 }
 0x4de   : > { %v1831_v54 = vsel %vm1320_vm4, %v1829_v51, %v1824_v52  ;;  %v3108_v51 = vld [vmem:[#allocation11 + $0x28] sm:$0xff]   ;;  %v3109_v52 = vld [vmem:[#allocation11 + $0x60] sm:$0xff]  }
 0x4df   : > { %v2660_v44 = vcombine.low %v1831_v54, %v1831_v54  ;;  %v2661_v55 = vcombine.high %v1831_v54, %v1831_v54  ;;  %v3110_v54 = vld [vmem:[#allocation11 + $0x20] sm:$0xff]  }
 0x4e1   : > { %1839 = vst [vmem:[#allocation2 + $0x8] sm:$0xf] %v2660_v44  ;;  %1840 = vst [vmem:[#allocation2 + $0xc] sm:$0xf] %v2661_v55  ;;  %v3111_v44 = vld [vmem:[#allocation11 + $0x58] sm:$0xff]  }
 0x4e2   : > { %v3112_v55 = vld [vmem:[#allocation11 + $0x18] sm:$0xff]  }
 0x4e8   : > { %v3078_v50 = vld [vmem:[#allocation2 + $0x8] sm:$0xff]  }
 0x4e9   : > { %2933 = vmatmul.mubr.bf16.vlgmr.msra.gmra.mxu1 %v3078_v50 }
 0x4ea   : > { %2773 = vmatpush3.bf16.msra.mxu1 %v3104_v37 }
 0x4eb   : > { %2774 = vmatprep.subr.bf16.mxu1 %v3105_v47 }
 0x4ee   : > { %2775 = vmatpush3.bf16.msra.mxu1 %v3106_v41 }
 0x4ef   : > { %2776 = vmatprep.subr.bf16.mxu1 %v3107_v49 }
 0x4f2   : > { %2777 = vmatpush3.bf16.msra.mxu1 %v3108_v51 }
 0x4f3   : > { %2778 = vmatprep.subr.bf16.mxu1 %v3109_v52 }
 0x4f6   : > { %2779 = vmatpush3.bf16.msra.mxu1 %v3110_v54 }
 0x4f7   : > { %2780 = vmatprep.subr.bf16.mxu1 %v3111_v44 }
 0x4fa   : > { %2781 = vmatpush3.bf16.msra.mxu1 %v3112_v55 }
 0x5a9   : > { %v2934_v57 = vpop.f32.mrf.mxu1 }
 0x5aa   : > { %v1970_v63 = vadd.f32 %v2934_v57, %v2662_v58 }
 0x5ab   : > { %v1961_v59 = vpop.f32.mrf.mxu1 }
 0x5ac   : > { %v1962_v61 = vadd.f32 %v2662_v58, %v1961_v59  ;;  %v1978_v13 = vadd.f32 %v3201_v10, %v1970_v63  ;;  %v2673_v10 = vld [vmem:[%s4040_s5] ss:$0 sm:$0xff] }
 0x5ad   : > { %v2935_v62 = vpop.f32.mrf.mxu1 }
 0x5ae   : > { %v1976_v1 = vadd.f32 %v3199_v12, %v1962_v61  ;;  %v1973_v7 = vadd.f32 %v2935_v62, %v2662_v58 }
 0x5af   : > { %v1964_v2 = vpop.f32.mrf.mxu1 }
 0x5b0   : > { %v1965_v4 = vadd.f32 %v2662_v58, %v1964_v2  ;;  %1980 = vadd.xlane.f32.xlu0 %v1976_v1  ;;  %v1979_v8 = vadd.f32 %v3202_v15, %v1973_v7 }
 0x5b2   : > { %v1977_v14 = vadd.f32 %v3200_v31, %v1965_v4 }
 0x5b4   : > { %1982 = vadd.xlane.f32.xlu1 %v1977_v14  ;;  %1984 = vadd.xlane.f32.xlu0 %v1978_v13 }
 0x5b8   : > { %1986 = vadd.xlane.f32.xlu0 %v1979_v8 }
 0x639   : > { %v1981_v20 = vpop.xlane.xlu0 %1980 }
 0x63a   : > { %v1989_v21 = vmul.f32 0.0078125, %v1981_v20 }
 0x63c   : > { %v3925_v22 = vsub.f32 %v1976_v1, %v1989_v21 }
 0x63d   : > { %v1983_v23 = vpop.xlane.xlu1 %1982  ;;  %v1985_v53 = vpop.xlane.xlu0 %1984 }
 0x63e   : > { %v1990_v24 = vmul.f32 0.0078125, %v1983_v23  ;;  %v1991_v25 = vmul.f32 0.0078125, %v1985_v53  ;;  %v1997_v60 = vmul.f32 %v3925_v22, %v3925_v22 }
 0x640   : > { %v3929_v26 = vsub.f32 %v1977_v14, %v1990_v24  ;;  %v3931_v56 = vsub.f32 %v1978_v13, %v1991_v25  ;;  %2001 = vadd.xlane.f32.xlu1 %v1997_v60 }
 0x641   : > { %v1987_v27 = vpop.xlane.xlu0 %1986 }
 0x642   : > { %v1992_v28 = vmul.f32 0.0078125, %v1987_v27  ;;  %v1998_v3 = vmul.f32 %v3929_v26, %v3929_v26  ;;  %v1999_v29 = vmul.f32 %v3931_v56, %v3931_v56 }
 0x644   : > { %v3937_v9 = vsub.f32 %v1979_v8, %v1992_v28  ;;  %2003 = vadd.xlane.f32.xlu0 %v1998_v3  ;;  %2005 = vadd.xlane.f32.xlu1 %v1999_v29  ;;  %v3113_v29 = vld [vmem:[#allocation11 + $0x50] sm:$0xff]  }
 0x645   : > { %2782 = vmatprep.subr.bf16.mxu1 %v3113_v29 }
 0x646   : > { %v2000_v30 = vmul.f32 %v3937_v9, %v3937_v9 }
 0x648   : > { %2007 = vadd.xlane.f32.xlu0 %v2000_v30  ;;  %v3116_v30 = vld [vmem:[#allocation11 + $0x8] sm:$0xff]  }
 0x6c9   : > { %v2002_v50 = vpop.xlane.xlu1 %2001 }
 0x6ca   : > { %v2009_v57 = vmul.f32 0.0078125, %v2002_v50 }
 0x6cc   : > { %v2013_v58 = vadd.f32 1e-05, %v2009_v57 }
 0x6cd   : > { %v2006_v59 = vpop.xlane.xlu1 %2005  ;;  %v2004_v61 = vpop.xlane.xlu0 %2003 }
 0x6ce   : > { %3183 = vrsqrt.f32 %v2013_v58  ;;  %v2011_v62 = vmul.f32 0.0078125, %v2006_v59  ;;  %v2010_v63 = vmul.f32 0.0078125, %v2004_v61 }
 0x6d0   : > { %v2014_v12 = vadd.f32 1e-05, %v2010_v63  ;;  %v2015_v1 = vadd.f32 1e-05, %v2011_v62  ;;  %v2691_v63 = vld [vmem:[%s4045_s10] ss:$0 sm:$0xff] }
 0x6d1   : > { %v2008_v2 = vpop.xlane.xlu0 %2007 }
 0x6d2   : > { %v2012_v4 = vmul.f32 0.0078125, %v2008_v2  ;;  %3185 = vrsqrt.f32 %v2014_v12 }
 0x6d3   : > { %3187 = vrsqrt.f32 %v2015_v1 }
 0x6d4   : > { %v2016_v7 = vadd.f32 1e-05, %v2012_v4 }
 0x6d6   : > { %3189 = vrsqrt.f32 %v2016_v7 }
 0x6db   : > { %v3184_v31 = vpop.eup %3183 }
 0x6dc   : > { %v2021_v14 = vmul.f32 %v3184_v31, %v3925_v22 }
 0x6de   : > { %v2031_v8 = vmul.f32 %v2673_v10, %v2021_v14 }
 0x6df   : > { %v3186_v13 = vpop.eup %3185 }
 0x6e0   : > { %v2022_v15 = vmul.f32 %v3186_v13, %v3929_v26  ;;  %v3188_v18 = vpop.eup %3187  ;;  %v3950_v53 = vadd.f32 %v2674_v19, %v2031_v8 }
 0x6e1   : > { %v2023_v24 = vmul.f32 %v3188_v18, %v3931_v56  ;;  %v3115_v56 = vld [vmem:[#allocation11 + $0x48] sm:$0xff]  }
 0x6e2   : > { %v2032_v21 = vmul.f32 %v2673_v10, %v2022_v15 }
 0x6e3   : > { %v3190_v20 = vpop.eup %3189  ;;  %v2033_v26 = vmul.f32 %v2673_v10, %v2023_v24 }
 0x6e4   : > { %v2024_v23 = vmul.f32 %v3190_v20, %v3937_v9  ;;  %v3952_v22 = vadd.f32 %v2674_v19, %v2032_v21  ;;  %v3114_v9 = vld [vmem:[#allocation11 + $0x10] sm:$0xff]  }
 0x6e5   : > { %v3960_v28 = vadd.f32 %v2674_v19, %v2033_v26  ;;  %2783 = vmatpush3.bf16.msra.mxu1 %v3114_v9 }
 0x6e6   : > { %v2045_v25 = vpack.c.bf16 %v3952_v22, %v3950_v53  ;;  %v2034_v60 = vmul.f32 %v2673_v10, %v2024_v23  ;;  %2784 = vmatprep.subr.bf16.mxu1 %v3115_v56 }
 0x6e8   : > { %2187 = vmatmul.mubr.bf16.vlgmr.msra.gmra.mxu0 %v2045_v25  ;;  %v3958_v27 = vadd.f32 %v2674_v19, %v2034_v60 }
 0x6e9   : > { %2196 = vmatprep.mubr.bf16.mxu0 %v3420_v0  ;;  %2785 = vmatpush3.bf16.msra.mxu1 %v3116_v30  ;;  %v525_v0 = vld [vmem:[%s4043_s8] sm:$0x3] }
 0x6ea   : > { %v2046_v3 = vpack.c.bf16 %v3958_v27, %v3960_v28  ;;  %2786 = vmatprep.subr.bf16.mxu1 %v3117_v6  ;;  %v2071_v39 = vrot.slane %v525_v0, %v574_v34  ;;  %v2067_v40 = vrot.slane %v525_v0, %v570_v38 }
 0x6ed   : > { %2787 = vmatpush3.bf16.msra.mxu1 %v3118_v32 }
 0x6f0   : > { %2197 = vmatmul.mubr.bf16.gmra.mxu0 %v2046_v3 }
 0x7a8   : > { %v2188_v11 = vpop.f32.mrf.mxu0 }
 0x7a9   : > { %v2189_v45 = vadd.f32 %v2188_v11, %v2067_v40 }
 0x7aa   : > { %v2190_v16 = vpop.f32.mrf.mxu0 }
 0x7ab   : > { %v2191_v43 = vadd.f32 %v2190_v16, %v2071_v39  ;;  %v2207_v47 = vmax.f32 %v2189_v45, 0.0 }
 0x7ac   : > { %v2192_v42 = vpop.f32.mrf.mxu0 }
 0x7ad   : > { %v2193_v5 = vadd.f32 %v2192_v42, %v2067_v40  ;;  %v2208_v35 = vmax.f32 %v2191_v43, 0.0 }
 0x7ae   : > { %v2194_v46 = vpop.f32.mrf.mxu0 }
 0x7af   : > { %v2195_v17 = vadd.f32 %v2194_v46, %v2071_v39  ;;  %v2209_v36 = vmax.f32 %v2193_v5, 0.0 }
 0x7b0   : > { %v2198_v48 = vpop.f32.mrf.mxu0 }
 0x7b1   : > { %v2210_v37 = vmax.f32 %v2195_v17, 0.0  ;;  %v2215_v51 = vpack.c.bf16 %v2209_v36, %v2207_v47  ;;  %v2199_v33 = vadd.f32 %v2198_v48, %v2067_v40 }
 0x7b2   : > { %v2200_v41 = vpop.f32.mrf.mxu0 }
 0x7b3   : > { %v2216_v49 = vpack.c.bf16 %v2210_v37, %v2208_v35  ;;  %v2201_v34 = vadd.f32 %v2200_v41, %v2071_v39  ;;  %v2211_v58 = vmax.f32 %v2199_v33, 0.0 }
 0x7b4   : > { %v2202_v52 = vpop.f32.mrf.mxu0 }
 0x7b5   : > { %v2203_v54 = vadd.f32 %v2202_v52, %v2067_v40  ;;  %2385 = vmatprep.mubr.bf16.mxu1 %v2216_v49  ;;  %v2212_v50 = vmax.f32 %v2201_v34, 0.0  ;;  %v2708_v49 = vld [vmem:[%s4046_s11] ss:$0 sm:$0xff] }
 0x7b6   : > { %v2204_v38 = vpop.f32.mrf.mxu0  ;;  %2386 = vmatmul.mubr.bf16.vlgmr.msra.gmra.mxu1 %v2215_v51  ;;  %v2709_v52 = vld [vmem:[%s4047_s12] ss:$0 sm:$0xff] }
 0x7b7   : > { %v2205_v44 = vadd.f32 %v2204_v38, %v2071_v39  ;;  %v2213_v55 = vmax.f32 %v2203_v54, 0.0 }
 0x7b9   : > { %v2214_v57 = vmax.f32 %v2205_v44, 0.0  ;;  %v2217_v61 = vpack.c.bf16 %v2213_v55, %v2211_v58 }
 0x7bb   : > { %v2218_v59 = vpack.c.bf16 %v2214_v57, %v2212_v50 }
 0x7bd   : > { %2393 = vmatprep.mubr.bf16.mxu1 %v2218_v59 }
 0x7be   : > { %2394 = vmatmul.mubr.bf16.gmra.mxu1 %v2217_v61 }
 0x876   : > { %v2788_v62 = vpop.f32.mrf.mxu1 }
 0x878   : > { %v2789_v12 = vpop.f32.mrf.mxu1 }
 0x879   : > { %v2790_v1 = vadd.f32 %v2789_v12, %v2788_v62 }
 0x87a   : > { %v2791_v2 = vpop.f32.mrf.mxu1 }
 0x87b   : > { %v2388_v4 = vadd.f32 %v2790_v1, %v2691_v63 }
 0x87c   : > { %v2792_v7 = vpop.f32.mrf.mxu1 }
 0x87d   : > { %v2793_v31 = vadd.f32 %v2792_v7, %v2791_v2  ;;  %v2402_v14 = vadd.f32 %v2388_v4, %v3950_v53 }
 0x87e   : > { %v2794_v10 = vpop.f32.mrf.mxu1 }
 0x87f   : > { %v2391_v13 = vadd.f32 %v2793_v31, %v2691_v63  ;;  %2406 = vadd.xlane.f32.xlu1 %v2402_v14 }
 0x880   : > { %v2795_v15 = vpop.f32.mrf.mxu1 }
 0x881   : > { %v2796_v8 = vadd.f32 %v2795_v15, %v2794_v10  ;;  %v2403_v18 = vadd.f32 %v2391_v13, %v3952_v22 }
 0x882   : > { %v2797_v19 = vpop.f32.mrf.mxu1 }
 0x883   : > { %v2396_v20 = vadd.f32 %v2796_v8, %v2691_v63  ;;  %2408 = vadd.xlane.f32.xlu0 %v2403_v18 }
 0x884   : > { %v2798_v21 = vpop.f32.mrf.mxu1 }
 0x885   : > { %v2799_v23 = vadd.f32 %v2798_v21, %v2797_v19  ;;  %v2404_v24 = vadd.f32 %v2396_v20, %v3960_v28 }
 0x887   : > { %v2399_v25 = vadd.f32 %v2799_v23, %v2691_v63  ;;  %2410 = vadd.xlane.f32.xlu1 %v2404_v24 }
 0x889   : > { %v2405_v60 = vadd.f32 %v2399_v25, %v3958_v27 }
 0x88b   : > { %2412 = vadd.xlane.f32.xlu0 %v2405_v60 }
 0x908   : > { %v2407_v53 = vpop.xlane.xlu1 %2406 }
 0x909   : > { %v2414_v26 = vmul.f32 0.0078125, %v2407_v53 }
 0x90b   : > { %v2418_v3 = vsub.f32 %v2402_v14, %v2414_v26 }
 0x90c   : > { %v2409_v29 = vpop.xlane.xlu0 %2408 }
 0x90d   : > { %v2415_v9 = vmul.f32 0.0078125, %v2409_v29  ;;  %v2422_v56 = vmul.f32 %v2418_v3, %v2418_v3 }
 0x90f   : > { %v2419_v30 = vsub.f32 %v2403_v18, %v2415_v9  ;;  %2426 = vadd.xlane.f32.xlu1 %v2422_v56 }
 0x910   : > { %v2411_v22 = vpop.xlane.xlu1 %2410 }
 0x911   : > { %v2416_v6 = vmul.f32 0.0078125, %v2411_v22  ;;  %v2423_v32 = vmul.f32 %v2419_v30, %v2419_v30 }
 0x913   : > { %v2420_v0 = vsub.f32 %v2404_v24, %v2416_v6  ;;  %2428 = vadd.xlane.f32.xlu0 %v2423_v32 }
 0x914   : > { %v2413_v11 = vpop.xlane.xlu0 %2412 }
 0x915   : > { %v2417_v28 = vmul.f32 0.0078125, %v2413_v11  ;;  %v2424_v39 = vmul.f32 %v2420_v0, %v2420_v0 }
 0x917   : > { %v2421_v40 = vsub.f32 %v2405_v60, %v2417_v28  ;;  %2430 = vadd.xlane.f32.xlu1 %v2424_v39 }
 0x919   : > { %v2425_v27 = vmul.f32 %v2421_v40, %v2421_v40 }
 0x91b   : > { %2432 = vadd.xlane.f32.xlu0 %v2425_v27 }
 0x998   : > { %v2427_v16 = vpop.xlane.xlu1 %2426 }
 0x999   : > { %v2434_v42 = vmul.f32 0.0078125, %v2427_v16 }
 0x99b   : > { %v2438_v43 = vadd.f32 1e-05, %v2434_v42 }
 0x99c   : > { %v2429_v5 = vpop.xlane.xlu0 %2428 }
 0x99d   : > { %3191 = vrsqrt.f32 %v2438_v43  ;;  %v2435_v45 = vmul.f32 0.0078125, %v2429_v5 }
 0x99f   : > { %v2439_v46 = vadd.f32 1e-05, %v2435_v45 }
 0x9a0   : > { %v2431_v17 = vpop.xlane.xlu1 %2430 }
 0x9a1   : > { %3193 = vrsqrt.f32 %v2439_v46  ;;  %v2436_v36 = vmul.f32 0.0078125, %v2431_v17 }
 0x9a3   : > { %v2440_v48 = vadd.f32 1e-05, %v2436_v36 }
 0x9a4   : > { %v2433_v35 = vpop.xlane.xlu0 %2432 }
 0x9a5   : > { %3195 = vrsqrt.f32 %v2440_v48  ;;  %v2437_v37 = vmul.f32 0.0078125, %v2433_v35 }
 0x9a7   : > { %v2441_v47 = vadd.f32 1e-05, %v2437_v37 }
 0x9a9   : > { %3197 = vrsqrt.f32 %v2441_v47 }
 0x9aa   : > { %v3192_v41 = vpop.eup %3191 }
 0x9ab   : > { %v2446_v51 = vmul.f32 %v3192_v41, %v2418_v3 }
 0x9ad   : > { %v2456_v34 = vmul.f32 %v2708_v49, %v2446_v51 }
 0x9ae   : > { %v3194_v54 = vpop.eup %3193 }
 0x9af   : > { %v2466_v33 = vadd.f32 %v2709_v52, %v2456_v34  ;;  %v2447_v38 = vmul.f32 %v3194_v54, %v2419_v30 }
 0x9b1   : > { %2470 = vst [vmem:[%s517_s19] sm:$0xff] %v2466_v33  ;;  %v2457_v44 = vmul.f32 %v2708_v49, %v2447_v38 }
 0x9b2   : > { %v3196_v55 = vpop.eup %3195 }
 0x9b3   : > { %v2467_v50 = vadd.f32 %v2709_v52, %v2457_v44  ;;  %v2448_v57 = vmul.f32 %v3196_v55, %v2420_v0 }
 0x9b5   : > { %2471 = vst [vmem:[%s517_s19 + $0x8] sm:$0xff] %v2467_v50  ;;  %v2458_v58 = vmul.f32 %v2708_v49, %v2448_v57 }
 0x9b6   : > { %v3198_v59 = vpop.eup %3197 }
 0x9b7   : > { %v2468_v61 = vadd.f32 %v2709_v52, %v2458_v58  ;;  %v2449_v62 = vmul.f32 %v3198_v59, %v2421_v40 }
 0x9b9   : > { %2472 = vst [vmem:[%s517_s19 + $0x10] sm:$0xff] %v2468_v61  ;;  %v2459_v63 = vmul.f32 %v2708_v49, %v2449_v62 }
 0x9bb   : > { %v2469_v12 = vadd.f32 %v2709_v52, %v2459_v63 }
 0x9bd   : > { %2473 = vst [vmem:[%s517_s19 + $0x18] sm:$0xff] %v2469_v12 }
 0x9be   : > { %3348 = shalt.err (!%p3345_p6)
}
 0x9bf   : > { %s3349_s16 = scalar_lea.hbm %s3990_s27, 512  ;;  %s3353_s24 = scalar_lea.hbm %s4048_s13, 1024 }
 0x9c0   : > { %p3350_p2 = scmp.ne.s32.totalorder %s3990_s27, %s3349_s16  ;;  %p3354_p0 = scmp.lt.s32.totalorder %s3990_s27, %s4048_s13 }
 0x9c1   : > { %p3355_p11 = scmp.lt.s32.totalorder %s3353_s24, %s3349_s16 }
 0x9c2   : > { %p3351_p4 = pnand %p3350_p2, %p4083_p7 }
 0x9c3   : > { %p3356_p3 = por %p3355_p11, %p3354_p0 }
 0x9c4   : > { %p3352_p8 = pneg %p3351_p4 }
 0x9c6   : > { %p3357_p12 = pnand %p3356_p3, %p3352_p8 }
 0x9c8   : > { %3360 = shalt.err (!%p3357_p12)
}
 0x9c9   : > { %s3427_s9 = smov 128   ;;  %s3428_s20 = smov 8  }
 0x9ca   : > { %2954 = dma.vmem_to_hbm [thread:$0]  (%p4083_p7), %s3992_s1, 512, %s3990_s27, %s2475_s23, %s3427_s9, %s3427_s9, %s3428_s20  }
 0x9cb PF: > { %s4084_s7 = sld [smem:[#allocation18_spill]]  ;;  %s2504_s29 = sand.u32 1, %s3395_s25  }
 0x9cc   : > { %p4086_p13 = scmp.ge.s32.totalorder %s3407_s28, 2  ;;  %s2505_s3 = scalar_lea.sflag [#allocation5], %s2504_s29 }
 0x9d1   : > { %p4085_p9 = scmp.ne.s32.totalorder %s4084_s7, 0 }
 0x9d3   : > { %p2974_p5 = pnand %p4086_p13, %p4085_p9 }
 0x9d5   : > { %p2975_p10 = pneg %p2974_p5 }
 0x9d7   : > { %3390 = dma.done.wait (%p2975_p10), %s2505_s3, 512  }
 0x9d8   : > { %3392 = vsyncadd (%p2975_p10), %s2505_s3, 4294966784  ;;  %s4087_s14 = sld [smem:[#allocation17_spill]]  ;;  %p28_p1 = scmp.ge.s32.totalorder %s3590_s22, 4  }
 0x9d9   : > { %s4088_s27 = sld [smem:[#allocation19_spill]]  ;;  %s4089_s25 = smov %s3399_s26 }
 0x9da   : > { %s4091_s28 = smov %s3590_s22  ;;  %30 = sbr.rel (!%p28_p1) target bundleno = 12 (0xc), region = 133 }
 0x9de   : > { %s4090_s26 = smov %s4087_s14 }
 0x9df   :  { %2510 = vsyncpa [#allocation4], 1 }
 0x9e0   :  { %2512 = vsyncpa [#allocation4 + $0x1], 1 }
 0x9e1   :  { %2513 = vsyncpa [#allocation7], 1 }
 0x9e2   :  { %2514 = vsyncpa [#allocation10], 1 }
 0x9e3   :  { %2515 = vsyncpa [#allocation5], 1 }
 0x9e4   :  { %2517 = vsyncpa [#allocation5 + $0x1], 1 }

</bundles_post_ra>
